<compile_context>
chip_gen: v6e
topology: v6e:2x2x1
jax: 0.10.0
libtpu: 0.0.40
codegen_flags: <defaults>
</compile_context>

<pallas_src>
import functools

import jax
import jax.numpy as jnp
from jax.experimental import pallas as pl
from jax.experimental.pallas import tpu as pltpu


def _round_up(x, m):
    return (x + m - 1) // m * m


def _pad_to(a, shape):
    pads = [(0, t - s) for s, t in zip(a.shape, shape)]
    return jnp.pad(a, pads)


# ----------------------------------------------------------------------------
# Fused kernel: synthetic encoder + classifier head for one batch tile.
# ----------------------------------------------------------------------------
def finetuner_kernel(patches_ref, w_emb_ref, b_emb_ref,
                     w_proj_ref, b_proj_ref,
                     w_cls_ref, b_cls_ref, out_ref):
    P, TB, D = patches_ref.shape          # patch-major layout: (P, tile_b, D)
    Ep = w_emb_ref.shape[1]

    w_emb = w_emb_ref[...]                # (D, Ep) bf16, VMEM-resident
    b_emb = b_emb_ref[...]                # (1, Ep) f32

    # Patch embed + mean pool, accumulated one patch at a time over the leading dim
    # (statically unrolled; keeps the reduction on the VPU and avoids a (TB*P, Ep)
    # f32 live set at large tile_b).
    pooled = jnp.zeros((TB, Ep), jnp.float32)
    for j in range(P):                    # P is static at trace time
        e = jnp.dot(patches_ref[j], w_emb, preferred_element_type=jnp.float32)
        pooled = pooled + jnp.maximum(e + b_emb, 0.0)
    pooled = pooled * jnp.float32(1.0 / P)          # mean pool: 1/P applied in f32

    # Projection to the encoder feature space (feat_dim), ReLU.
    feat = jnp.dot(pooled.astype(w_proj_ref.dtype), w_proj_ref[...],
                   preferred_element_type=jnp.float32) + b_proj_ref[...]
    feat = jnp.maximum(feat, 0.0)                   # (TB, Fp) f32

    # Classifier head: nn.Linear(feat_dim, num_classes), zero-padded to 128 lanes.
    logits = jnp.dot(feat.astype(w_cls_ref.dtype), w_cls_ref[...],
                     preferred_element_type=jnp.float32) + b_cls_ref[...]
    out_ref[...] = logits.astype(out_ref.dtype)


# ----------------------------------------------------------------------------
# Host-side wrapper: patchify (bf16), pad lane dims, run the kernel.
# ----------------------------------------------------------------------------
@functools.partial(
    jax.jit,
    static_argnames=("patch_size", "num_classes", "tile_b", "single_buffer_weights"))
def _forward_impl(x_nchw, w_emb, b_emb, w_proj, b_proj, w_cls, b_cls, *,
                  patch_size, num_classes, tile_b, single_buffer_weights):
    B, C, H, W = x_nchw.shape
    p = patch_size
    nh, nw = H // p, W // p
    P = nh * nw
    D = C * p * p
    E = w_emb.shape[1]
    F = w_proj.shape[1]

    # Patchify NCHW -> (P, B, D).  Cast to bf16 FIRST so the transpose moves half the
    # bytes; patch-major layout lets the kernel pool with leading-dim slices only.
    xb = x_nchw.astype(jnp.bfloat16)
    patches = xb.reshape(B, C, nh, p, nw, p).transpose(2, 4, 0, 1, 3, 5)
    patches = patches.reshape(P, B, D)

    # Batch tile: primary tuning knob (MXU M dim + pipeline granularity).
    bp8 = _round_up(B, 8)
    tile = max(8, min(_round_up(tile_b, 8), bp8))
    # v7x megacore: prefer >= 2 grid steps so the "parallel" batch axis can shard
    # across both TensorCores (perf-neutral on single-core v5e/v6e).
    if bp8 >= 16 and bp8 // tile < 2:
        tile = max(8, _round_up(bp8 // 2, 8))
    Bp = _round_up(B, tile)

    # Lane-dense padding everywhere except the streamed patch dim D (kept full-extent
    # so the dominant HBM stream is not doubled).
    Ep = _round_up(E, 128)
    Fp = _round_up(F, 128)
    Np = _round_up(num_classes, 128)

    patches_p = _pad_to(patches, (P, Bp, D))                       # bf16
    w_emb_p = _pad_to(w_emb, (D, Ep)).astype(jnp.bfloat16)
    b_emb_p = _pad_to(b_emb, (1, Ep)).astype(jnp.float32)
    w_proj_p = _pad_to(w_proj, (Ep, Fp)).astype(jnp.bfloat16)      # unscaled (1/P in-kernel)
    b_proj_p = _pad_to(b_proj, (1, Fp)).astype(jnp.float32)
    w_cls_p = _pad_to(w_cls, (Fp, Np)).astype(jnp.bfloat16)
    b_cls_p = _pad_to(b_cls, (1, Np)).astype(jnp.float32)

    def w_spec(shape):
        zeros = (0,) * len(shape)
        if single_buffer_weights:
            # Constant index_map -> DMA'd once; Buffered(1) drops the second buffer.
            return pl.BlockSpec(shape, lambda i: zeros, pipeline_mode=pl.Buffered(1))
        return pl.BlockSpec(shape, lambda i: zeros)

    grid = (Bp // tile,)
    flops = 2 * Bp * P * D * Ep + 2 * Bp * Ep * Fp + 2 * Bp * Fp * Np
    bytes_accessed = (
        2 * (patches_p.size + w_emb_p.size + w_proj_p.size + w_cls_p.size)
        + 4 * (b_emb_p.size + b_proj_p.size + b_cls_p.size)
        + 4 * Bp * Np)

    out = pl.pallas_call(
        finetuner_kernel,
        out_shape=jax.ShapeDtypeStruct((Bp, Np), jnp.float32),
        grid=grid,
        in_specs=[
            # streamed per batch tile (double-buffered by the Pallas pipeline)
            pl.BlockSpec((P, tile, D), lambda i: (0, i, 0)),
            # weights/biases: constant index_map -> VMEM-resident
            w_spec((D, Ep)), w_spec((1, Ep)),
            w_spec((Ep, Fp)), w_spec((1, Fp)),
            w_spec((Fp, Np)), w_spec((1, Np)),
        ],
        out_specs=pl.BlockSpec((tile, Np), lambda i: (i, 0)),
        compiler_params=pltpu.CompilerParams(
            dimension_semantics=("parallel",),
            # Raise the scoped-VMEM default (16 MiB v5e / 32 MiB v6e,v7x) so large
            # batch tiles fit; 64 MiB stays within every generation's physical VMEM.
            vmem_limit_bytes=64 * 1024 * 1024),
        cost_estimate=pl.CostEstimate(
            flops=flops, transcendentals=0, bytes_accessed=bytes_accessed),
    )(patches_p, w_emb_p, b_emb_p, w_proj_p, b_proj_p, w_cls_p, b_cls_p)

    # Drop batch padding and the zero-padded classifier columns.
    return out[:B, :num_classes]


def finetuner_pcseg_forward(x_nchw, params, *, patch_size=4, num_classes, tile_b=256):
    """x_nchw: (B, C, H, W) float32 -> (B, num_classes) float32 logits.

    tile_b is the primary perf knob: sweep 128-512 (cap ~512 on v7x's 64 MiB VMEM;
    1024-2048 is profitable on v5e/v6e for large B).
    """
    args = (x_nchw,
            params['w_emb'], params['b_emb'],
            params['w_proj'], params['b_proj'],
            params['w_cls'], params['b_cls'])
    kwargs = dict(patch_size=patch_size, num_classes=num_classes, tile_b=tile_b)
    try:
        return _forward_impl(*args, single_buffer_weights=True, **kwargs)
    except Exception:
        # pl.Buffered(1) not supported by this jax/Mosaic build -> fall back to the
        # default double-buffered weight pipeline (identical numerics).
        return _forward_impl(*args, single_buffer_weights=False, **kwargs)


# ----------------------------------------------------------------------------
# Deterministic parameter construction (synthetic; no checkpoint loading)
# ----------------------------------------------------------------------------
def make_params(key, *, in_channels, patch_size, embed_dim, feat_dim, num_classes):
    patch_dim = in_channels * patch_size * patch_size
    keys = jax.random.split(key, 6)

    def linear_init(kw, kb, fan_in, fan_out):
        bound = 1.0 / (fan_in ** 0.5)
        w = jax.random.uniform(kw, (fan_in, fan_out), jnp.float32, -bound, bound)
        b = jax.random.uniform(kb, (1, fan_out), jnp.float32, -bound, bound)
        return w, b

    # synthetic encoder (stands in for the timm/torchvision backbone)
    w_emb, b_emb = linear_init(keys[0], keys[1], patch_dim, embed_dim)
    w_proj, b_proj = linear_init(keys[2], keys[3], embed_dim, feat_dim)
    # classifier = nn.Linear(encoder.classifier.in_features, configs['num_classes'])
    w_cls, b_cls = linear_init(keys[4], keys[5], feat_dim, num_classes)

    return {'w_emb': w_emb, 'b_emb': b_emb,
            'w_proj': w_proj, 'b_proj': b_proj,
            'w_cls': w_cls, 'b_cls': b_cls}


def reference_forward(x_nchw, params, *, patch_size, num_classes):
    """Pure-JAX f32 reference of the same synthetic encoder + classifier head."""
    B, C, H, W = x_nchw.shape
    p = patch_size
    P = (H // p) * (W // p)
    D = C * p * p
    patches = x_nchw.reshape(B, C, H // p, p, W // p, p)
    patches = patches.transpose(0, 2, 4, 1, 3, 5).reshape(B, P, D)
    emb = jnp.maximum(patches @ params['w_emb'] + params['b_emb'], 0.0)
    pooled = emb.mean(axis=1)
    feat = jnp.maximum(pooled @ params['w_proj'] + params['b_proj'], 0.0)
    return feat @ params['w_cls'] + params['b_cls']


if __name__ == "__main__":
    configs = {'num_classes': 10}
    B, C, H, W = 2, 4, 16, 16
    PATCH = 4
    EMBED = 32
    FEAT = 2048   # encoder.classifier.in_features

    key = jax.random.PRNGKey(0)
    k_params, k_x = jax.random.split(key)

    params = make_params(
        k_params,
        in_channels=C, patch_size=PATCH, embed_dim=EMBED, feat_dim=FEAT,
        num_classes=configs['num_classes'],
    )

    x = jax.random.normal(k_x, (B, C, H, W), jnp.float32)

    logits = finetuner_pcseg_forward(
        x, params, patch_size=PATCH, num_classes=configs['num_classes'])
    jax.block_until_ready(logits)

    assert logits.shape == (B, configs['num_classes'])
    assert bool(jnp.all(jnp.isfinite(logits)))

    ref = reference_forward(x, params, patch_size=PATCH,
                            num_classes=configs['num_classes'])
    assert bool(jnp.allclose(logits, ref, atol=5e-2, rtol=5e-2)), (
        float(jnp.max(jnp.abs(logits - ref))))

    print("KERNEL_OK")
</pallas_src>

<mosaic_0001>
module attributes {stable_mosaic.version = 11 : i64} {
  func.func @finetuner_kernel(%arg0: i32, %arg1: memref<16x8x64xbf16, #tpu.memory_space<vmem>>, %arg2: memref<64x128xbf16, #tpu.memory_space<vmem>>, %arg3: memref<1x128xf32, #tpu.memory_space<vmem>>, %arg4: memref<128x2048xbf16, #tpu.memory_space<vmem>>, %arg5: memref<1x2048xf32, #tpu.memory_space<vmem>>, %arg6: memref<2048x128xbf16, #tpu.memory_space<vmem>>, %arg7: memref<1x128xf32, #tpu.memory_space<vmem>>, %arg8: memref<8x128xf32, #tpu.memory_space<vmem>>) attributes {dimension_semantics = [#tpu.dimension_semantics<parallel>], iteration_bounds = array<i64: 1>, scalar_prefetch = 0 : i64, scratch_operands = 0 : i64, tpu.core_type = #tpu.core_type<tc>, window_params = [{transform_indices = @transform_0, window_bounds = array<i64: 16, 8, 64>}, {pipeline_mode = #tpu.pipeline_mode<synchronous>, transform_indices = @transform_1, window_bounds = array<i64: 64, 128>}, {pipeline_mode = #tpu.pipeline_mode<synchronous>, transform_indices = @transform_2, window_bounds = array<i64: 1, 128>}, {pipeline_mode = #tpu.pipeline_mode<synchronous>, transform_indices = @transform_3, window_bounds = array<i64: 128, 2048>}, {pipeline_mode = #tpu.pipeline_mode<synchronous>, transform_indices = @transform_4, window_bounds = array<i64: 1, 2048>}, {pipeline_mode = #tpu.pipeline_mode<synchronous>, transform_indices = @transform_5, window_bounds = array<i64: 2048, 128>}, {pipeline_mode = #tpu.pipeline_mode<synchronous>, transform_indices = @transform_6, window_bounds = array<i64: 1, 128>}, {transform_indices = @transform_7, window_bounds = array<i64: 8, 128>}]} {
    %c0 = arith.constant 0 : index
    %c0_0 = arith.constant 0 : index
    %0 = vector.load %arg2[%c0, %c0_0] : memref<64x128xbf16, #tpu.memory_space<vmem>>, vector<64x128xbf16>
    %c0_1 = arith.constant 0 : index
    %c0_2 = arith.constant 0 : index
    %1 = vector.load %arg3[%c0_1, %c0_2] : memref<1x128xf32, #tpu.memory_space<vmem>>, vector<1x128xf32>
    %cst = arith.constant 0.000000e+00 : f32
    %2 = vector.broadcast %cst : f32 to vector<8x128xf32>
    %c0_3 = arith.constant 0 : index
    %c0_4 = arith.constant 0 : index
    %c0_5 = arith.constant 0 : index
    %3 = vector.load %arg1[%c0_3, %c0_4, %c0_5] : memref<16x8x64xbf16, #tpu.memory_space<vmem>>, vector<1x8x64xbf16>
    %4 = vector.shape_cast %3 : vector<1x8x64xbf16> to vector<8x64xbf16>
    %cst_6 = arith.constant dense<0.000000e+00> : vector<8x128xf32>
    %5 = tpu.matmul %4, %0, %cst_6 {dimension_numbers = #tpu.dot_dimension_numbers<[1], [0], [0], [1], [0, 0, 1, 1], [], []>} : vector<8x64xbf16>, vector<64x128xbf16>, vector<8x128xf32> -> vector<8x128xf32>
    %6 = vector.broadcast %1 : vector<1x128xf32> to vector<8x128xf32>
    %7 = arith.addf %5, %6 : vector<8x128xf32>
    %cst_7 = arith.constant 0.000000e+00 : f32
    %8 = vector.broadcast %cst_7 : f32 to vector<8x128xf32>
    %9 = arith.maximumf %7, %8 : vector<8x128xf32>
    %10 = arith.addf %2, %9 : vector<8x128xf32>
    %c1 = arith.constant 1 : index
    %c0_8 = arith.constant 0 : index
    %c0_9 = arith.constant 0 : index
    %11 = vector.load %arg1[%c1, %c0_8, %c0_9] : memref<16x8x64xbf16, #tpu.memory_space<vmem>>, vector<1x8x64xbf16>
    %12 = vector.shape_cast %11 : vector<1x8x64xbf16> to vector<8x64xbf16>
    %cst_10 = arith.constant dense<0.000000e+00> : vector<8x128xf32>
    %13 = tpu.matmul %12, %0, %cst_10 {dimension_numbers = #tpu.dot_dimension_numbers<[1], [0], [0], [1], [0, 0, 1, 1], [], []>} : vector<8x64xbf16>, vector<64x128xbf16>, vector<8x128xf32> -> vector<8x128xf32>
    %14 = vector.broadcast %1 : vector<1x128xf32> to vector<8x128xf32>
    %15 = arith.addf %13, %14 : vector<8x128xf32>
    %cst_11 = arith.constant 0.000000e+00 : f32
    %16 = vector.broadcast %cst_11 : f32 to vector<8x128xf32>
    %17 = arith.maximumf %15, %16 : vector<8x128xf32>
    %18 = arith.addf %10, %17 : vector<8x128xf32>
    %c2 = arith.constant 2 : index
    %c0_12 = arith.constant 0 : index
    %c0_13 = arith.constant 0 : index
    %19 = vector.load %arg1[%c2, %c0_12, %c0_13] : memref<16x8x64xbf16, #tpu.memory_space<vmem>>, vector<1x8x64xbf16>
    %20 = vector.shape_cast %19 : vector<1x8x64xbf16> to vector<8x64xbf16>
    %cst_14 = arith.constant dense<0.000000e+00> : vector<8x128xf32>
    %21 = tpu.matmul %20, %0, %cst_14 {dimension_numbers = #tpu.dot_dimension_numbers<[1], [0], [0], [1], [0, 0, 1, 1], [], []>} : vector<8x64xbf16>, vector<64x128xbf16>, vector<8x128xf32> -> vector<8x128xf32>
    %22 = vector.broadcast %1 : vector<1x128xf32> to vector<8x128xf32>
    %23 = arith.addf %21, %22 : vector<8x128xf32>
    %cst_15 = arith.constant 0.000000e+00 : f32
    %24 = vector.broadcast %cst_15 : f32 to vector<8x128xf32>
    %25 = arith.maximumf %23, %24 : vector<8x128xf32>
    %26 = arith.addf %18, %25 : vector<8x128xf32>
    %c3 = arith.constant 3 : index
    %c0_16 = arith.constant 0 : index
    %c0_17 = arith.constant 0 : index
    %27 = vector.load %arg1[%c3, %c0_16, %c0_17] : memref<16x8x64xbf16, #tpu.memory_space<vmem>>, vector<1x8x64xbf16>
    %28 = vector.shape_cast %27 : vector<1x8x64xbf16> to vector<8x64xbf16>
    %cst_18 = arith.constant dense<0.000000e+00> : vector<8x128xf32>
    %29 = tpu.matmul %28, %0, %cst_18 {dimension_numbers = #tpu.dot_dimension_numbers<[1], [0], [0], [1], [0, 0, 1, 1], [], []>} : vector<8x64xbf16>, vector<64x128xbf16>, vector<8x128xf32> -> vector<8x128xf32>
    %30 = vector.broadcast %1 : vector<1x128xf32> to vector<8x128xf32>
    %31 = arith.addf %29, %30 : vector<8x128xf32>
    %cst_19 = arith.constant 0.000000e+00 : f32
    %32 = vector.broadcast %cst_19 : f32 to vector<8x128xf32>
    %33 = arith.maximumf %31, %32 : vector<8x128xf32>
    %34 = arith.addf %26, %33 : vector<8x128xf32>
    %c4 = arith.constant 4 : index
    %c0_20 = arith.constant 0 : index
    %c0_21 = arith.constant 0 : index
    %35 = vector.load %arg1[%c4, %c0_20, %c0_21] : memref<16x8x64xbf16, #tpu.memory_space<vmem>>, vector<1x8x64xbf16>
    %36 = vector.shape_cast %35 : vector<1x8x64xbf16> to vector<8x64xbf16>
    %cst_22 = arith.constant dense<0.000000e+00> : vector<8x128xf32>
    %37 = tpu.matmul %36, %0, %cst_22 {dimension_numbers = #tpu.dot_dimension_numbers<[1], [0], [0], [1], [0, 0, 1, 1], [], []>} : vector<8x64xbf16>, vector<64x128xbf16>, vector<8x128xf32> -> vector<8x128xf32>
    %38 = vector.broadcast %1 : vector<1x128xf32> to vector<8x128xf32>
    %39 = arith.addf %37, %38 : vector<8x128xf32>
    %cst_23 = arith.constant 0.000000e+00 : f32
    %40 = vector.broadcast %cst_23 : f32 to vector<8x128xf32>
    %41 = arith.maximumf %39, %40 : vector<8x128xf32>
    %42 = arith.addf %34, %41 : vector<8x128xf32>
    %c5 = arith.constant 5 : index
    %c0_24 = arith.constant 0 : index
    %c0_25 = arith.constant 0 : index
    %43 = vector.load %arg1[%c5, %c0_24, %c0_25] : memref<16x8x64xbf16, #tpu.memory_space<vmem>>, vector<1x8x64xbf16>
    %44 = vector.shape_cast %43 : vector<1x8x64xbf16> to vector<8x64xbf16>
    %cst_26 = arith.constant dense<0.000000e+00> : vector<8x128xf32>
    %45 = tpu.matmul %44, %0, %cst_26 {dimension_numbers = #tpu.dot_dimension_numbers<[1], [0], [0], [1], [0, 0, 1, 1], [], []>} : vector<8x64xbf16>, vector<64x128xbf16>, vector<8x128xf32> -> vector<8x128xf32>
    %46 = vector.broadcast %1 : vector<1x128xf32> to vector<8x128xf32>
    %47 = arith.addf %45, %46 : vector<8x128xf32>
    %cst_27 = arith.constant 0.000000e+00 : f32
    %48 = vector.broadcast %cst_27 : f32 to vector<8x128xf32>
    %49 = arith.maximumf %47, %48 : vector<8x128xf32>
    %50 = arith.addf %42, %49 : vector<8x128xf32>
    %c6 = arith.constant 6 : index
    %c0_28 = arith.constant 0 : index
    %c0_29 = arith.constant 0 : index
    %51 = vector.load %arg1[%c6, %c0_28, %c0_29] : memref<16x8x64xbf16, #tpu.memory_space<vmem>>, vector<1x8x64xbf16>
    %52 = vector.shape_cast %51 : vector<1x8x64xbf16> to vector<8x64xbf16>
    %cst_30 = arith.constant dense<0.000000e+00> : vector<8x128xf32>
    %53 = tpu.matmul %52, %0, %cst_30 {dimension_numbers = #tpu.dot_dimension_numbers<[1], [0], [0], [1], [0, 0, 1, 1], [], []>} : vector<8x64xbf16>, vector<64x128xbf16>, vector<8x128xf32> -> vector<8x128xf32>
    %54 = vector.broadcast %1 : vector<1x128xf32> to vector<8x128xf32>
    %55 = arith.addf %53, %54 : vector<8x128xf32>
    %cst_31 = arith.constant 0.000000e+00 : f32
    %56 = vector.broadcast %cst_31 : f32 to vector<8x128xf32>
    %57 = arith.maximumf %55, %56 : vector<8x128xf32>
    %58 = arith.addf %50, %57 : vector<8x128xf32>
    %c7 = arith.constant 7 : index
    %c0_32 = arith.constant 0 : index
    %c0_33 = arith.constant 0 : index
    %59 = vector.load %arg1[%c7, %c0_32, %c0_33] : memref<16x8x64xbf16, #tpu.memory_space<vmem>>, vector<1x8x64xbf16>
    %60 = vector.shape_cast %59 : vector<1x8x64xbf16> to vector<8x64xbf16>
    %cst_34 = arith.constant dense<0.000000e+00> : vector<8x128xf32>
    %61 = tpu.matmul %60, %0, %cst_34 {dimension_numbers = #tpu.dot_dimension_numbers<[1], [0], [0], [1], [0, 0, 1, 1], [], []>} : vector<8x64xbf16>, vector<64x128xbf16>, vector<8x128xf32> -> vector<8x128xf32>
    %62 = vector.broadcast %1 : vector<1x128xf32> to vector<8x128xf32>
    %63 = arith.addf %61, %62 : vector<8x128xf32>
    %cst_35 = arith.constant 0.000000e+00 : f32
    %64 = vector.broadcast %cst_35 : f32 to vector<8x128xf32>
    %65 = arith.maximumf %63, %64 : vector<8x128xf32>
    %66 = arith.addf %58, %65 : vector<8x128xf32>
    %c8 = arith.constant 8 : index
    %c0_36 = arith.constant 0 : index
    %c0_37 = arith.constant 0 : index
    %67 = vector.load %arg1[%c8, %c0_36, %c0_37] : memref<16x8x64xbf16, #tpu.memory_space<vmem>>, vector<1x8x64xbf16>
    %68 = vector.shape_cast %67 : vector<1x8x64xbf16> to vector<8x64xbf16>
    %cst_38 = arith.constant dense<0.000000e+00> : vector<8x128xf32>
    %69 = tpu.matmul %68, %0, %cst_38 {dimension_numbers = #tpu.dot_dimension_numbers<[1], [0], [0], [1], [0, 0, 1, 1], [], []>} : vector<8x64xbf16>, vector<64x128xbf16>, vector<8x128xf32> -> vector<8x128xf32>
    %70 = vector.broadcast %1 : vector<1x128xf32> to vector<8x128xf32>
    %71 = arith.addf %69, %70 : vector<8x128xf32>
    %cst_39 = arith.constant 0.000000e+00 : f32
    %72 = vector.broadcast %cst_39 : f32 to vector<8x128xf32>
    %73 = arith.maximumf %71, %72 : vector<8x128xf32>
    %74 = arith.addf %66, %73 : vector<8x128xf32>
    %c9 = arith.constant 9 : index
    %c0_40 = arith.constant 0 : index
    %c0_41 = arith.constant 0 : index
    %75 = vector.load %arg1[%c9, %c0_40, %c0_41] : memref<16x8x64xbf16, #tpu.memory_space<vmem>>, vector<1x8x64xbf16>
    %76 = vector.shape_cast %75 : vector<1x8x64xbf16> to vector<8x64xbf16>
    %cst_42 = arith.constant dense<0.000000e+00> : vector<8x128xf32>
    %77 = tpu.matmul %76, %0, %cst_42 {dimension_numbers = #tpu.dot_dimension_numbers<[1], [0], [0], [1], [0, 0, 1, 1], [], []>} : vector<8x64xbf16>, vector<64x128xbf16>, vector<8x128xf32> -> vector<8x128xf32>
    %78 = vector.broadcast %1 : vector<1x128xf32> to vector<8x128xf32>
    %79 = arith.addf %77, %78 : vector<8x128xf32>
    %cst_43 = arith.constant 0.000000e+00 : f32
    %80 = vector.broadcast %cst_43 : f32 to vector<8x128xf32>
    %81 = arith.maximumf %79, %80 : vector<8x128xf32>
    %82 = arith.addf %74, %81 : vector<8x128xf32>
    %c10 = arith.constant 10 : index
    %c0_44 = arith.constant 0 : index
    %c0_45 = arith.constant 0 : index
    %83 = vector.load %arg1[%c10, %c0_44, %c0_45] : memref<16x8x64xbf16, #tpu.memory_space<vmem>>, vector<1x8x64xbf16>
    %84 = vector.shape_cast %83 : vector<1x8x64xbf16> to vector<8x64xbf16>
    %cst_46 = arith.constant dense<0.000000e+00> : vector<8x128xf32>
    %85 = tpu.matmul %84, %0, %cst_46 {dimension_numbers = #tpu.dot_dimension_numbers<[1], [0], [0], [1], [0, 0, 1, 1], [], []>} : vector<8x64xbf16>, vector<64x128xbf16>, vector<8x128xf32> -> vector<8x128xf32>
    %86 = vector.broadcast %1 : vector<1x128xf32> to vector<8x128xf32>
    %87 = arith.addf %85, %86 : vector<8x128xf32>
    %cst_47 = arith.constant 0.000000e+00 : f32
    %88 = vector.broadcast %cst_47 : f32 to vector<8x128xf32>
    %89 = arith.maximumf %87, %88 : vector<8x128xf32>
    %90 = arith.addf %82, %89 : vector<8x128xf32>
    %c11 = arith.constant 11 : index
    %c0_48 = arith.constant 0 : index
    %c0_49 = arith.constant 0 : index
    %91 = vector.load %arg1[%c11, %c0_48, %c0_49] : memref<16x8x64xbf16, #tpu.memory_space<vmem>>, vector<1x8x64xbf16>
    %92 = vector.shape_cast %91 : vector<1x8x64xbf16> to vector<8x64xbf16>
    %cst_50 = arith.constant dense<0.000000e+00> : vector<8x128xf32>
    %93 = tpu.matmul %92, %0, %cst_50 {dimension_numbers = #tpu.dot_dimension_numbers<[1], [0], [0], [1], [0, 0, 1, 1], [], []>} : vector<8x64xbf16>, vector<64x128xbf16>, vector<8x128xf32> -> vector<8x128xf32>
    %94 = vector.broadcast %1 : vector<1x128xf32> to vector<8x128xf32>
    %95 = arith.addf %93, %94 : vector<8x128xf32>
    %cst_51 = arith.constant 0.000000e+00 : f32
    %96 = vector.broadcast %cst_51 : f32 to vector<8x128xf32>
    %97 = arith.maximumf %95, %96 : vector<8x128xf32>
    %98 = arith.addf %90, %97 : vector<8x128xf32>
    %c12 = arith.constant 12 : index
    %c0_52 = arith.constant 0 : index
    %c0_53 = arith.constant 0 : index
    %99 = vector.load %arg1[%c12, %c0_52, %c0_53] : memref<16x8x64xbf16, #tpu.memory_space<vmem>>, vector<1x8x64xbf16>
    %100 = vector.shape_cast %99 : vector<1x8x64xbf16> to vector<8x64xbf16>
    %cst_54 = arith.constant dense<0.000000e+00> : vector<8x128xf32>
    %101 = tpu.matmul %100, %0, %cst_54 {dimension_numbers = #tpu.dot_dimension_numbers<[1], [0], [0], [1], [0, 0, 1, 1], [], []>} : vector<8x64xbf16>, vector<64x128xbf16>, vector<8x128xf32> -> vector<8x128xf32>
    %102 = vector.broadcast %1 : vector<1x128xf32> to vector<8x128xf32>
    %103 = arith.addf %101, %102 : vector<8x128xf32>
    %cst_55 = arith.constant 0.000000e+00 : f32
    %104 = vector.broadcast %cst_55 : f32 to vector<8x128xf32>
    %105 = arith.maximumf %103, %104 : vector<8x128xf32>
    %106 = arith.addf %98, %105 : vector<8x128xf32>
    %c13 = arith.constant 13 : index
    %c0_56 = arith.constant 0 : index
    %c0_57 = arith.constant 0 : index
    %107 = vector.load %arg1[%c13, %c0_56, %c0_57] : memref<16x8x64xbf16, #tpu.memory_space<vmem>>, vector<1x8x64xbf16>
    %108 = vector.shape_cast %107 : vector<1x8x64xbf16> to vector<8x64xbf16>
    %cst_58 = arith.constant dense<0.000000e+00> : vector<8x128xf32>
    %109 = tpu.matmul %108, %0, %cst_58 {dimension_numbers = #tpu.dot_dimension_numbers<[1], [0], [0], [1], [0, 0, 1, 1], [], []>} : vector<8x64xbf16>, vector<64x128xbf16>, vector<8x128xf32> -> vector<8x128xf32>
    %110 = vector.broadcast %1 : vector<1x128xf32> to vector<8x128xf32>
    %111 = arith.addf %109, %110 : vector<8x128xf32>
    %cst_59 = arith.constant 0.000000e+00 : f32
    %112 = vector.broadcast %cst_59 : f32 to vector<8x128xf32>
    %113 = arith.maximumf %111, %112 : vector<8x128xf32>
    %114 = arith.addf %106, %113 : vector<8x128xf32>
    %c14 = arith.constant 14 : index
    %c0_60 = arith.constant 0 : index
    %c0_61 = arith.constant 0 : index
    %115 = vector.load %arg1[%c14, %c0_60, %c0_61] : memref<16x8x64xbf16, #tpu.memory_space<vmem>>, vector<1x8x64xbf16>
    %116 = vector.shape_cast %115 : vector<1x8x64xbf16> to vector<8x64xbf16>
    %cst_62 = arith.constant dense<0.000000e+00> : vector<8x128xf32>
    %117 = tpu.matmul %116, %0, %cst_62 {dimension_numbers = #tpu.dot_dimension_numbers<[1], [0], [0], [1], [0, 0, 1, 1], [], []>} : vector<8x64xbf16>, vector<64x128xbf16>, vector<8x128xf32> -> vector<8x128xf32>
    %118 = vector.broadcast %1 : vector<1x128xf32> to vector<8x128xf32>
    %119 = arith.addf %117, %118 : vector<8x128xf32>
    %cst_63 = arith.constant 0.000000e+00 : f32
    %120 = vector.broadcast %cst_63 : f32 to vector<8x128xf32>
    %121 = arith.maximumf %119, %120 : vector<8x128xf32>
    %122 = arith.addf %114, %121 : vector<8x128xf32>
    %c15 = arith.constant 15 : index
    %c0_64 = arith.constant 0 : index
    %c0_65 = arith.constant 0 : index
    %123 = vector.load %arg1[%c15, %c0_64, %c0_65] : memref<16x8x64xbf16, #tpu.memory_space<vmem>>, vector<1x8x64xbf16>
    %124 = vector.shape_cast %123 : vector<1x8x64xbf16> to vector<8x64xbf16>
    %cst_66 = arith.constant dense<0.000000e+00> : vector<8x128xf32>
    %125 = tpu.matmul %124, %0, %cst_66 {dimension_numbers = #tpu.dot_dimension_numbers<[1], [0], [0], [1], [0, 0, 1, 1], [], []>} : vector<8x64xbf16>, vector<64x128xbf16>, vector<8x128xf32> -> vector<8x128xf32>
    %126 = vector.broadcast %1 : vector<1x128xf32> to vector<8x128xf32>
    %127 = arith.addf %125, %126 : vector<8x128xf32>
    %cst_67 = arith.constant 0.000000e+00 : f32
    %128 = vector.broadcast %cst_67 : f32 to vector<8x128xf32>
    %129 = arith.maximumf %127, %128 : vector<8x128xf32>
    %130 = arith.addf %122, %129 : vector<8x128xf32>
    %cst_68 = arith.constant 6.250000e-02 : f32
    %131 = vector.broadcast %cst_68 : f32 to vector<8x128xf32>
    %132 = arith.mulf %130, %131 : vector<8x128xf32>
    %133 = arith.truncf %132 : vector<8x128xf32> to vector<8x128xbf16>
    %c0_69 = arith.constant 0 : index
    %c0_70 = arith.constant 0 : index
    %134 = vector.load %arg4[%c0_69, %c0_70] : memref<128x2048xbf16, #tpu.memory_space<vmem>>, vector<128x2048xbf16>
    %cst_71 = arith.constant dense<0.000000e+00> : vector<8x2048xf32>
    %135 = tpu.matmul %133, %134, %cst_71 {dimension_numbers = #tpu.dot_dimension_numbers<[1], [0], [0], [1], [0, 0, 1, 1], [], []>} : vector<8x128xbf16>, vector<128x2048xbf16>, vector<8x2048xf32> -> vector<8x2048xf32>
    %c0_72 = arith.constant 0 : index
    %c0_73 = arith.constant 0 : index
    %136 = vector.load %arg5[%c0_72, %c0_73] : memref<1x2048xf32, #tpu.memory_space<vmem>>, vector<1x2048xf32>
    %137 = vector.broadcast %136 : vector<1x2048xf32> to vector<8x2048xf32>
    %138 = arith.addf %135, %137 : vector<8x2048xf32>
    %cst_74 = arith.constant 0.000000e+00 : f32
    %139 = vector.broadcast %cst_74 : f32 to vector<8x2048xf32>
    %140 = arith.maximumf %138, %139 : vector<8x2048xf32>
    %141 = arith.truncf %140 : vector<8x2048xf32> to vector<8x2048xbf16>
    %c0_75 = arith.constant 0 : index
    %c0_76 = arith.constant 0 : index
    %142 = vector.load %arg6[%c0_75, %c0_76] : memref<2048x128xbf16, #tpu.memory_space<vmem>>, vector<2048x128xbf16>
    %cst_77 = arith.constant dense<0.000000e+00> : vector<8x128xf32>
    %143 = tpu.matmul %141, %142, %cst_77 {dimension_numbers = #tpu.dot_dimension_numbers<[1], [0], [0], [1], [0, 0, 1, 1], [], []>} : vector<8x2048xbf16>, vector<2048x128xbf16>, vector<8x128xf32> -> vector<8x128xf32>
    %c0_78 = arith.constant 0 : index
    %c0_79 = arith.constant 0 : index
    %144 = vector.load %arg7[%c0_78, %c0_79] : memref<1x128xf32, #tpu.memory_space<vmem>>, vector<1x128xf32>
    %145 = vector.broadcast %144 : vector<1x128xf32> to vector<8x128xf32>
    %146 = arith.addf %143, %145 : vector<8x128xf32>
    %c0_80 = arith.constant 0 : index
    %c0_81 = arith.constant 0 : index
    %147 = vector.load %arg8[%c0_80, %c0_81] : memref<8x128xf32, #tpu.memory_space<vmem>>, vector<8x128xf32>
    tpu.vector_store %arg8[%c0_80, %c0_81], %146 {strides = array<i32>} : memref<8x128xf32, #tpu.memory_space<vmem>>, vector<8x128xf32>,
    return
  }
  func.func @transform_0(%arg0: i32) -> (i32, i32, i32) {
    %c0_i32 = arith.constant 0 : i32
    %c0_i32_0 = arith.constant 0 : i32
    %c0_i32_1 = arith.constant 0 : i32
    return %c0_i32, %arg0, %c0_i32_0 : i32, i32, i32
  }
  func.func @transform_1(%arg0: i32) -> (i32, i32) {
    %c0_i32 = arith.constant 0 : i32
    %c0_i32_0 = arith.constant 0 : i32
    %c0_i32_1 = arith.constant 0 : i32
    return %c0_i32, %c0_i32_0 : i32, i32
  }
  func.func @transform_2(%arg0: i32) -> (i32, i32) {
    %c0_i32 = arith.constant 0 : i32
    %c0_i32_0 = arith.constant 0 : i32
    %c0_i32_1 = arith.constant 0 : i32
    return %c0_i32, %c0_i32_0 : i32, i32
  }
  func.func @transform_3(%arg0: i32) -> (i32, i32) {
    %c0_i32 = arith.constant 0 : i32
    %c0_i32_0 = arith.constant 0 : i32
    %c0_i32_1 = arith.constant 0 : i32
    return %c0_i32, %c0_i32_0 : i32, i32
  }
  func.func @transform_4(%arg0: i32) -> (i32, i32) {
    %c0_i32 = arith.constant 0 : i32
    %c0_i32_0 = arith.constant 0 : i32
    %c0_i32_1 = arith.constant 0 : i32
    return %c0_i32, %c0_i32_0 : i32, i32
  }
  func.func @transform_5(%arg0: i32) -> (i32, i32) {
    %c0_i32 = arith.constant 0 : i32
    %c0_i32_0 = arith.constant 0 : i32
    %c0_i32_1 = arith.constant 0 : i32
    return %c0_i32, %c0_i32_0 : i32, i32
  }
  func.func @transform_6(%arg0: i32) -> (i32, i32) {
    %c0_i32 = arith.constant 0 : i32
    %c0_i32_0 = arith.constant 0 : i32
    %c0_i32_1 = arith.constant 0 : i32
    return %c0_i32, %c0_i32_0 : i32, i32
  }
  func.func @transform_7(%arg0: i32) -> (i32, i32) {
    %c0_i32 = arith.constant 0 : i32
    %c0_i32_0 = arith.constant 0 : i32
    return %arg0, %c0_i32 : i32, i32
  }
}

module attributes {stable_mosaic.version = 11 : i64} {
  func.func @finetuner_kernel(%arg0: i32, %arg1: memref<16x8x64xbf16, #tpu.memory_space<vmem>>, %arg2: memref<64x128xbf16, #tpu.memory_space<vmem>>, %arg3: memref<1x128xf32, #tpu.memory_space<vmem>>, %arg4: memref<128x2048xbf16, #tpu.memory_space<vmem>>, %arg5: memref<1x2048xf32, #tpu.memory_space<vmem>>, %arg6: memref<2048x128xbf16, #tpu.memory_space<vmem>>, %arg7: memref<1x128xf32, #tpu.memory_space<vmem>>, %arg8: memref<8x128xf32, #tpu.memory_space<vmem>>) attributes {dimension_semantics = [#tpu.dimension_semantics<parallel>], iteration_bounds = array<i64: 1>, scalar_prefetch = 0 : i64, scratch_operands = 0 : i64, tpu.core_type = #tpu.core_type<tc>, window_params = [{transform_indices = @transform_0, window_bounds = array<i64: 16, 8, 64>}, {pipeline_mode = #tpu.pipeline_mode<synchronous>, transform_indices = @transform_1, window_bounds = array<i64: 64, 128>}, {pipeline_mode = #tpu.pipeline_mode<synchronous>, transform_indices = @transform_2, window_bounds = array<i64: 1, 128>}, {pipeline_mode = #tpu.pipeline_mode<synchronous>, transform_indices = @transform_3, window_bounds = array<i64: 128, 2048>}, {pipeline_mode = #tpu.pipeline_mode<synchronous>, transform_indices = @transform_4, window_bounds = array<i64: 1, 2048>}, {pipeline_mode = #tpu.pipeline_mode<synchronous>, transform_indices = @transform_5, window_bounds = array<i64: 2048, 128>}, {pipeline_mode = #tpu.pipeline_mode<synchronous>, transform_indices = @transform_6, window_bounds = array<i64: 1, 128>}, {transform_indices = @transform_7, window_bounds = array<i64: 8, 128>}]} {
    %c0 = arith.constant 0 : index
    %c0_0 = arith.constant 0 : index
    %0 = vector.load %arg2[%c0, %c0_0] : memref<64x128xbf16, #tpu.memory_space<vmem>>, vector<64x128xbf16>
    %c0_1 = arith.constant 0 : index
    %c0_2 = arith.constant 0 : index
    %1 = vector.load %arg3[%c0_1, %c0_2] : memref<1x128xf32, #tpu.memory_space<vmem>>, vector<1x128xf32>
    %cst = arith.constant 0.000000e+00 : f32
    %2 = vector.broadcast %cst : f32 to vector<8x128xf32>
    %c0_3 = arith.constant 0 : index
    %c0_4 = arith.constant 0 : index
    %c0_5 = arith.constant 0 : index
    %3 = vector.load %arg1[%c0_3, %c0_4, %c0_5] : memref<16x8x64xbf16, #tpu.memory_space<vmem>>, vector<1x8x64xbf16>
    %4 = vector.shape_cast %3 : vector<1x8x64xbf16> to vector<8x64xbf16>
    %cst_6 = arith.constant dense<0.000000e+00> : vector<8x128xf32>
    %5 = tpu.matmul %4, %0, %cst_6 {dimension_numbers = #tpu.dot_dimension_numbers<[1], [0], [0], [1], [0, 0, 1, 1], [], []>} : vector<8x64xbf16>, vector<64x128xbf16>, vector<8x128xf32> -> vector<8x128xf32>
    %6 = vector.broadcast %1 : vector<1x128xf32> to vector<8x128xf32>
    %7 = arith.addf %5, %6 : vector<8x128xf32>
    %cst_7 = arith.constant 0.000000e+00 : f32
    %8 = vector.broadcast %cst_7 : f32 to vector<8x128xf32>
    %9 = arith.maximumf %7, %8 : vector<8x128xf32>
    %10 = arith.addf %2, %9 : vector<8x128xf32>
    %c1 = arith.constant 1 : index
    %c0_8 = arith.constant 0 : index
    %c0_9 = arith.constant 0 : index
    %11 = vector.load %arg1[%c1, %c0_8, %c0_9] : memref<16x8x64xbf16, #tpu.memory_space<vmem>>, vector<1x8x64xbf16>
    %12 = vector.shape_cast %11 : vector<1x8x64xbf16> to vector<8x64xbf16>
    %cst_10 = arith.constant dense<0.000000e+00> : vector<8x128xf32>
    %13 = tpu.matmul %12, %0, %cst_10 {dimension_numbers = #tpu.dot_dimension_numbers<[1], [0], [0], [1], [0, 0, 1, 1], [], []>} : vector<8x64xbf16>, vector<64x128xbf16>, vector<8x128xf32> -> vector<8x128xf32>
    %14 = vector.broadcast %1 : vector<1x128xf32> to vector<8x128xf32>
    %15 = arith.addf %13, %14 : vector<8x128xf32>
    %cst_11 = arith.constant 0.000000e+00 : f32
    %16 = vector.broadcast %cst_11 : f32 to vector<8x128xf32>
    %17 = arith.maximumf %15, %16 : vector<8x128xf32>
    %18 = arith.addf %10, %17 : vector<8x128xf32>
    %c2 = arith.constant 2 : index
    %c0_12 = arith.constant 0 : index
    %c0_13 = arith.constant 0 : index
    %19 = vector.load %arg1[%c2, %c0_12, %c0_13] : memref<16x8x64xbf16, #tpu.memory_space<vmem>>, vector<1x8x64xbf16>
    %20 = vector.shape_cast %19 : vector<1x8x64xbf16> to vector<8x64xbf16>
    %cst_14 = arith.constant dense<0.000000e+00> : vector<8x128xf32>
    %21 = tpu.matmul %20, %0, %cst_14 {dimension_numbers = #tpu.dot_dimension_numbers<[1], [0], [0], [1], [0, 0, 1, 1], [], []>} : vector<8x64xbf16>, vector<64x128xbf16>, vector<8x128xf32> -> vector<8x128xf32>
    %22 = vector.broadcast %1 : vector<1x128xf32> to vector<8x128xf32>
    %23 = arith.addf %21, %22 : vector<8x128xf32>
    %cst_15 = arith.constant 0.000000e+00 : f32
    %24 = vector.broadcast %cst_15 : f32 to vector<8x128xf32>
    %25 = arith.maximumf %23, %24 : vector<8x128xf32>
    %26 = arith.addf %18, %25 : vector<8x128xf32>
    %c3 = arith.constant 3 : index
    %c0_16 = arith.constant 0 : index
    %c0_17 = arith.constant 0 : index
    %27 = vector.load %arg1[%c3, %c0_16, %c0_17] : memref<16x8x64xbf16, #tpu.memory_space<vmem>>, vector<1x8x64xbf16>
    %28 = vector.shape_cast %27 : vector<1x8x64xbf16> to vector<8x64xbf16>
    %cst_18 = arith.constant dense<0.000000e+00> : vector<8x128xf32>
    %29 = tpu.matmul %28, %0, %cst_18 {dimension_numbers = #tpu.dot_dimension_numbers<[1], [0], [0], [1], [0, 0, 1, 1], [], []>} : vector<8x64xbf16>, vector<64x128xbf16>, vector<8x128xf32> -> vector<8x128xf32>
    %30 = vector.broadcast %1 : vector<1x128xf32> to vector<8x128xf32>
    %31 = arith.addf %29, %30 : vector<8x128xf32>
    %cst_19 = arith.constant 0.000000e+00 : f32
    %32 = vector.broadcast %cst_19 : f32 to vector<8x128xf32>
    %33 = arith.maximumf %31, %32 : vector<8x128xf32>
    %34 = arith.addf %26, %33 : vector<8x128xf32>
    %c4 = arith.constant 4 : index
    %c0_20 = arith.constant 0 : index
    %c0_21 = arith.constant 0 : index
    %35 = vector.load %arg1[%c4, %c0_20, %c0_21] : memref<16x8x64xbf16, #tpu.memory_space<vmem>>, vector<1x8x64xbf16>
    %36 = vector.shape_cast %35 : vector<1x8x64xbf16> to vector<8x64xbf16>
    %cst_22 = arith.constant dense<0.000000e+00> : vector<8x128xf32>
    %37 = tpu.matmul %36, %0, %cst_22 {dimension_numbers = #tpu.dot_dimension_numbers<[1], [0], [0], [1], [0, 0, 1, 1], [], []>} : vector<8x64xbf16>, vector<64x128xbf16>, vector<8x128xf32> -> vector<8x128xf32>
    %38 = vector.broadcast %1 : vector<1x128xf32> to vector<8x128xf32>
    %39 = arith.addf %37, %38 : vector<8x128xf32>
    %cst_23 = arith.constant 0.000000e+00 : f32
    %40 = vector.broadcast %cst_23 : f32 to vector<8x128xf32>
    %41 = arith.maximumf %39, %40 : vector<8x128xf32>
    %42 = arith.addf %34, %41 : vector<8x128xf32>
    %c5 = arith.constant 5 : index
    %c0_24 = arith.constant 0 : index
    %c0_25 = arith.constant 0 : index
    %43 = vector.load %arg1[%c5, %c0_24, %c0_25] : memref<16x8x64xbf16, #tpu.memory_space<vmem>>, vector<1x8x64xbf16>
    %44 = vector.shape_cast %43 : vector<1x8x64xbf16> to vector<8x64xbf16>
    %cst_26 = arith.constant dense<0.000000e+00> : vector<8x128xf32>
    %45 = tpu.matmul %44, %0, %cst_26 {dimension_numbers = #tpu.dot_dimension_numbers<[1], [0], [0], [1], [0, 0, 1, 1], [], []>} : vector<8x64xbf16>, vector<64x128xbf16>, vector<8x128xf32> -> vector<8x128xf32>
    %46 = vector.broadcast %1 : vector<1x128xf32> to vector<8x128xf32>
    %47 = arith.addf %45, %46 : vector<8x128xf32>
    %cst_27 = arith.constant 0.000000e+00 : f32
    %48 = vector.broadcast %cst_27 : f32 to vector<8x128xf32>
    %49 = arith.maximumf %47, %48 : vector<8x128xf32>
    %50 = arith.addf %42, %49 : vector<8x128xf32>
    %c6 = arith.constant 6 : index
    %c0_28 = arith.constant 0 : index
    %c0_29 = arith.constant 0 : index
    %51 = vector.load %arg1[%c6, %c0_28, %c0_29] : memref<16x8x64xbf16, #tpu.memory_space<vmem>>, vector<1x8x64xbf16>
    %52 = vector.shape_cast %51 : vector<1x8x64xbf16> to vector<8x64xbf16>
    %cst_30 = arith.constant dense<0.000000e+00> : vector<8x128xf32>
    %53 = tpu.matmul %52, %0, %cst_30 {dimension_numbers = #tpu.dot_dimension_numbers<[1], [0], [0], [1], [0, 0, 1, 1], [], []>} : vector<8x64xbf16>, vector<64x128xbf16>, vector<8x128xf32> -> vector<8x128xf32>
    %54 = vector.broadcast %1 : vector<1x128xf32> to vector<8x128xf32>
    %55 = arith.addf %53, %54 : vector<8x128xf32>
    %cst_31 = arith.constant 0.000000e+00 : f32
    %56 = vector.broadcast %cst_31 : f32 to vector<8x128xf32>
    %57 = arith.maximumf %55, %56 : vector<8x128xf32>
    %58 = arith.addf %50, %57 : vector<8x128xf32>
    %c7 = arith.constant 7 : index
    %c0_32 = arith.constant 0 : index
    %c0_33 = arith.constant 0 : index
    %59 = vector.load %arg1[%c7, %c0_32, %c0_33] : memref<16x8x64xbf16, #tpu.memory_space<vmem>>, vector<1x8x64xbf16>
    %60 = vector.shape_cast %59 : vector<1x8x64xbf16> to vector<8x64xbf16>
    %cst_34 = arith.constant dense<0.000000e+00> : vector<8x128xf32>
    %61 = tpu.matmul %60, %0, %cst_34 {dimension_numbers = #tpu.dot_dimension_numbers<[1], [0], [0], [1], [0, 0, 1, 1], [], []>} : vector<8x64xbf16>, vector<64x128xbf16>, vector<8x128xf32> -> vector<8x128xf32>
    %62 = vector.broadcast %1 : vector<1x128xf32> to vector<8x128xf32>
    %63 = arith.addf %61, %62 : vector<8x128xf32>
    %cst_35 = arith.constant 0.000000e+00 : f32
    %64 = vector.broadcast %cst_35 : f32 to vector<8x128xf32>
    %65 = arith.maximumf %63, %64 : vector<8x128xf32>
    %66 = arith.addf %58, %65 : vector<8x128xf32>
    %c8 = arith.constant 8 : index
    %c0_36 = arith.constant 0 : index
    %c0_37 = arith.constant 0 : index
    %67 = vector.load %arg1[%c8, %c0_36, %c0_37] : memref<16x8x64xbf16, #tpu.memory_space<vmem>>, vector<1x8x64xbf16>
    %68 = vector.shape_cast %67 : vector<1x8x64xbf16> to vector<8x64xbf16>
    %cst_38 = arith.constant dense<0.000000e+00> : vector<8x128xf32>
    %69 = tpu.matmul %68, %0, %cst_38 {dimension_numbers = #tpu.dot_dimension_numbers<[1], [0], [0], [1], [0, 0, 1, 1], [], []>} : vector<8x64xbf16>, vector<64x128xbf16>, vector<8x128xf32> -> vector<8x128xf32>
    %70 = vector.broadcast %1 : vector<1x128xf32> to vector<8x128xf32>
    %71 = arith.addf %69, %70 : vector<8x128xf32>
    %cst_39 = arith.constant 0.000000e+00 : f32
    %72 = vector.broadcast %cst_39 : f32 to vector<8x128xf32>
    %73 = arith.maximumf %71, %72 : vector<8x128xf32>
    %74 = arith.addf %66, %73 : vector<8x128xf32>
    %c9 = arith.constant 9 : index
    %c0_40 = arith.constant 0 : index
    %c0_41 = arith.constant 0 : index
    %75 = vector.load %arg1[%c9, %c0_40, %c0_41] : memref<16x8x64xbf16, #tpu.memory_space<vmem>>, vector<1x8x64xbf16>
    %76 = vector.shape_cast %75 : vector<1x8x64xbf16> to vector<8x64xbf16>
    %cst_42 = arith.constant dense<0.000000e+00> : vector<8x128xf32>
    %77 = tpu.matmul %76, %0, %cst_42 {dimension_numbers = #tpu.dot_dimension_numbers<[1], [0], [0], [1], [0, 0, 1, 1], [], []>} : vector<8x64xbf16>, vector<64x128xbf16>, vector<8x128xf32> -> vector<8x128xf32>
    %78 = vector.broadcast %1 : vector<1x128xf32> to vector<8x128xf32>
    %79 = arith.addf %77, %78 : vector<8x128xf32>
    %cst_43 = arith.constant 0.000000e+00 : f32
    %80 = vector.broadcast %cst_43 : f32 to vector<8x128xf32>
    %81 = arith.maximumf %79, %80 : vector<8x128xf32>
    %82 = arith.addf %74, %81 : vector<8x128xf32>
    %c10 = arith.constant 10 : index
    %c0_44 = arith.constant 0 : index
    %c0_45 = arith.constant 0 : index
    %83 = vector.load %arg1[%c10, %c0_44, %c0_45] : memref<16x8x64xbf16, #tpu.memory_space<vmem>>, vector<1x8x64xbf16>
    %84 = vector.shape_cast %83 : vector<1x8x64xbf16> to vector<8x64xbf16>
    %cst_46 = arith.constant dense<0.000000e+00> : vector<8x128xf32>
    %85 = tpu.matmul %84, %0, %cst_46 {dimension_numbers = #tpu.dot_dimension_numbers<[1], [0], [0], [1], [0, 0, 1, 1], [], []>} : vector<8x64xbf16>, vector<64x128xbf16>, vector<8x128xf32> -> vector<8x128xf32>
    %86 = vector.broadcast %1 : vector<1x128xf32> to vector<8x128xf32>
    %87 = arith.addf %85, %86 : vector<8x128xf32>
    %cst_47 = arith.constant 0.000000e+00 : f32
    %88 = vector.broadcast %cst_47 : f32 to vector<8x128xf32>
    %89 = arith.maximumf %87, %88 : vector<8x128xf32>
    %90 = arith.addf %82, %89 : vector<8x128xf32>
    %c11 = arith.constant 11 : index
    %c0_48 = arith.constant 0 : index
    %c0_49 = arith.constant 0 : index
    %91 = vector.load %arg1[%c11, %c0_48, %c0_49] : memref<16x8x64xbf16, #tpu.memory_space<vmem>>, vector<1x8x64xbf16>
    %92 = vector.shape_cast %91 : vector<1x8x64xbf16> to vector<8x64xbf16>
    %cst_50 = arith.constant dense<0.000000e+00> : vector<8x128xf32>
    %93 = tpu.matmul %92, %0, %cst_50 {dimension_numbers = #tpu.dot_dimension_numbers<[1], [0], [0], [1], [0, 0, 1, 1], [], []>} : vector<8x64xbf16>, vector<64x128xbf16>, vector<8x128xf32> -> vector<8x128xf32>
    %94 = vector.broadcast %1 : vector<1x128xf32> to vector<8x128xf32>
    %95 = arith.addf %93, %94 : vector<8x128xf32>
    %cst_51 = arith.constant 0.000000e+00 : f32
    %96 = vector.broadcast %cst_51 : f32 to vector<8x128xf32>
    %97 = arith.maximumf %95, %96 : vector<8x128xf32>
    %98 = arith.addf %90, %97 : vector<8x128xf32>
    %c12 = arith.constant 12 : index
    %c0_52 = arith.constant 0 : index
    %c0_53 = arith.constant 0 : index
    %99 = vector.load %arg1[%c12, %c0_52, %c0_53] : memref<16x8x64xbf16, #tpu.memory_space<vmem>>, vector<1x8x64xbf16>
    %100 = vector.shape_cast %99 : vector<1x8x64xbf16> to vector<8x64xbf16>
    %cst_54 = arith.constant dense<0.000000e+00> : vector<8x128xf32>
    %101 = tpu.matmul %100, %0, %cst_54 {dimension_numbers = #tpu.dot_dimension_numbers<[1], [0], [0], [1], [0, 0, 1, 1], [], []>} : vector<8x64xbf16>, vector<64x128xbf16>, vector<8x128xf32> -> vector<8x128xf32>
    %102 = vector.broadcast %1 : vector<1x128xf32> to vector<8x128xf32>
    %103 = arith.addf %101, %102 : vector<8x128xf32>
    %cst_55 = arith.constant 0.000000e+00 : f32
    %104 = vector.broadcast %cst_55 : f32 to vector<8x128xf32>
    %105 = arith.maximumf %103, %104 : vector<8x128xf32>
    %106 = arith.addf %98, %105 : vector<8x128xf32>
    %c13 = arith.constant 13 : index
    %c0_56 = arith.constant 0 : index
    %c0_57 = arith.constant 0 : index
    %107 = vector.load %arg1[%c13, %c0_56, %c0_57] : memref<16x8x64xbf16, #tpu.memory_space<vmem>>, vector<1x8x64xbf16>
    %108 = vector.shape_cast %107 : vector<1x8x64xbf16> to vector<8x64xbf16>
    %cst_58 = arith.constant dense<0.000000e+00> : vector<8x128xf32>
    %109 = tpu.matmul %108, %0, %cst_58 {dimension_numbers = #tpu.dot_dimension_numbers<[1], [0], [0], [1], [0, 0, 1, 1], [], []>} : vector<8x64xbf16>, vector<64x128xbf16>, vector<8x128xf32> -> vector<8x128xf32>
    %110 = vector.broadcast %1 : vector<1x128xf32> to vector<8x128xf32>
    %111 = arith.addf %109, %110 : vector<8x128xf32>
    %cst_59 = arith.constant 0.000000e+00 : f32
    %112 = vector.broadcast %cst_59 : f32 to vector<8x128xf32>
    %113 = arith.maximumf %111, %112 : vector<8x128xf32>
    %114 = arith.addf %106, %113 : vector<8x128xf32>
    %c14 = arith.constant 14 : index
    %c0_60 = arith.constant 0 : index
    %c0_61 = arith.constant 0 : index
    %115 = vector.load %arg1[%c14, %c0_60, %c0_61] : memref<16x8x64xbf16, #tpu.memory_space<vmem>>, vector<1x8x64xbf16>
    %116 = vector.shape_cast %115 : vector<1x8x64xbf16> to vector<8x64xbf16>
    %cst_62 = arith.constant dense<0.000000e+00> : vector<8x128xf32>
    %117 = tpu.matmul %116, %0, %cst_62 {dimension_numbers = #tpu.dot_dimension_numbers<[1], [0], [0], [1], [0, 0, 1, 1], [], []>} : vector<8x64xbf16>, vector<64x128xbf16>, vector<8x128xf32> -> vector<8x128xf32>
    %118 = vector.broadcast %1 : vector<1x128xf32> to vector<8x128xf32>
    %119 = arith.addf %117, %118 : vector<8x128xf32>
    %cst_63 = arith.constant 0.000000e+00 : f32
    %120 = vector.broadcast %cst_63 : f32 to vector<8x128xf32>
    %121 = arith.maximumf %119, %120 : vector<8x128xf32>
    %122 = arith.addf %114, %121 : vector<8x128xf32>
    %c15 = arith.constant 15 : index
    %c0_64 = arith.constant 0 : index
    %c0_65 = arith.constant 0 : index
    %123 = vector.load %arg1[%c15, %c0_64, %c0_65] : memref<16x8x64xbf16, #tpu.memory_space<vmem>>, vector<1x8x64xbf16>
    %124 = vector.shape_cast %123 : vector<1x8x64xbf16> to vector<8x64xbf16>
    %cst_66 = arith.constant dense<0.000000e+00> : vector<8x128xf32>
    %125 = tpu.matmul %124, %0, %cst_66 {dimension_numbers = #tpu.dot_dimension_numbers<[1], [0], [0], [1], [0, 0, 1, 1], [], []>} : vector<8x64xbf16>, vector<64x128xbf16>, vector<8x128xf32> -> vector<8x128xf32>
    %126 = vector.broadcast %1 : vector<1x128xf32> to vector<8x128xf32>
    %127 = arith.addf %125, %126 : vector<8x128xf32>
    %cst_67 = arith.constant 0.000000e+00 : f32
    %128 = vector.broadcast %cst_67 : f32 to vector<8x128xf32>
    %129 = arith.maximumf %127, %128 : vector<8x128xf32>
    %130 = arith.addf %122, %129 : vector<8x128xf32>
    %cst_68 = arith.constant 6.250000e-02 : f32
    %131 = vector.broadcast %cst_68 : f32 to vector<8x128xf32>
    %132 = arith.mulf %130, %131 : vector<8x128xf32>
    %133 = arith.truncf %132 : vector<8x128xf32> to vector<8x128xbf16>
    %c0_69 = arith.constant 0 : index
    %c0_70 = arith.constant 0 : index
    %134 = vector.load %arg4[%c0_69, %c0_70] : memref<128x2048xbf16, #tpu.memory_space<vmem>>, vector<128x2048xbf16>
    %cst_71 = arith.constant dense<0.000000e+00> : vector<8x2048xf32>
    %135 = tpu.matmul %133, %134, %cst_71 {dimension_numbers = #tpu.dot_dimension_numbers<[1], [0], [0], [1], [0, 0, 1, 1], [], []>} : vector<8x128xbf16>, vector<128x2048xbf16>, vector<8x2048xf32> -> vector<8x2048xf32>
    %c0_72 = arith.constant 0 : index
    %c0_73 = arith.constant 0 : index
    %136 = vector.load %arg5[%c0_72, %c0_73] : memref<1x2048xf32, #tpu.memory_space<vmem>>, vector<1x2048xf32>
    %137 = vector.broadcast %136 : vector<1x2048xf32> to vector<8x2048xf32>
    %138 = arith.addf %135, %137 : vector<8x2048xf32>
    %cst_74 = arith.constant 0.000000e+00 : f32
    %139 = vector.broadcast %cst_74 : f32 to vector<8x2048xf32>
    %140 = arith.maximumf %138, %139 : vector<8x2048xf32>
    %141 = arith.truncf %140 : vector<8x2048xf32> to vector<8x2048xbf16>
    %c0_75 = arith.constant 0 : index
    %c0_76 = arith.constant 0 : index
    %142 = vector.load %arg6[%c0_75, %c0_76] : memref<2048x128xbf16, #tpu.memory_space<vmem>>, vector<2048x128xbf16>
    %cst_77 = arith.constant dense<0.000000e+00> : vector<8x128xf32>
    %143 = tpu.matmul %141, %142, %cst_77 {dimension_numbers = #tpu.dot_dimension_numbers<[1], [0], [0], [1], [0, 0, 1, 1], [], []>} : vector<8x2048xbf16>, vector<2048x128xbf16>, vector<8x128xf32> -> vector<8x128xf32>
    %c0_78 = arith.constant 0 : index
    %c0_79 = arith.constant 0 : index
    %144 = vector.load %arg7[%c0_78, %c0_79] : memref<1x128xf32, #tpu.memory_space<vmem>>, vector<1x128xf32>
    %145 = vector.broadcast %144 : vector<1x128xf32> to vector<8x128xf32>
    %146 = arith.addf %143, %145 : vector<8x128xf32>
    %c0_80 = arith.constant 0 : index
    %c0_81 = arith.constant 0 : index
    %147 = vector.load %arg8[%c0_80, %c0_81] : memref<8x128xf32, #tpu.memory_space<vmem>>, vector<8x128xf32>
    tpu.vector_store %arg8[%c0_80, %c0_81], %146 {strides = array<i32>} : memref<8x128xf32, #tpu.memory_space<vmem>>, vector<8x128xf32>,
    return
  }
  func.func @transform_0(%arg0: i32) -> (i32, i32, i32) {
    %c0_i32 = arith.constant 0 : i32
    %c0_i32_0 = arith.constant 0 : i32
    %c0_i32_1 = arith.constant 0 : i32
    return %c0_i32, %arg0, %c0_i32_0 : i32, i32, i32
  }
  func.func @transform_1(%arg0: i32) -> (i32, i32) {
    %c0_i32 = arith.constant 0 : i32
    %c0_i32_0 = arith.constant 0 : i32
    %c0_i32_1 = arith.constant 0 : i32
    return %c0_i32, %c0_i32_0 : i32, i32
  }
  func.func @transform_2(%arg0: i32) -> (i32, i32) {
    %c0_i32 = arith.constant 0 : i32
    %c0_i32_0 = arith.constant 0 : i32
    %c0_i32_1 = arith.constant 0 : i32
    return %c0_i32, %c0_i32_0 : i32, i32
  }
  func.func @transform_3(%arg0: i32) -> (i32, i32) {
    %c0_i32 = arith.constant 0 : i32
    %c0_i32_0 = arith.constant 0 : i32
    %c0_i32_1 = arith.constant 0 : i32
    return %c0_i32, %c0_i32_0 : i32, i32
  }
  func.func @transform_4(%arg0: i32) -> (i32, i32) {
    %c0_i32 = arith.constant 0 : i32
    %c0_i32_0 = arith.constant 0 : i32
    %c0_i32_1 = arith.constant 0 : i32
    return %c0_i32, %c0_i32_0 : i32, i32
  }
  func.func @transform_5(%arg0: i32) -> (i32, i32) {
    %c0_i32 = arith.constant 0 : i32
    %c0_i32_0 = arith.constant 0 : i32
    %c0_i32_1 = arith.constant 0 : i32
    return %c0_i32, %c0_i32_0 : i32, i32
  }
  func.func @transform_6(%arg0: i32) -> (i32, i32) {
    %c0_i32 = arith.constant 0 : i32
    %c0_i32_0 = arith.constant 0 : i32
    %c0_i32_1 = arith.constant 0 : i32
    return %c0_i32, %c0_i32_0 : i32, i32
  }
  func.func @transform_7(%arg0: i32) -> (i32, i32) {
    %c0_i32 = arith.constant 0 : i32
    %c0_i32_0 = arith.constant 0 : i32
    return %arg0, %c0_i32 : i32, i32
  }
}

</mosaic_0001>

<bundles_post_ra>
// kernel: _forward_impl.1
= control target key start
LH: loop header
LB: loop body
LE: loop exit
PB: predicated region body
PF: predicated region fallthrough
CT: control target
= control target key end

     0   :  { %v4264_v0 = vmov 0.0   ;;  %vm4265_vm0 = vmmov 0   ;;  %vm67_vm1 = vcmask 523264   ;;  %s5452_s1 = inlined_call_operand.vmem [shape: bf16[64,128], index: 1, kind: input, shape index: {}]   ;;  %s5453_s0 = inlined_call_operand.vmem [shape: bf16[16,8,64], index: 0, kind: input, shape index: {}]   ;;  %s5454_s3 = inlined_call_operand.vmem [shape: bf16[128,2048], index: 3, kind: input, shape index: {}]   ;;  %s5455_s2 = inlined_call_operand.vmem [shape: f32[1,128], index: 2, kind: input, shape index: {}]   ;;  %s5456_s5 = inlined_call_operand.vmem [shape: bf16[2048,128], index: 5, kind: input, shape index: {}]   ;;  %s5457_s4 = inlined_call_operand.vmem [shape: f32[1,2048], index: 4, kind: input, shape index: {}]   ;;  %s5458_s6 = inlined_call_operand.vmem [shape: f32[1,128], index: 6, kind: input, shape index: {}]   ;;  %s5459_s7 = inlined_call_operand.vmem [shape: f32[8,128], index: 7, kind: output, shape index: {}]  }
   0x1   :  { %3937 = vmatprep.subr.bf16.mxu0 %v4264_v0  ;;  %3949 = vmatprep.subr.bf16.mxu1 %v4264_v0  ;;  %v4312_v1 = vld [vmem:[%s5452_s1 + $0x18] sm:$0xff]   ;;  %v4323_v2 = vld [vmem:[%s5452_s1 + $0x10] sm:$0xff]   ;;  %v4332_v3 = vld [vmem:[%s5452_s1 + $0x8] sm:$0xff]  }
   0x2   :  { %3945 = vmatprep.mubr.msk.bf16.mxu0 %vm4265_vm0, %v4264_v0  ;;  %3957 = vmatprep.mubr.msk.bf16.mxu1 %vm4265_vm0, %v4264_v0  ;;  %v4341_v4 = vld [vmem:[%s5452_s1] sm:$0xff]   ;;  %v3396_v7 = vld [vmem:[%s5453_s0 + $0x8] sm:$0xf]  ;;  %v3398_v8 = vld [vmem:[%s5453_s0 + $0xc] sm:$0xf] }
   0x3   :  { %3938 = vmatpush3.bf16.msra.mxu0 %v4312_v1  ;;  %3950 = vmatpush3.bf16.msra.mxu1 %v4312_v1  ;;  %v36_v5 = vld [vmem:[%s5453_s0] sm:$0xf]  ;;  %v3394_v6 = vld [vmem:[%s5453_s0 + $0x4] sm:$0xf]  ;;  %v3400_v9 = vld [vmem:[%s5453_s0 + $0x10] sm:$0xf] }
   0x4   :  { %3939 = vmatprep.subr.bf16.mxu0 %v4264_v0  ;;  %3951 = vmatprep.subr.bf16.mxu1 %v4264_v0  ;;  %v3402_v10 = vld [vmem:[%s5453_s0 + $0x14] sm:$0xf]  ;;  %v3404_v11 = vld [vmem:[%s5453_s0 + $0x18] sm:$0xf]  ;;  %v3406_v12 = vld [vmem:[%s5453_s0 + $0x1c] sm:$0xf] }
   0x5   :  { %v3408_v13 = vld [vmem:[%s5453_s0 + $0x20] sm:$0xf]  ;;  %v3410_v14 = vld [vmem:[%s5453_s0 + $0x24] sm:$0xf]  ;;  %v3412_v15 = vld [vmem:[%s5453_s0 + $0x28] sm:$0xf] }
   0x6   :  { %v3414_v16 = vld [vmem:[%s5453_s0 + $0x2c] sm:$0xf]  ;;  %v3416_v17 = vld [vmem:[%s5453_s0 + $0x30] sm:$0xf]  ;;  %v3418_v18 = vld [vmem:[%s5453_s0 + $0x34] sm:$0xf] }
   0x7   :  { %3940 = vmatpush3.bf16.msra.mxu0 %v4323_v2  ;;  %3952 = vmatpush3.bf16.msra.mxu1 %v4323_v2  ;;  %v3420_v19 = vld [vmem:[%s5453_s0 + $0x38] sm:$0xf]  ;;  %v3422_v20 = vld [vmem:[%s5453_s0 + $0x3c] sm:$0xf]  ;;  %v932_v21 = vld [vmem:[%s5454_s3 + $0x380] sm:$0xff] }
   0x8   :  { %3941 = vmatprep.subr.bf16.mxu0 %v4264_v0  ;;  %3953 = vmatprep.subr.bf16.mxu1 %v4264_v0  ;;  %v940_v22 = vld [vmem:[%s5454_s3 + $0x3c0] sm:$0xff]  ;;  %v933_v23 = vld [vmem:[%s5454_s3 + $0x388] sm:$0xff] }
   0x9   :  { %v3536_v24 = vcombine.low %v932_v21, %v940_v22  ;;  %v3537_v25 = vcombine.high %v932_v21, %v940_v22  ;;  %v941_v26 = vld [vmem:[%s5454_s3 + $0x3c8] sm:$0xff]  ;;  %v916_v29 = vld [vmem:[%s5454_s3 + $0x300] sm:$0xff]  ;;  %v4650_v21 = vld [vmem:[%s5454_s3 + $0x390] sm:$0xff] }
   0xa   :  { %v3538_v27 = vcombine.low %v933_v23, %v941_v26  ;;  %v3539_v28 = vcombine.high %v933_v23, %v941_v26  ;;  %v924_v30 = vld [vmem:[%s5454_s3 + $0x340] sm:$0xff]  ;;  %v917_v31 = vld [vmem:[%s5454_s3 + $0x308] sm:$0xff]  ;;  %v4655_v22 = vld [vmem:[%s5454_s3 + $0x3d0] sm:$0xff] }
   0xb   :  { %3942 = vmatpush3.bf16.msra.mxu0 %v4332_v3  ;;  %3954 = vmatpush3.bf16.msra.mxu1 %v4332_v3  ;;  %v3521_v32 = vcombine.high %v916_v29, %v924_v30  ;;  %v925_v33 = vld [vmem:[%s5454_s3 + $0x348] sm:$0xff]  ;;  %v3520_v34 = vcombine.low %v916_v29, %v924_v30  ;;  %v900_v37 = vld [vmem:[%s5454_s3 + $0x280] sm:$0xff]  ;;  %v4660_v23 = vld [vmem:[%s5454_s3 + $0x398] sm:$0xff]  ;;  %v3540_v26 = vcombine.low %v4650_v21, %v4655_v22  ;;  %v4266_v29 = vmov 0  }
   0xc   :  { %3943 = vmatprep.subr.bf16.mxu0 %v4264_v0  ;;  %3955 = vmatprep.subr.bf16.mxu1 %v4264_v0  ;;  %v3522_v35 = vcombine.low %v917_v31, %v925_v33  ;;  %v3523_v36 = vcombine.high %v917_v31, %v925_v33  ;;  %v908_v38 = vld [vmem:[%s5454_s3 + $0x2c0] sm:$0xff]  ;;  %v901_v39 = vld [vmem:[%s5454_s3 + $0x288] sm:$0xff] }
   0xd   :  { %v3505_v40 = vcombine.high %v900_v37, %v908_v38  ;;  %v909_v41 = vld [vmem:[%s5454_s3 + $0x2c8] sm:$0xff]  ;;  %v3504_v42 = vcombine.low %v900_v37, %v908_v38  ;;  %v884_v45 = vld [vmem:[%s5454_s3 + $0x200] sm:$0xff] }
   0xe   :  { %v3506_v43 = vcombine.low %v901_v39, %v909_v41  ;;  %v3507_v44 = vcombine.high %v901_v39, %v909_v41  ;;  %v892_v46 = vld [vmem:[%s5454_s3 + $0x240] sm:$0xff]  ;;  %v885_v47 = vld [vmem:[%s5454_s3 + $0x208] sm:$0xff] }
   0xf   :  { %3944 = vmatpush3.bf16.msra.mxu0 %v4341_v4  ;;  %3956 = vmatpush3.bf16.msra.mxu1 %v4341_v4  ;;  %v3489_v48 = vcombine.high %v884_v45, %v892_v46  ;;  %v893_v49 = vld [vmem:[%s5454_s3 + $0x248] sm:$0xff]  ;;  %v3488_v50 = vcombine.low %v884_v45, %v892_v46  ;;  %v868_v53 = vld [vmem:[%s5454_s3 + $0x180] sm:$0xff] }
  0x10   :  { %3961 = vmatprep.subr.bf16.mxu0 %v4264_v0  ;;  %3973 = vmatprep.subr.bf16.mxu1 %v4264_v0  ;;  %v3490_v51 = vcombine.low %v885_v47, %v893_v49  ;;  %v3491_v52 = vcombine.high %v885_v47, %v893_v49  ;;  %v876_v54 = vld [vmem:[%s5454_s3 + $0x1c0] sm:$0xff]  ;;  %v869_v55 = vld [vmem:[%s5454_s3 + $0x188] sm:$0xff] }
  0x11   :  { %v3473_v56 = vcombine.high %v868_v53, %v876_v54  ;;  %v877_v57 = vld [vmem:[%s5454_s3 + $0x1c8] sm:$0xff]  ;;  %v3472_v58 = vcombine.low %v868_v53, %v876_v54  ;;  %v852_v61 = vld [vmem:[%s5454_s3 + $0x100] sm:$0xff] }
  0x12   :  { %3946 = vmatmul.mubr.msk.bf16.vlgmr.msra.gmra.mxu0 %vm67_vm1, %v36_v5  ;;  %3958 = vmatmul.mubr.msk.bf16.vlgmr.msra.gmra.mxu1 %vm67_vm1, %v3394_v6  ;;  %v3475_v59 = vcombine.high %v869_v55, %v877_v57  ;;  %v3474_v60 = vcombine.low %v869_v55, %v877_v57  ;;  %v860_v62 = vld [vmem:[%s5454_s3 + $0x140] sm:$0xff]  ;;  %v853_v63 = vld [vmem:[%s5454_s3 + $0x108] sm:$0xff] }
  0x13   :  { %3962 = vmatpush3.bf16.msra.mxu0 %v4312_v1  ;;  %3974 = vmatpush3.bf16.msra.mxu1 %v4312_v1  ;;  %v836_v5 = vld [vmem:[%s5454_s3 + $0x80] sm:$0xff] }
  0x14   :  { %3963 = vmatprep.subr.bf16.mxu0 %v4264_v0  ;;  %3975 = vmatprep.subr.bf16.mxu1 %v4264_v0  ;;  %v844_v6 = vld [vmem:[%s5454_s3 + $0xc0] sm:$0xff] }
  0x15   :  { %3969 = vmatprep.mubr.msk.bf16.mxu0 %vm4265_vm0, %v4264_v0  ;;  %3981 = vmatprep.mubr.msk.bf16.mxu1 %vm4265_vm0, %v4264_v0  ;;  %v4680_v30 = vld [vmem:[%s5455_s2] ss:$0 sm:$0xff] }
  0x17   :  { %3964 = vmatpush3.bf16.msra.mxu0 %v4323_v2  ;;  %3976 = vmatpush3.bf16.msra.mxu1 %v4323_v2 }
  0x18   :  { %3965 = vmatprep.subr.bf16.mxu0 %v4264_v0  ;;  %3977 = vmatprep.subr.bf16.mxu1 %v4264_v0 }
  0x1b   :  { %3966 = vmatpush3.bf16.msra.mxu0 %v4332_v3  ;;  %3978 = vmatpush3.bf16.msra.mxu1 %v4332_v3 }
  0x1c   :  { %3967 = vmatprep.subr.bf16.mxu0 %v4264_v0  ;;  %3979 = vmatprep.subr.bf16.mxu1 %v4264_v0 }
  0x1f   :  { %3968 = vmatpush3.bf16.msra.mxu0 %v4341_v4  ;;  %3980 = vmatpush3.bf16.msra.mxu1 %v4341_v4 }
  0x20   :  { %3985 = vmatprep.subr.bf16.mxu0 %v4264_v0  ;;  %3997 = vmatprep.subr.bf16.mxu1 %v4264_v0 }
  0x22   :  { %3970 = vmatmul.mubr.msk.bf16.vlgmr.msra.gmra.mxu0 %vm67_vm1, %v3396_v7  ;;  %3982 = vmatmul.mubr.msk.bf16.vlgmr.msra.gmra.mxu1 %vm67_vm1, %v3398_v8  ;;  %v837_v7 = vld [vmem:[%s5454_s3 + $0x88] sm:$0xff]  ;;  %v3441_v8 = vcombine.high %v836_v5, %v844_v6 }
  0x23   :  { %3986 = vmatpush3.bf16.msra.mxu0 %v4312_v1  ;;  %3998 = vmatpush3.bf16.msra.mxu1 %v4312_v1 }
  0x24   :  { %3987 = vmatprep.subr.bf16.mxu0 %v4264_v0  ;;  %3999 = vmatprep.subr.bf16.mxu1 %v4264_v0 }
  0x25   :  { %3993 = vmatprep.mubr.msk.bf16.mxu0 %vm4265_vm0, %v4264_v0  ;;  %4005 = vmatprep.mubr.msk.bf16.mxu1 %vm4265_vm0, %v4264_v0 }
  0x27   :  { %3988 = vmatpush3.bf16.msra.mxu0 %v4323_v2  ;;  %4000 = vmatpush3.bf16.msra.mxu1 %v4323_v2 }
  0x28   :  { %3989 = vmatprep.subr.bf16.mxu0 %v4264_v0  ;;  %4001 = vmatprep.subr.bf16.mxu1 %v4264_v0 }
  0x2b   :  { %3990 = vmatpush3.bf16.msra.mxu0 %v4332_v3  ;;  %4002 = vmatpush3.bf16.msra.mxu1 %v4332_v3 }
  0x2c   :  { %3991 = vmatprep.subr.bf16.mxu0 %v4264_v0  ;;  %4003 = vmatprep.subr.bf16.mxu1 %v4264_v0 }
  0x2f   :  { %3992 = vmatpush3.bf16.msra.mxu0 %v4341_v4  ;;  %4004 = vmatpush3.bf16.msra.mxu1 %v4341_v4 }
  0x30   :  { %4009 = vmatprep.subr.bf16.mxu0 %v4264_v0  ;;  %4021 = vmatprep.subr.bf16.mxu1 %v4264_v0 }
  0x32   :  { %3994 = vmatmul.mubr.msk.bf16.vlgmr.msra.gmra.mxu0 %vm67_vm1, %v3400_v9  ;;  %4006 = vmatmul.mubr.msk.bf16.vlgmr.msra.gmra.mxu1 %vm67_vm1, %v3402_v10  ;;  %v845_v9 = vld [vmem:[%s5454_s3 + $0xc8] sm:$0xff]  ;;  %v3440_v10 = vcombine.low %v836_v5, %v844_v6 }
  0x33   :  { %4010 = vmatpush3.bf16.msra.mxu0 %v4312_v1  ;;  %4022 = vmatpush3.bf16.msra.mxu1 %v4312_v1 }
  0x34   :  { %4011 = vmatprep.subr.bf16.mxu0 %v4264_v0  ;;  %4023 = vmatprep.subr.bf16.mxu1 %v4264_v0 }
  0x35   :  { %4017 = vmatprep.mubr.msk.bf16.mxu0 %vm4265_vm0, %v4264_v0  ;;  %4029 = vmatprep.mubr.msk.bf16.mxu1 %vm4265_vm0, %v4264_v0 }
  0x37   :  { %4012 = vmatpush3.bf16.msra.mxu0 %v4323_v2  ;;  %4024 = vmatpush3.bf16.msra.mxu1 %v4323_v2 }
  0x38   :  { %4013 = vmatprep.subr.bf16.mxu0 %v4264_v0  ;;  %4025 = vmatprep.subr.bf16.mxu1 %v4264_v0 }
  0x3b   :  { %4014 = vmatpush3.bf16.msra.mxu0 %v4332_v3  ;;  %4026 = vmatpush3.bf16.msra.mxu1 %v4332_v3 }
  0x3c   :  { %4015 = vmatprep.subr.bf16.mxu0 %v4264_v0  ;;  %4027 = vmatprep.subr.bf16.mxu1 %v4264_v0 }
  0x3f   :  { %4016 = vmatpush3.bf16.msra.mxu0 %v4341_v4  ;;  %4028 = vmatpush3.bf16.msra.mxu1 %v4341_v4 }
  0x40   :  { %4033 = vmatprep.subr.bf16.mxu0 %v4264_v0  ;;  %4045 = vmatprep.subr.bf16.mxu1 %v4264_v0 }
  0x42   :  { %4018 = vmatmul.mubr.msk.bf16.vlgmr.msra.gmra.mxu0 %vm67_vm1, %v3404_v11  ;;  %4030 = vmatmul.mubr.msk.bf16.vlgmr.msra.gmra.mxu1 %vm67_vm1, %v3406_v12  ;;  %v3442_v11 = vcombine.low %v837_v7, %v845_v9  ;;  %v3443_v12 = vcombine.high %v837_v7, %v845_v9 }
  0x43   :  { %4034 = vmatpush3.bf16.msra.mxu0 %v4312_v1  ;;  %4046 = vmatpush3.bf16.msra.mxu1 %v4312_v1 }
  0x44   :  { %4035 = vmatprep.subr.bf16.mxu0 %v4264_v0  ;;  %4047 = vmatprep.subr.bf16.mxu1 %v4264_v0 }
  0x45   :  { %4041 = vmatprep.mubr.msk.bf16.mxu0 %vm4265_vm0, %v4264_v0  ;;  %4053 = vmatprep.mubr.msk.bf16.mxu1 %vm4265_vm0, %v4264_v0 }
  0x47   :  { %4036 = vmatpush3.bf16.msra.mxu0 %v4323_v2  ;;  %4048 = vmatpush3.bf16.msra.mxu1 %v4323_v2 }
  0x48   :  { %4037 = vmatprep.subr.bf16.mxu0 %v4264_v0  ;;  %4049 = vmatprep.subr.bf16.mxu1 %v4264_v0 }
  0x4b   :  { %4038 = vmatpush3.bf16.msra.mxu0 %v4332_v3  ;;  %4050 = vmatpush3.bf16.msra.mxu1 %v4332_v3 }
  0x4c   :  { %4039 = vmatprep.subr.bf16.mxu0 %v4264_v0  ;;  %4051 = vmatprep.subr.bf16.mxu1 %v4264_v0 }
  0x4f   :  { %4040 = vmatpush3.bf16.msra.mxu0 %v4341_v4  ;;  %4052 = vmatpush3.bf16.msra.mxu1 %v4341_v4 }
  0x50   :  { %4057 = vmatprep.subr.bf16.mxu0 %v4264_v0  ;;  %4069 = vmatprep.subr.bf16.mxu1 %v4264_v0 }
  0x52   :  { %4042 = vmatmul.mubr.msk.bf16.vlgmr.msra.gmra.mxu0 %vm67_vm1, %v3408_v13  ;;  %4054 = vmatmul.mubr.msk.bf16.vlgmr.msra.gmra.mxu1 %vm67_vm1, %v3410_v14  ;;  %v820_v13 = vld [vmem:[%s5454_s3] sm:$0xff] }
  0x53   :  { %4058 = vmatpush3.bf16.msra.mxu0 %v4312_v1  ;;  %4070 = vmatpush3.bf16.msra.mxu1 %v4312_v1  ;;  %v828_v14 = vld [vmem:[%s5454_s3 + $0x40] sm:$0xff] }
  0x54   :  { %4059 = vmatprep.subr.bf16.mxu0 %v4264_v0  ;;  %4071 = vmatprep.subr.bf16.mxu1 %v4264_v0 }
  0x55   :  { %4065 = vmatprep.mubr.msk.bf16.mxu0 %vm4265_vm0, %v4264_v0  ;;  %4077 = vmatprep.mubr.msk.bf16.mxu1 %vm4265_vm0, %v4264_v0 }
  0x57   :  { %4060 = vmatpush3.bf16.msra.mxu0 %v4323_v2  ;;  %4072 = vmatpush3.bf16.msra.mxu1 %v4323_v2 }
  0x58   :  { %4061 = vmatprep.subr.bf16.mxu0 %v4264_v0  ;;  %4073 = vmatprep.subr.bf16.mxu1 %v4264_v0 }
  0x5b   :  { %4062 = vmatpush3.bf16.msra.mxu0 %v4332_v3  ;;  %4074 = vmatpush3.bf16.msra.mxu1 %v4332_v3 }
  0x5c   :  { %4063 = vmatprep.subr.bf16.mxu0 %v4264_v0  ;;  %4075 = vmatprep.subr.bf16.mxu1 %v4264_v0 }
  0x5f   :  { %4064 = vmatpush3.bf16.msra.mxu0 %v4341_v4  ;;  %4076 = vmatpush3.bf16.msra.mxu1 %v4341_v4 }
  0x60   :  { %4081 = vmatprep.subr.bf16.mxu0 %v4264_v0  ;;  %4093 = vmatprep.subr.bf16.mxu1 %v4264_v0 }
  0x62   :  { %4066 = vmatmul.mubr.msk.bf16.vlgmr.msra.gmra.mxu0 %vm67_vm1, %v3412_v15  ;;  %4078 = vmatmul.mubr.msk.bf16.vlgmr.msra.gmra.mxu1 %vm67_vm1, %v3414_v16  ;;  %v821_v15 = vld [vmem:[%s5454_s3 + $0x8] sm:$0xff]  ;;  %v3425_v16 = vcombine.high %v820_v13, %v828_v14 }
  0x63   :  { %4082 = vmatpush3.bf16.msra.mxu0 %v4312_v1  ;;  %4094 = vmatpush3.bf16.msra.mxu1 %v4312_v1 }
  0x64   :  { %4083 = vmatprep.subr.bf16.mxu0 %v4264_v0  ;;  %4095 = vmatprep.subr.bf16.mxu1 %v4264_v0 }
  0x65   :  { %4089 = vmatprep.mubr.msk.bf16.mxu0 %vm4265_vm0, %v4264_v0  ;;  %4101 = vmatprep.mubr.msk.bf16.mxu1 %vm4265_vm0, %v4264_v0 }
  0x67   :  { %4084 = vmatpush3.bf16.msra.mxu0 %v4323_v2  ;;  %4096 = vmatpush3.bf16.msra.mxu1 %v4323_v2 }
  0x68   :  { %4085 = vmatprep.subr.bf16.mxu0 %v4264_v0  ;;  %4097 = vmatprep.subr.bf16.mxu1 %v4264_v0 }
  0x6b   :  { %4086 = vmatpush3.bf16.msra.mxu0 %v4332_v3  ;;  %4098 = vmatpush3.bf16.msra.mxu1 %v4332_v3 }
  0x6c   :  { %4087 = vmatprep.subr.bf16.mxu0 %v4264_v0  ;;  %4099 = vmatprep.subr.bf16.mxu1 %v4264_v0 }
  0x6f   :  { %4088 = vmatpush3.bf16.msra.mxu0 %v4341_v4  ;;  %4100 = vmatpush3.bf16.msra.mxu1 %v4341_v4 }
  0x70   :  { %4105 = vmatprep.subr.bf16.mxu0 %v4264_v0  ;;  %4117 = vmatprep.subr.bf16.mxu1 %v4264_v0 }
  0x72   :  { %4090 = vmatmul.mubr.msk.bf16.vlgmr.msra.gmra.mxu0 %vm67_vm1, %v3416_v17  ;;  %4102 = vmatmul.mubr.msk.bf16.vlgmr.msra.gmra.mxu1 %vm67_vm1, %v3418_v18  ;;  %v829_v17 = vld [vmem:[%s5454_s3 + $0x48] sm:$0xff]  ;;  %v3424_v18 = vcombine.low %v820_v13, %v828_v14 }
  0x73   :  { %4106 = vmatpush3.bf16.msra.mxu0 %v4312_v1  ;;  %4118 = vmatpush3.bf16.msra.mxu1 %v4312_v1  ;;  %v861_v1 = vld [vmem:[%s5454_s3 + $0x148] sm:$0xff] }
  0x74   :  { %4107 = vmatprep.subr.bf16.mxu0 %v4264_v0  ;;  %4119 = vmatprep.subr.bf16.mxu1 %v4264_v0 }
  0x75   :  { %4113 = vmatprep.mubr.msk.bf16.mxu0 %vm4265_vm0, %v4264_v0  ;;  %4125 = vmatprep.mubr.msk.bf16.mxu1 %vm4265_vm0, %v4264_v0 }
  0x77   :  { %4108 = vmatpush3.bf16.msra.mxu0 %v4323_v2  ;;  %4120 = vmatpush3.bf16.msra.mxu1 %v4323_v2  ;;  %v3456_v2 = vcombine.low %v852_v61, %v860_v62 }
  0x78   :  { %4109 = vmatprep.subr.bf16.mxu0 %v4264_v0  ;;  %4121 = vmatprep.subr.bf16.mxu1 %v4264_v0 }
  0x7b   :  { %4110 = vmatpush3.bf16.msra.mxu0 %v4332_v3  ;;  %4122 = vmatpush3.bf16.msra.mxu1 %v4332_v3  ;;  %v3458_v3 = vcombine.low %v853_v63, %v861_v1 }
  0x7c   :  { %4111 = vmatprep.subr.bf16.mxu0 %v4264_v0  ;;  %4123 = vmatprep.subr.bf16.mxu1 %v4264_v0  ;;  %v3457_v0 = vcombine.high %v852_v61, %v860_v62 }
  0x7f   :  { %4112 = vmatpush3.bf16.msra.mxu0 %v4341_v4  ;;  %4124 = vmatpush3.bf16.msra.mxu1 %v4341_v4  ;;  %v3459_v4 = vcombine.high %v853_v63, %v861_v1 }
  0x80   :  { %1672 = vmatprep.subr.bf16.mxu0 %v3537_v25  ;;  %1713 = vmatprep.subr.bf16.mxu1 %v3539_v28  ;;  %v4667_v25 = vld [vmem:[%s5454_s3 + $0x3d8] sm:$0xff] }
  0x81   :  { %v3543_v28 = vcombine.high %v4660_v23, %v4667_v25 }
  0x82   :  { %4114 = vmatmul.mubr.msk.bf16.vlgmr.msra.gmra.mxu0 %vm67_vm1, %v3420_v19  ;;  %4126 = vmatmul.mubr.msk.bf16.vlgmr.msra.gmra.mxu1 %vm67_vm1, %v3422_v20  ;;  %v3426_v19 = vcombine.low %v821_v15, %v829_v17  ;;  %v3427_v20 = vcombine.high %v821_v15, %v829_v17 }
  0x83   :  { %1673 = vmatpush1.bf16.msra.mxu0 %v3536_v24  ;;  %1714 = vmatpush1.bf16.msra.mxu1 %v3538_v27  ;;  %v3541_v24 = vcombine.high %v4650_v21, %v4655_v22  ;;  %v3542_v27 = vcombine.low %v4660_v23, %v4667_v25  ;;  %v895_v21 = vld [vmem:[%s5454_s3 + $0x258] sm:$0xff] }
  0x84   :  { %1674 = vmatprep.subr.bf16.mxu0 %v3521_v32  ;;  %1715 = vmatprep.subr.bf16.mxu1 %v3523_v36 }
  0x85   :  { %1704 = vmatprep.mubr.bf16.mxu0 %v4266_v29  ;;  %1745 = vmatprep.mubr.bf16.mxu1 %v4266_v29 }
  0x87   :  { %1675 = vmatpush1.bf16.msra.mxu0 %v3520_v34  ;;  %1716 = vmatpush1.bf16.msra.mxu1 %v3522_v35 }
  0x88   :  { %1676 = vmatprep.subr.bf16.mxu0 %v3505_v40  ;;  %1717 = vmatprep.subr.bf16.mxu1 %v3507_v44 }
  0x8b   :  { %1677 = vmatpush1.bf16.msra.mxu0 %v3504_v42  ;;  %1718 = vmatpush1.bf16.msra.mxu1 %v3506_v43 }
  0x8c   :  { %1678 = vmatprep.subr.bf16.mxu0 %v3489_v48  ;;  %1719 = vmatprep.subr.bf16.mxu1 %v3491_v52 }
  0x8f   :  { %1679 = vmatpush1.bf16.msra.mxu0 %v3488_v50  ;;  %1720 = vmatpush1.bf16.msra.mxu1 %v3490_v51 }
  0x90   :  { %1680 = vmatprep.subr.bf16.mxu0 %v3473_v56  ;;  %1721 = vmatprep.subr.bf16.mxu1 %v3475_v59 }
  0x93   :  { %1681 = vmatpush1.bf16.msra.mxu0 %v3472_v58  ;;  %1722 = vmatpush1.bf16.msra.mxu1 %v3474_v60 }
  0x94   :  { %1682 = vmatprep.subr.bf16.mxu0 %v3457_v0  ;;  %1723 = vmatprep.subr.bf16.mxu1 %v3459_v4 }
  0x97   :  { %1683 = vmatpush1.bf16.msra.mxu0 %v3456_v2  ;;  %1724 = vmatpush1.bf16.msra.mxu1 %v3458_v3 }
  0x98   :  { %1684 = vmatprep.subr.bf16.mxu0 %v3441_v8  ;;  %1725 = vmatprep.subr.bf16.mxu1 %v3443_v12 }
  0x9b   :  { %1685 = vmatpush1.bf16.msra.mxu0 %v3440_v10  ;;  %1726 = vmatpush1.bf16.msra.mxu1 %v3442_v11 }
  0x9c   :  { %1686 = vmatprep.subr.bf16.mxu0 %v3425_v16  ;;  %1727 = vmatprep.subr.bf16.mxu1 %v3427_v20 }
  0x9f   :  { %1687 = vmatpush1.bf16.msra.mxu0 %v3424_v18  ;;  %1728 = vmatpush1.bf16.msra.mxu1 %v3426_v19 }
  0xa0   :  { %1754 = vmatprep.subr.bf16.mxu0 %v3541_v24  ;;  %1795 = vmatprep.subr.bf16.mxu1 %v3543_v28 }
  0xd2   :  { %v105_v31 = vpop.f32.mrf.mxu0  ;;  %v152_v32 = vpop.f32.mrf.mxu1 }
  0xd3   :  { %v106_v33 = vadd.f32 %v4680_v30, %v105_v31  ;;  %v153_v34 = vadd.f32 %v4680_v30, %v152_v32 }
  0xd4   :  { %v3947_v35 = vpop.f32.mrf.mxu0  ;;  %v3959_v36 = vpop.f32.mrf.mxu1 }
  0xd5   :  { %v111_v37 = vmax.f32 %v106_v33, 0.0  ;;  %v158_v38 = vmax.f32 %v153_v34, 0.0 }
  0xd6   :  { %v108_v39 = vpop.f32.mrf.mxu0  ;;  %v155_v40 = vpop.f32.mrf.mxu1 }
  0xd7   :  { %v159_v41 = vadd.f32 %v158_v38, %v111_v37 }
  0xd8   :  { %v3948_v42 = vpop.f32.mrf.mxu0  ;;  %v3960_v43 = vpop.f32.mrf.mxu1 }
  0xe2   :  { %v199_v44 = vpop.f32.mrf.mxu0  ;;  %v246_v45 = vpop.f32.mrf.mxu1 }
  0xe3   :  { %v200_v46 = vadd.f32 %v4680_v30, %v199_v44  ;;  %v247_v47 = vadd.f32 %v4680_v30, %v246_v45 }
  0xe4   :  { %v3971_v48 = vpop.f32.mrf.mxu0  ;;  %v3983_v49 = vpop.f32.mrf.mxu1 }
  0xe5   :  { %v205_v50 = vmax.f32 %v200_v46, 0.0  ;;  %v252_v51 = vmax.f32 %v247_v47, 0.0 }
  0xe6   :  { %v202_v52 = vpop.f32.mrf.mxu0  ;;  %v249_v53 = vpop.f32.mrf.mxu1 }
  0xe7   :  { %v206_v54 = vadd.f32 %v205_v50, %v159_v41 }
  0xe8   :  { %v3972_v55 = vpop.f32.mrf.mxu0  ;;  %v3984_v56 = vpop.f32.mrf.mxu1 }
  0xe9   :  { %v253_v57 = vadd.f32 %v252_v51, %v206_v54 }
  0xf2   :  { %v293_v58 = vpop.f32.mrf.mxu0  ;;  %v340_v59 = vpop.f32.mrf.mxu1 }
  0xf3   :  { %v294_v18 = vadd.f32 %v4680_v30, %v293_v58  ;;  %v341_v32 = vadd.f32 %v4680_v30, %v340_v59 }
  0xf4   :  { %v3995_v60 = vpop.f32.mrf.mxu0  ;;  %v4007_v61 = vpop.f32.mrf.mxu1 }
  0xf5   :  { %v299_v31 = vmax.f32 %v294_v18, 0.0  ;;  %v346_v39 = vmax.f32 %v341_v32, 0.0  ;;  %v927_v32 = vld [vmem:[%s5454_s3 + $0x358] sm:$0xff] }
  0xf6   :  { %v296_v62 = vpop.f32.mrf.mxu0  ;;  %v343_v63 = vpop.f32.mrf.mxu1 }
  0xf7   :  { %v300_v38 = vadd.f32 %v299_v31, %v253_v57 }
  0xf8   :  { %v3996_v0 = vpop.f32.mrf.mxu0  ;;  %v4008_v1 = vpop.f32.mrf.mxu1 }
  0xf9   :  { %v347_v42 = vadd.f32 %v346_v39, %v300_v38 }
 0x102   :  { %v387_v2 = vpop.f32.mrf.mxu0  ;;  %v434_v3 = vpop.f32.mrf.mxu1 }
 0x103   :  { %v388_v35 = vadd.f32 %v4680_v30, %v387_v2  ;;  %v435_v41 = vadd.f32 %v4680_v30, %v434_v3 }
 0x104   :  { %v4019_v4 = vpop.f32.mrf.mxu0  ;;  %v4031_v5 = vpop.f32.mrf.mxu1 }
 0x105   :  { %v393_v40 = vmax.f32 %v388_v35, 0.0  ;;  %v440_v45 = vmax.f32 %v435_v41, 0.0  ;;  %v910_v35 = vld [vmem:[%s5454_s3 + $0x2d0] sm:$0xff] }
 0x106   :  { %v390_v6 = vpop.f32.mrf.mxu0  ;;  %v437_v7 = vpop.f32.mrf.mxu1 }
 0x107   :  { %v394_v44 = vadd.f32 %v393_v40, %v347_v42 }
 0x108   :  { %v4020_v8 = vpop.f32.mrf.mxu0  ;;  %v4032_v9 = vpop.f32.mrf.mxu1 }
 0x109   :  { %v441_v50 = vadd.f32 %v440_v45, %v394_v44  ;;  %v894_v44 = vld [vmem:[%s5454_s3 + $0x250] sm:$0xff]  ;;  %v887_v45 = vld [vmem:[%s5454_s3 + $0x218] sm:$0xff] }
 0x112   :  { %v481_v10 = vpop.f32.mrf.mxu0  ;;  %v528_v11 = vpop.f32.mrf.mxu1 }
 0x113   :  { %v482_v43 = vadd.f32 %v4680_v30, %v481_v10  ;;  %v529_v47 = vadd.f32 %v4680_v30, %v528_v11 }
 0x114   :  { %v4043_v12 = vpop.f32.mrf.mxu0  ;;  %v4055_v13 = vpop.f32.mrf.mxu1 }
 0x115   :  { %v487_v46 = vmax.f32 %v482_v43, 0.0  ;;  %v534_v55 = vmax.f32 %v529_v47, 0.0  ;;  %v886_v43 = vld [vmem:[%s5454_s3 + $0x210] sm:$0xff]  ;;  %v871_v47 = vld [vmem:[%s5454_s3 + $0x198] sm:$0xff] }
 0x116   :  { %v484_v14 = vpop.f32.mrf.mxu0  ;;  %v531_v15 = vpop.f32.mrf.mxu1 }
 0x117   :  { %v488_v54 = vadd.f32 %v487_v46, %v441_v50  ;;  %v878_v46 = vld [vmem:[%s5454_s3 + $0x1d0] sm:$0xff]  ;;  %v3495_v50 = vcombine.high %v887_v45, %v895_v21 }
 0x118   :  { %v4044_v16 = vpop.f32.mrf.mxu0  ;;  %v4056_v17 = vpop.f32.mrf.mxu1 }
 0x119   :  { %v535_v62 = vadd.f32 %v534_v55, %v488_v54  ;;  %v862_v54 = vld [vmem:[%s5454_s3 + $0x150] sm:$0xff]  ;;  %v855_v55 = vld [vmem:[%s5454_s3 + $0x118] sm:$0xff] }
 0x122   :  { %v575_v19 = vpop.f32.mrf.mxu0  ;;  %v622_v20 = vpop.f32.mrf.mxu1 }
 0x123   :  { %v576_v51 = vadd.f32 %v4680_v30, %v575_v19  ;;  %v623_v59 = vadd.f32 %v4680_v30, %v622_v20 }
 0x124   :  { %v4067_v24 = vpop.f32.mrf.mxu0  ;;  %v4079_v28 = vpop.f32.mrf.mxu1 }
 0x125   :  { %v581_v58 = vmax.f32 %v576_v51, 0.0  ;;  %v628_v1 = vmax.f32 %v623_v59, 0.0  ;;  %v918_v24 = vld [vmem:[%s5454_s3 + $0x310] sm:$0xff]  ;;  %v3492_v51 = vcombine.low %v886_v43, %v894_v44 }
 0x126   :  { %v578_v33 = vpop.f32.mrf.mxu0  ;;  %v625_v34 = vpop.f32.mrf.mxu1  ;;  %v926_v28 = vld [vmem:[%s5454_s3 + $0x350] sm:$0xff] }
 0x127   :  { %v582_v0 = vadd.f32 %v581_v58, %v535_v62  ;;  %v902_v34 = vld [vmem:[%s5454_s3 + $0x290] sm:$0xff]  ;;  %v3525_v39 = vcombine.high %v918_v24, %v926_v28  ;;  %v3524_v41 = vcombine.low %v918_v24, %v926_v28  ;;  %v920_v24 = vld [vmem:[%s5454_s3 + $0x320] sm:$0xff] }
 0x128   :  { %v4068_v36 = vpop.f32.mrf.mxu0  ;;  %v4080_v37 = vpop.f32.mrf.mxu1  ;;  %v3509_v22 = vcombine.high %v902_v34, %v910_v35  ;;  %v3508_v25 = vcombine.low %v902_v34, %v910_v35  ;;  %v846_v62 = vld [vmem:[%s5454_s3 + $0xd0] sm:$0xff]  ;;  %v928_v28 = vld [vmem:[%s5454_s3 + $0x360] sm:$0xff] }
 0x129   :  { %v629_v4 = vadd.f32 %v628_v1, %v582_v0  ;;  %v903_v36 = vld [vmem:[%s5454_s3 + $0x298] sm:$0xff] }
 0x12a   :  { %v911_v37 = vld [vmem:[%s5454_s3 + $0x2d8] sm:$0xff] }
 0x12b   :  { %v3511_v23 = vcombine.high %v903_v36, %v911_v37  ;;  %v847_v0 = vld [vmem:[%s5454_s3 + $0xd8] sm:$0xff] }
 0x132   :  { %v669_v48 = vpop.f32.mrf.mxu0  ;;  %v716_v49 = vpop.f32.mrf.mxu1 }
 0x133   :  { %v670_v63 = vadd.f32 %v4680_v30, %v669_v48  ;;  %v717_v3 = vadd.f32 %v4680_v30, %v716_v49  ;;  %v879_v48 = vld [vmem:[%s5454_s3 + $0x1d8] sm:$0xff]  ;;  %v3493_v49 = vcombine.high %v886_v43, %v894_v44  ;;  %v3528_v43 = vcombine.low %v920_v24, %v928_v28 }
 0x134   :  { %v4091_v52 = vpop.f32.mrf.mxu0  ;;  %v4103_v53 = vpop.f32.mrf.mxu1  ;;  %v3479_v58 = vcombine.high %v871_v47, %v879_v48 }
 0x135   :  { %v675_v2 = vmax.f32 %v670_v63, 0.0  ;;  %v722_v6 = vmax.f32 %v717_v3, 0.0  ;;  %v3494_v52 = vcombine.low %v887_v45, %v895_v21  ;;  %v854_v53 = vld [vmem:[%s5454_s3 + $0x110] sm:$0xff]  ;;  %v839_v63 = vld [vmem:[%s5454_s3 + $0x98] sm:$0xff]  ;;  %v888_v45 = vld [vmem:[%s5454_s3 + $0x220] sm:$0xff] }
 0x136   :  { %v672_v56 = vpop.f32.mrf.mxu0  ;;  %v719_v57 = vpop.f32.mrf.mxu1  ;;  %v3461_v1 = vcombine.high %v854_v53, %v862_v54  ;;  %v3460_v3 = vcombine.low %v854_v53, %v862_v54  ;;  %v896_v21 = vld [vmem:[%s5454_s3 + $0x260] sm:$0xff] }
 0x137   :  { %v676_v5 = vadd.f32 %v675_v2, %v629_v4  ;;  %v863_v56 = vld [vmem:[%s5454_s3 + $0x158] sm:$0xff]  ;;  %v3496_v53 = vcombine.low %v888_v45, %v896_v21 }
 0x138   :  { %v4092_v60 = vpop.f32.mrf.mxu0  ;;  %v4104_v61 = vpop.f32.mrf.mxu1  ;;  %v3463_v2 = vcombine.high %v855_v55, %v863_v56  ;;  %v3462_v4 = vcombine.low %v855_v55, %v863_v56  ;;  %v856_v55 = vld [vmem:[%s5454_s3 + $0x120] sm:$0xff] }
 0x139   :  { %v723_v13 = vadd.f32 %v722_v6, %v676_v5  ;;  %v3478_v60 = vcombine.low %v871_v47, %v879_v48  ;;  %v838_v61 = vld [vmem:[%s5454_s3 + $0x90] sm:$0xff]  ;;  %v872_v47 = vld [vmem:[%s5454_s3 + $0x1a0] sm:$0xff] }
 0x13a   :  { %v822_v5 = vld [vmem:[%s5454_s3 + $0x10] sm:$0xff]  ;;  %v880_v48 = vld [vmem:[%s5454_s3 + $0x1e0] sm:$0xff] }
 0x13b   :  { %v830_v6 = vld [vmem:[%s5454_s3 + $0x50] sm:$0xff]  ;;  %v864_v56 = vld [vmem:[%s5454_s3 + $0x160] sm:$0xff] }
 0x142   :  { %v763_v7 = vpop.f32.mrf.mxu0  ;;  %v810_v8 = vpop.f32.mrf.mxu1 }
 0x143   :  { %v764_v9 = vadd.f32 %v4680_v30, %v763_v7  ;;  %v811_v10 = vadd.f32 %v4680_v30, %v810_v8  ;;  %v919_v30 = vld [vmem:[%s5454_s3 + $0x318] sm:$0xff] }
 0x144   :  { %v4115_v11 = vpop.f32.mrf.mxu0  ;;  %v4127_v12 = vpop.f32.mrf.mxu1  ;;  %v3527_v40 = vcombine.high %v919_v30, %v927_v32  ;;  %v3526_v42 = vcombine.low %v919_v30, %v927_v32  ;;  %v823_v7 = vld [vmem:[%s5454_s3 + $0x18] sm:$0xff]  ;;  %v921_v30 = vld [vmem:[%s5454_s3 + $0x328] sm:$0xff] }
 0x145   :  { %v769_v14 = vmax.f32 %v764_v9, 0.0  ;;  %v816_v15 = vmax.f32 %v811_v10, 0.0  ;;  %v831_v8 = vld [vmem:[%s5454_s3 + $0x58] sm:$0xff]  ;;  %v3445_v9 = vcombine.high %v838_v61, %v846_v62  ;;  %v3447_v10 = vcombine.high %v839_v63, %v847_v0 }
 0x146   :  { %v766_v16 = vpop.f32.mrf.mxu0  ;;  %v813_v17 = vpop.f32.mrf.mxu1  ;;  %v3444_v11 = vcombine.low %v838_v61, %v846_v62  ;;  %v3446_v12 = vcombine.low %v839_v63, %v847_v0  ;;  %v3480_v61 = vcombine.low %v872_v47, %v880_v48  ;;  %v840_v63 = vld [vmem:[%s5454_s3 + $0xa0] sm:$0xff] }
 0x147   :  { %v770_v18 = vadd.f32 %v769_v14, %v723_v13  ;;  %v936_v13 = vld [vmem:[%s5454_s3 + $0x3a0] sm:$0xff]  ;;  %v945_v16 = vld [vmem:[%s5454_s3 + $0x3e8] sm:$0xff]  ;;  %v3429_v17 = vcombine.high %v822_v5, %v830_v6 }
 0x148   :  { %v4116_v19 = vpop.f32.mrf.mxu0  ;;  %v4128_v20 = vpop.f32.mrf.mxu1  ;;  %v944_v14 = vld [vmem:[%s5454_s3 + $0x3e0] sm:$0xff] }
 0x149   :  { %v817_v31 = vadd.f32 %v816_v15, %v770_v18  ;;  %v937_v15 = vld [vmem:[%s5454_s3 + $0x3a8] sm:$0xff]  ;;  %v3431_v18 = vcombine.high %v823_v7, %v831_v8  ;;  %v3428_v19 = vcombine.low %v822_v5, %v830_v6  ;;  %v3430_v20 = vcombine.low %v823_v7, %v831_v8  ;;  %v848_v0 = vld [vmem:[%s5454_s3 + $0xe0] sm:$0xff] }
 0x14a   :  { %v3545_v32 = vcombine.high %v936_v13, %v944_v14  ;;  %v3544_v34 = vcombine.low %v936_v13, %v944_v14  ;;  %v3546_v35 = vcombine.low %v937_v15, %v945_v16  ;;  %v3464_v5 = vcombine.low %v856_v55, %v864_v56  ;;  %v824_v7 = vld [vmem:[%s5454_s3 + $0x20] sm:$0xff] }
 0x14b   :  { %v818_v33 = vmul.f32 0.0625, %v817_v31  ;;  %v929_v31 = vld [vmem:[%s5454_s3 + $0x368] sm:$0xff]  ;;  %v832_v8 = vld [vmem:[%s5454_s3 + $0x60] sm:$0xff]  ;;  %v3448_v13 = vcombine.low %v840_v63, %v848_v0 }
 0x14c   :  { %v3530_v44 = vcombine.low %v921_v30, %v929_v31 }
 0x14d   :  { %v4722_v38 = vpack.c.bf16 %v818_v33, %v818_v33  ;;  %v3547_v33 = vcombine.high %v937_v15, %v945_v16  ;;  %v938_v15 = vld [vmem:[%s5454_s3 + $0x3b0] sm:$0xff] }
 0x14e   :  { %v946_v16 = vld [vmem:[%s5454_s3 + $0x3f0] sm:$0xff] }
 0x14f   :  { %1705 = vmatmul.mubr.bf16.vlgmr.msra.gmra.mxu0 %v4722_v38  ;;  %1746 = vmatmul.mubr.bf16.vlgmr.msra.gmra.mxu1 %v4722_v38 }
 0x150   :  { %1755 = vmatpush1.bf16.msra.mxu0 %v3540_v26  ;;  %1796 = vmatpush1.bf16.msra.mxu1 %v3542_v27  ;;  %v3510_v26 = vcombine.low %v903_v36, %v911_v37  ;;  %v870_v27 = vld [vmem:[%s5454_s3 + $0x190] sm:$0xff]  ;;  %v904_v36 = vld [vmem:[%s5454_s3 + $0x2a0] sm:$0xff] }
 0x151   :  { %1756 = vmatprep.subr.bf16.mxu0 %v3525_v39  ;;  %1797 = vmatprep.subr.bf16.mxu1 %v3527_v40  ;;  %v3477_v57 = vcombine.high %v870_v27, %v878_v46  ;;  %v3476_v59 = vcombine.low %v870_v27, %v878_v46  ;;  %v912_v37 = vld [vmem:[%s5454_s3 + $0x2e0] sm:$0xff]  ;;  %v905_v39 = vld [vmem:[%s5454_s3 + $0x2a8] sm:$0xff] }
 0x152   :  { %1786 = vmatprep.mubr.bf16.mxu0 %v4266_v29  ;;  %1827 = vmatprep.mubr.bf16.mxu1 %v4266_v29  ;;  %v913_v40 = vld [vmem:[%s5454_s3 + $0x2e8] sm:$0xff]  ;;  %v3512_v27 = vcombine.low %v904_v36, %v912_v37 }
 0x153   :  { %v3514_v46 = vcombine.low %v905_v39, %v913_v40 }
 0x154   :  { %1757 = vmatpush1.bf16.msra.mxu0 %v3524_v41  ;;  %1798 = vmatpush1.bf16.msra.mxu1 %v3526_v42  ;;  %v3529_v41 = vcombine.high %v920_v24, %v928_v28  ;;  %v3531_v42 = vcombine.high %v921_v30, %v929_v31  ;;  %v3432_v24 = vcombine.low %v824_v7, %v832_v8  ;;  %v922_v30 = vld [vmem:[%s5454_s3 + $0x330] sm:$0xff] }
 0x155   :  { %1758 = vmatprep.subr.bf16.mxu0 %v3509_v22  ;;  %1799 = vmatprep.subr.bf16.mxu1 %v3511_v23  ;;  %v889_v22 = vld [vmem:[%s5454_s3 + $0x228] sm:$0xff]  ;;  %v930_v31 = vld [vmem:[%s5454_s3 + $0x370] sm:$0xff] }
 0x156   :  { %v897_v23 = vld [vmem:[%s5454_s3 + $0x268] sm:$0xff] }
 0x157   :  { %v3498_v54 = vcombine.low %v889_v22, %v897_v23 }
 0x158   :  { %1759 = vmatpush1.bf16.msra.mxu0 %v3508_v25  ;;  %1800 = vmatpush1.bf16.msra.mxu1 %v3510_v26  ;;  %v3513_v25 = vcombine.high %v904_v36, %v912_v37  ;;  %v3515_v26 = vcombine.high %v905_v39, %v913_v40  ;;  %v3548_v36 = vcombine.low %v938_v15, %v946_v16  ;;  %v906_v39 = vld [vmem:[%s5454_s3 + $0x2b0] sm:$0xff] }
 0x159   :  { %1760 = vmatprep.subr.bf16.mxu0 %v3493_v49  ;;  %1801 = vmatprep.subr.bf16.mxu1 %v3495_v50  ;;  %v873_v49 = vld [vmem:[%s5454_s3 + $0x1a8] sm:$0xff]  ;;  %v914_v40 = vld [vmem:[%s5454_s3 + $0x2f0] sm:$0xff] }
 0x15a   :  { %v881_v50 = vld [vmem:[%s5454_s3 + $0x1e8] sm:$0xff] }
 0x15b   :  { %v3482_v62 = vcombine.low %v873_v49, %v881_v50 }
 0x15c   :  { %1761 = vmatpush1.bf16.msra.mxu0 %v3492_v51  ;;  %1802 = vmatpush1.bf16.msra.mxu1 %v3494_v52  ;;  %v3497_v51 = vcombine.high %v888_v45, %v896_v21  ;;  %v3499_v52 = vcombine.high %v889_v22, %v897_v23  ;;  %v3532_v45 = vcombine.low %v922_v30, %v930_v31 }
 0x15d   :  { %1762 = vmatprep.subr.bf16.mxu0 %v3477_v57  ;;  %1803 = vmatprep.subr.bf16.mxu1 %v3479_v58  ;;  %v857_v57 = vld [vmem:[%s5454_s3 + $0x128] sm:$0xff]  ;;  %v3517_v22 = vcombine.high %v906_v39, %v914_v40 }
 0x15e   :  { %v865_v58 = vld [vmem:[%s5454_s3 + $0x168] sm:$0xff] }
 0x15f   :  { %v3466_v6 = vcombine.low %v857_v57, %v865_v58 }
 0x160   :  { %1763 = vmatpush1.bf16.msra.mxu0 %v3476_v59  ;;  %1804 = vmatpush1.bf16.msra.mxu1 %v3478_v60  ;;  %v3481_v59 = vcombine.high %v872_v47, %v880_v48  ;;  %v3483_v60 = vcombine.high %v873_v49, %v881_v50  ;;  %v3516_v47 = vcombine.low %v906_v39, %v914_v40  ;;  %v4148_v39 = vld [vmem:[%s5456_s5 + $0x60] sm:$0xff]  }
 0x161   :  { %1764 = vmatprep.subr.bf16.mxu0 %v3461_v1  ;;  %1805 = vmatprep.subr.bf16.mxu1 %v3463_v2  ;;  %v841_v1 = vld [vmem:[%s5454_s3 + $0xa8] sm:$0xff]  ;;  %v4149_v40 = vld [vmem:[%s5456_s5 + $0xe0] sm:$0xff]  }
 0x162   :  { %v849_v2 = vld [vmem:[%s5454_s3 + $0xe8] sm:$0xff] }
 0x163   :  { %v3450_v14 = vcombine.low %v841_v1, %v849_v2 }
 0x164   :  { %1765 = vmatpush1.bf16.msra.mxu0 %v3460_v3  ;;  %1806 = vmatpush1.bf16.msra.mxu1 %v3462_v4  ;;  %v3465_v3 = vcombine.high %v856_v55, %v864_v56  ;;  %v3467_v4 = vcombine.high %v857_v57, %v865_v58  ;;  %v858_v58 = vld [vmem:[%s5454_s3 + $0x130] sm:$0xff] }
 0x165   :  { %1766 = vmatprep.subr.bf16.mxu0 %v3445_v9  ;;  %1807 = vmatprep.subr.bf16.mxu1 %v3447_v10  ;;  %v825_v9 = vld [vmem:[%s5454_s3 + $0x28] sm:$0xff] }
 0x166   :  { %v833_v10 = vld [vmem:[%s5454_s3 + $0x68] sm:$0xff] }
 0x167   :  { %v3434_v28 = vcombine.low %v825_v9, %v833_v10 }
 0x168   :  { %1767 = vmatpush1.bf16.msra.mxu0 %v3444_v11  ;;  %1808 = vmatpush1.bf16.msra.mxu1 %v3446_v12  ;;  %v3449_v11 = vcombine.high %v840_v63, %v848_v0  ;;  %v3451_v12 = vcombine.high %v841_v1, %v849_v2  ;;  %v842_v2 = vld [vmem:[%s5454_s3 + $0xb0] sm:$0xff] }
 0x169   :  { %1768 = vmatprep.subr.bf16.mxu0 %v3429_v17  ;;  %1809 = vmatprep.subr.bf16.mxu1 %v3431_v18  ;;  %v939_v17 = vld [vmem:[%s5454_s3 + $0x3b8] sm:$0xff] }
 0x16a   :  { %v947_v18 = vld [vmem:[%s5454_s3 + $0x3f8] sm:$0xff] }
 0x16b   :  { %v3550_v37 = vcombine.low %v939_v17, %v947_v18 }
 0x16c   :  { %1769 = vmatpush1.bf16.msra.mxu0 %v3428_v19  ;;  %1810 = vmatpush1.bf16.msra.mxu1 %v3430_v20  ;;  %v3433_v19 = vcombine.high %v824_v7, %v832_v8  ;;  %v3435_v20 = vcombine.high %v825_v9, %v833_v10  ;;  %v826_v10 = vld [vmem:[%s5454_s3 + $0x30] sm:$0xff] }
 0x16d   :  { %1836 = vmatprep.subr.bf16.mxu0 %v3545_v32  ;;  %1877 = vmatprep.subr.bf16.mxu1 %v3547_v33  ;;  %v923_v32 = vld [vmem:[%s5454_s3 + $0x338] sm:$0xff] }
 0x16e   :  { %v931_v33 = vld [vmem:[%s5454_s3 + $0x378] sm:$0xff] }
 0x16f   :  { %1787 = vmatmul.mubr.bf16.vlgmr.msra.gmra.mxu0 %v4722_v38  ;;  %1828 = vmatmul.mubr.bf16.vlgmr.msra.gmra.mxu1 %v4722_v38  ;;  %v3534_v21 = vcombine.low %v923_v32, %v931_v33 }
 0x170   :  { %1837 = vmatpush1.bf16.msra.mxu0 %v3544_v34  ;;  %1878 = vmatpush1.bf16.msra.mxu1 %v3546_v35  ;;  %v3549_v34 = vcombine.high %v938_v15, %v946_v16  ;;  %v3551_v35 = vcombine.high %v939_v17, %v947_v18 }
 0x171   :  { %1838 = vmatprep.subr.bf16.mxu0 %v3529_v41  ;;  %1879 = vmatprep.subr.bf16.mxu1 %v3531_v42  ;;  %v907_v41 = vld [vmem:[%s5454_s3 + $0x2b8] sm:$0xff]  ;;  %v3533_v42 = vcombine.high %v922_v30, %v930_v31  ;;  %v4140_v31 = vld [vmem:[%s5456_s5 + $0x70] sm:$0xff]  }
 0x172   :  { %1868 = vmatprep.mubr.bf16.mxu0 %v4266_v29  ;;  %1909 = vmatprep.mubr.bf16.mxu1 %v4266_v29  ;;  %v4139_v30 = vld [vmem:[%s5456_s5 + $0xb8] sm:$0xff]  }
 0x174   :  { %1839 = vmatpush1.bf16.msra.mxu0 %v3528_v43  ;;  %1880 = vmatpush1.bf16.msra.mxu1 %v3530_v44  ;;  %v3535_v43 = vcombine.high %v923_v32, %v931_v33  ;;  %v915_v44 = vld [vmem:[%s5454_s3 + $0x2f8] sm:$0xff]  ;;  %v4141_v32 = vld [vmem:[%s5456_s5 + $0xf0] sm:$0xff]  }
 0x175   :  { %1840 = vmatprep.subr.bf16.mxu0 %v3513_v25  ;;  %1881 = vmatprep.subr.bf16.mxu1 %v3515_v26  ;;  %v3519_v23 = vcombine.high %v907_v41, %v915_v44  ;;  %v890_v25 = vld [vmem:[%s5454_s3 + $0x230] sm:$0xff]  ;;  %v3518_v48 = vcombine.low %v907_v41, %v915_v44  ;;  %v4150_v41 = vld [vmem:[%s5456_s5 + $0x20] sm:$0xff]   ;;  %v4153_v44 = vld [vmem:[%s5456_s5 + $0xd8] sm:$0xff]  }
 0x176   :  { %v898_v26 = vld [vmem:[%s5454_s3 + $0x270] sm:$0xff] }
 0x177   :  { %v3501_v49 = vcombine.high %v890_v25, %v898_v26  ;;  %v4142_v33 = vld [vmem:[%s5456_s5 + $0x30] sm:$0xff]  }
 0x178   :  { %1841 = vmatpush1.bf16.msra.mxu0 %v3512_v27  ;;  %1882 = vmatpush1.bf16.msra.mxu1 %v3514_v46  ;;  %v891_v27 = vld [vmem:[%s5454_s3 + $0x238] sm:$0xff] }
 0x179   :  { %1842 = vmatprep.subr.bf16.mxu0 %v3497_v51  ;;  %1883 = vmatprep.subr.bf16.mxu1 %v3499_v52  ;;  %v899_v46 = vld [vmem:[%s5454_s3 + $0x278] sm:$0xff]  ;;  %v874_v51 = vld [vmem:[%s5454_s3 + $0x1b0] sm:$0xff] }
 0x17a   :  { %v3503_v50 = vcombine.high %v891_v27, %v899_v46  ;;  %v882_v52 = vld [vmem:[%s5454_s3 + $0x1f0] sm:$0xff]  ;;  %v3502_v55 = vcombine.low %v891_v27, %v899_v46  ;;  %v4160_v27 = vld [vmem:[%s5456_s5 + $0x48] sm:$0xff]  }
 0x17b   :  { %v3485_v56 = vcombine.high %v874_v51, %v882_v52  ;;  %v4161_v46 = vld [vmem:[%s5456_s5 + $0xc8] sm:$0xff]  }
 0x17c   :  { %1843 = vmatpush1.bf16.msra.mxu0 %v3496_v53  ;;  %1884 = vmatpush1.bf16.msra.mxu1 %v3498_v54  ;;  %v883_v53 = vld [vmem:[%s5454_s3 + $0x1f8] sm:$0xff]  ;;  %v3500_v54 = vcombine.low %v890_v25, %v898_v26  ;;  %v4158_v25 = vld [vmem:[%s5456_s5 + $0x10] sm:$0xff]  }
 0x17d   :  { %1844 = vmatprep.subr.bf16.mxu0 %v3481_v59  ;;  %1885 = vmatprep.subr.bf16.mxu1 %v3483_v60  ;;  %v866_v59 = vld [vmem:[%s5454_s3 + $0x170] sm:$0xff]  ;;  %v859_v60 = vld [vmem:[%s5454_s3 + $0x138] sm:$0xff] }
 0x17e   :  { %v3469_v0 = vcombine.high %v858_v58, %v866_v59  ;;  %v4159_v26 = vld [vmem:[%s5456_s5 + $0x90] sm:$0xff]  }
 0x180   :  { %1845 = vmatpush1.bf16.msra.mxu0 %v3480_v61  ;;  %1886 = vmatpush1.bf16.msra.mxu1 %v3482_v62  ;;  %v867_v61 = vld [vmem:[%s5454_s3 + $0x178] sm:$0xff]  ;;  %v3484_v62 = vcombine.low %v874_v51, %v882_v52  ;;  %v4165_v51 = vld [vmem:[%s5456_s5 + $0xc0] sm:$0xff]  }
 0x181   :  { %1846 = vmatprep.subr.bf16.mxu0 %v3465_v3  ;;  %1887 = vmatprep.subr.bf16.mxu1 %v3467_v4  ;;  %v3471_v1 = vcombine.high %v859_v60, %v867_v61  ;;  %v850_v3 = vld [vmem:[%s5454_s3 + $0xf0] sm:$0xff]  ;;  %v843_v4 = vld [vmem:[%s5454_s3 + $0xb8] sm:$0xff]  ;;  %v3470_v7 = vcombine.low %v859_v60, %v867_v61 }
 0x182   :  { %v3453_v8 = vcombine.high %v842_v2, %v850_v3 }
 0x184   :  { %1847 = vmatpush1.bf16.msra.mxu0 %v3464_v5  ;;  %1888 = vmatpush1.bf16.msra.mxu1 %v3466_v6  ;;  %v851_v5 = vld [vmem:[%s5454_s3 + $0xf8] sm:$0xff]  ;;  %v3468_v6 = vcombine.low %v858_v58, %v866_v59  ;;  %v949_v58 = vld [vmem:[%s5457_s4 + $0x8] sm:$0xff] }
 0x185   :  { %1848 = vmatprep.subr.bf16.mxu0 %v3449_v11  ;;  %1889 = vmatprep.subr.bf16.mxu1 %v3451_v12  ;;  %v3455_v9 = vcombine.high %v843_v4, %v851_v5  ;;  %v834_v11 = vld [vmem:[%s5454_s3 + $0x70] sm:$0xff]  ;;  %v827_v12 = vld [vmem:[%s5454_s3 + $0x38] sm:$0xff]  ;;  %v3454_v15 = vcombine.low %v843_v4, %v851_v5 }
 0x186   :  { %v3437_v16 = vcombine.high %v826_v10, %v834_v11  ;;  %v3436_v18 = vcombine.low %v826_v10, %v834_v11 }
 0x188   :  { %1849 = vmatpush1.bf16.msra.mxu0 %v3448_v13  ;;  %1890 = vmatpush1.bf16.msra.mxu1 %v3450_v14  ;;  %v835_v13 = vld [vmem:[%s5454_s3 + $0x78] sm:$0xff]  ;;  %v3452_v14 = vcombine.low %v842_v2, %v850_v3 }
 0x189   :  { %1850 = vmatprep.subr.bf16.mxu0 %v3433_v19  ;;  %1891 = vmatprep.subr.bf16.mxu1 %v3435_v20  ;;  %v3439_v17 = vcombine.high %v827_v12, %v835_v13  ;;  %v3438_v19 = vcombine.low %v827_v12, %v835_v13  ;;  %v4136_v20 = vld [vmem:[%s5456_s5 + $0x78] sm:$0xff]  }
 0x18c   :  { %1851 = vmatpush1.bf16.msra.mxu0 %v3432_v24  ;;  %1892 = vmatpush1.bf16.msra.mxu1 %v3434_v28  ;;  %v4137_v24 = vld [vmem:[%s5456_s5 + $0xf8] sm:$0xff]  }
 0x18d   :  { %1918 = vmatprep.subr.bf16.mxu0 %v3549_v34  ;;  %1959 = vmatprep.subr.bf16.mxu1 %v3551_v35  ;;  %v4138_v28 = vld [vmem:[%s5456_s5 + $0x38] sm:$0xff]   ;;  %v4143_v34 = vld [vmem:[%s5456_s5 + $0xb0] sm:$0xff]   ;;  %v4144_v35 = vld [vmem:[%s5456_s5 + $0x68] sm:$0xff]  }
 0x18f   :  { %1869 = vmatmul.mubr.bf16.vlgmr.msra.gmra.mxu0 %v4722_v38  ;;  %1910 = vmatmul.mubr.bf16.vlgmr.msra.gmra.mxu1 %v4722_v38 }
 0x190   :  { %1919 = vmatpush1.bf16.msra.mxu0 %v3548_v36  ;;  %1960 = vmatpush1.bf16.msra.mxu1 %v3550_v37  ;;  %v4146_v36 = vld [vmem:[%s5456_s5 + $0x28] sm:$0xff]  }
 0x191   :  { %1920 = vmatprep.subr.bf16.mxu0 %v3533_v42  ;;  %1961 = vmatprep.subr.bf16.mxu1 %v3535_v43  ;;  %v4147_v37 = vld [vmem:[%s5456_s5 + $0xa8] sm:$0xff]   ;;  %v4151_v42 = vld [vmem:[%s5456_s5 + $0xa0] sm:$0xff]   ;;  %v4152_v43 = vld [vmem:[%s5456_s5 + $0x58] sm:$0xff]  }
 0x192   :  { %1950 = vmatprep.mubr.bf16.mxu0 %v4266_v29  ;;  %1991 = vmatprep.mubr.bf16.mxu1 %v4266_v29  ;;  %v875_v29 = vld [vmem:[%s5454_s3 + $0x1b8] sm:$0xff] }
 0x193   :  { %v3487_v57 = vcombine.high %v875_v29, %v883_v53  ;;  %v3486_v63 = vcombine.low %v875_v29, %v883_v53  ;;  %v4166_v29 = vld [vmem:[%s5456_s5] sm:$0xff]  }
 0x194   :  { %1921 = vmatpush1.bf16.msra.mxu0 %v3532_v45  ;;  %1962 = vmatpush1.bf16.msra.mxu1 %v3534_v21  ;;  %v4154_v45 = vld [vmem:[%s5456_s5 + $0x18] sm:$0xff]   ;;  %v4167_v53 = vld [vmem:[%s5456_s5 + $0x80] sm:$0xff]  }
 0x195   :  { %1922 = vmatprep.subr.bf16.mxu0 %v3517_v22  ;;  %1963 = vmatprep.subr.bf16.mxu1 %v3519_v23  ;;  %v4155_v21 = vld [vmem:[%s5456_s5 + $0x98] sm:$0xff]   ;;  %v4156_v22 = vld [vmem:[%s5456_s5 + $0x50] sm:$0xff]  }
 0x196   :  { %v4157_v23 = vld [vmem:[%s5456_s5 + $0xd0] sm:$0xff]  }
 0x198   :  { %1923 = vmatpush1.bf16.msra.mxu0 %v3516_v47  ;;  %1964 = vmatpush1.bf16.msra.mxu1 %v3518_v48  ;;  %v952_v47 = vlaneseq  ;;  %v4162_v48 = vld [vmem:[%s5456_s5 + $0x8] sm:$0xff]  }
 0x199   :  { %1924 = vmatprep.subr.bf16.mxu0 %v3501_v49  ;;  %1965 = vmatprep.subr.bf16.mxu1 %v3503_v50  ;;  %v4163_v49 = vld [vmem:[%s5456_s5 + $0x88] sm:$0xff]   ;;  %v4164_v50 = vld [vmem:[%s5456_s5 + $0x40] sm:$0xff]  }
 0x19a   :  { %v5086_v52 = vshrl.u32 %v952_v47, 7  ;;  %v4182_v47 = vld [vmem:[%s5456_s5 + $0x120] sm:$0xff]  }
 0x19c   :  { %1925 = vmatpush1.bf16.msra.mxu0 %v3500_v54  ;;  %1966 = vmatpush1.bf16.msra.mxu1 %v3502_v55  ;;  %v4168_v54 = vld [vmem:[%s5456_s5 + $0x178] sm:$0xff]   ;;  %v958_v59 = vsub.s32 1, %v5086_v52  ;;  %v966_v60 = vsub.s32 3, %v5086_v52  ;;  %v978_v2 = vsub.s32 6, %v5086_v52  ;;  %v974_v3 = vsub.s32 5, %v5086_v52 }
 0x19d   :  { %1926 = vmatprep.subr.bf16.mxu0 %v3485_v56  ;;  %1967 = vmatprep.subr.bf16.mxu1 %v3487_v57  ;;  %v4169_v55 = vld [vmem:[%s5456_s5 + $0x1f8] sm:$0xff]   ;;  %v954_v56 = vsub.s32 0, %v5086_v52  ;;  %v962_v57 = vsub.s32 2, %v5086_v52  ;;  %v982_v4 = vsub.s32 7, %v5086_v52 }
 0x19f   :  { %v5107_v61 = vrot.slane %v949_v58, %v954_v56 }
 0x1a0   :  { %1927 = vmatpush1.bf16.msra.mxu0 %v3484_v62  ;;  %1968 = vmatpush1.bf16.msra.mxu1 %v3486_v63  ;;  %v5109_v62 = vrot.slane %v949_v58, %v962_v57  ;;  %v5111_v63 = vrot.slane %v949_v58, %v958_v59 }
 0x1a1   :  { %1928 = vmatprep.subr.bf16.mxu0 %v3469_v0  ;;  %1969 = vmatprep.subr.bf16.mxu1 %v3471_v1  ;;  %v5113_v0 = vrot.slane %v949_v58, %v966_v60  ;;  %v970_v1 = vsub.s32 4, %v5086_v52  ;;  %v4197_v52 = vld [vmem:[%s5456_s5 + $0x1c0] sm:$0xff]  }
 0x1a3   :  { %v5121_v5 = vrot.slane %v949_v58, %v970_v1 }
 0x1a4   :  { %1929 = vmatpush1.bf16.msra.mxu0 %v3468_v6  ;;  %1970 = vmatpush1.bf16.msra.mxu1 %v3470_v7  ;;  %v5125_v6 = vrot.slane %v949_v58, %v978_v2  ;;  %v5129_v7 = vrot.slane %v949_v58, %v974_v3 }
 0x1a5   :  { %1930 = vmatprep.subr.bf16.mxu0 %v3453_v8  ;;  %1971 = vmatprep.subr.bf16.mxu1 %v3455_v9  ;;  %v5133_v8 = vrot.slane %v949_v58, %v982_v4  ;;  %v5138_v9 = vld [vmem:[%s5457_s4] sm:$0xff]  ;;  %v4193_v58 = vld [vmem:[%s5456_s5 + $0x1c8] sm:$0xff]  }
 0x1a6   :  { %v955_v10 = vrot.slane %v5138_v9, %v954_v56  ;;  %v963_v11 = vrot.slane %v5138_v9, %v962_v57  ;;  %v959_v12 = vrot.slane %v5138_v9, %v958_v59  ;;  %v967_v13 = vrot.slane %v5138_v9, %v966_v60  ;;  %v4191_v56 = vld [vmem:[%s5456_s5 + $0x190] sm:$0xff]   ;;  %v4192_v57 = vld [vmem:[%s5456_s5 + $0x148] sm:$0xff]  }
 0x1a7   :  { %v971_v59 = vrot.slane %v5138_v9, %v970_v1  ;;  %v979_v60 = vrot.slane %v5138_v9, %v978_v2  ;;  %v4195_v1 = vld [vmem:[%s5456_s5 + $0x188] sm:$0xff]  }
 0x1a8   :  { %1931 = vmatpush1.bf16.msra.mxu0 %v3452_v14  ;;  %1972 = vmatpush1.bf16.msra.mxu1 %v3454_v15 }
 0x1a9   :  { %1932 = vmatprep.subr.bf16.mxu0 %v3437_v16  ;;  %1973 = vmatprep.subr.bf16.mxu1 %v3439_v17 }
 0x1ac   :  { %1933 = vmatpush1.bf16.msra.mxu0 %v3436_v18  ;;  %1974 = vmatpush1.bf16.msra.mxu1 %v3438_v19 }
 0x1ad   :  { %3761 = vmatprep.subr.bf16.mxu0 %v4136_v20  ;;  %3783 = vmatprep.subr.bf16.mxu1 %v4137_v24 }
 0x1af   :  { %1951 = vmatmul.mubr.bf16.vlgmr.msra.gmra.mxu0 %v4722_v38  ;;  %1992 = vmatmul.mubr.bf16.vlgmr.msra.gmra.mxu1 %v4722_v38  ;;  %v4145_v38 = vld [vmem:[%s5456_s5 + $0xe8] sm:$0xff]  }
 0x1b0   :  { %3762 = vmatpush3.bf16.msra.mxu0 %v4138_v28  ;;  %3784 = vmatpush3.bf16.msra.mxu1 %v4139_v30 }
 0x1b1   :  { %3763 = vmatprep.subr.bf16.mxu0 %v4140_v31  ;;  %3785 = vmatprep.subr.bf16.mxu1 %v4141_v32 }
 0x1b4   :  { %3764 = vmatpush3.bf16.msra.mxu0 %v4142_v33  ;;  %3786 = vmatpush3.bf16.msra.mxu1 %v4143_v34 }
 0x1b5   :  { %3765 = vmatprep.subr.bf16.mxu0 %v4144_v35  ;;  %3787 = vmatprep.subr.bf16.mxu1 %v4145_v38 }
 0x1b8   :  { %3766 = vmatpush3.bf16.msra.mxu0 %v4146_v36  ;;  %3788 = vmatpush3.bf16.msra.mxu1 %v4147_v37 }
 0x1b9   :  { %3767 = vmatprep.subr.bf16.mxu0 %v4148_v39  ;;  %3789 = vmatprep.subr.bf16.mxu1 %v4149_v40  ;;  %v4170_v39 = vld [vmem:[%s5456_s5 + $0x138] sm:$0xff]  }
 0x1ba   :  { %v4171_v40 = vld [vmem:[%s5456_s5 + $0x1b8] sm:$0xff]  }
 0x1bc   :  { %3768 = vmatpush3.bf16.msra.mxu0 %v4150_v41  ;;  %3790 = vmatpush3.bf16.msra.mxu1 %v4151_v42 }
 0x1bd   :  { %3769 = vmatprep.subr.bf16.mxu0 %v4152_v43  ;;  %3791 = vmatprep.subr.bf16.mxu1 %v4153_v44  ;;  %v4172_v43 = vld [vmem:[%s5456_s5 + $0x170] sm:$0xff]  }
 0x1be   :  { %v4173_v44 = vld [vmem:[%s5456_s5 + $0x1f0] sm:$0xff]  }
 0x1c0   :  { %3770 = vmatpush3.bf16.msra.mxu0 %v4154_v45  ;;  %3792 = vmatpush3.bf16.msra.mxu1 %v4155_v21  ;;  %v4174_v45 = vld [vmem:[%s5456_s5 + $0x130] sm:$0xff]  }
 0x1c1   :  { %3771 = vmatprep.subr.bf16.mxu0 %v4156_v22  ;;  %3793 = vmatprep.subr.bf16.mxu1 %v4157_v23  ;;  %v4175_v21 = vld [vmem:[%s5456_s5 + $0x1b0] sm:$0xff]   ;;  %v4176_v22 = vld [vmem:[%s5456_s5 + $0x168] sm:$0xff]  }
 0x1c2   :  { %v4177_v23 = vld [vmem:[%s5456_s5 + $0x1e8] sm:$0xff]  }
 0x1c4   :  { %3772 = vmatpush3.bf16.msra.mxu0 %v4158_v25  ;;  %3794 = vmatpush3.bf16.msra.mxu1 %v4159_v26  ;;  %v4178_v25 = vld [vmem:[%s5456_s5 + $0x128] sm:$0xff]  }
 0x1c5   :  { %3773 = vmatprep.subr.bf16.mxu0 %v4160_v27  ;;  %3795 = vmatprep.subr.bf16.mxu1 %v4161_v46  ;;  %v4179_v26 = vld [vmem:[%s5456_s5 + $0x1a8] sm:$0xff]   ;;  %v4180_v27 = vld [vmem:[%s5456_s5 + $0x160] sm:$0xff]  }
 0x1c6   :  { %v4181_v46 = vld [vmem:[%s5456_s5 + $0x1e0] sm:$0xff]  }
 0x1c8   :  { %3774 = vmatpush3.bf16.msra.mxu0 %v4162_v48  ;;  %3796 = vmatpush3.bf16.msra.mxu1 %v4163_v49  ;;  %v4183_v48 = vld [vmem:[%s5456_s5 + $0x1a0] sm:$0xff]   ;;  %v4184_v49 = vld [vmem:[%s5456_s5 + $0x158] sm:$0xff]  }
 0x1c9   :  { %3775 = vmatprep.subr.bf16.mxu0 %v4164_v50  ;;  %3797 = vmatprep.subr.bf16.mxu1 %v4165_v51  ;;  %v4185_v50 = vld [vmem:[%s5456_s5 + $0x1d8] sm:$0xff]  }
 0x1ca   :  { %v4186_v51 = vld [vmem:[%s5456_s5 + $0x118] sm:$0xff]  }
 0x1cc   :  { %3776 = vmatpush3.bf16.msra.mxu0 %v4166_v29  ;;  %3798 = vmatpush3.bf16.msra.mxu1 %v4167_v53  ;;  %v4187_v29 = vld [vmem:[%s5456_s5 + $0x198] sm:$0xff]   ;;  %v4188_v53 = vld [vmem:[%s5456_s5 + $0x150] sm:$0xff]  }
 0x1cd   :  { %3805 = vmatprep.subr.bf16.mxu0 %v4168_v54  ;;  %3827 = vmatprep.subr.bf16.mxu1 %v4169_v55  ;;  %v4189_v54 = vld [vmem:[%s5456_s5 + $0x1d0] sm:$0xff]  }
 0x1ce   :  { %v4190_v55 = vld [vmem:[%s5456_s5 + $0x110] sm:$0xff]  }
 0x20f   :  { %v1706_v14 = vpop.f32.mrf.mxu0  ;;  %v1747_v15 = vpop.f32.mrf.mxu1 }
 0x210   :  { %v1707_v16 = vadd.f32 %v1706_v14, %v955_v10  ;;  %v1748_v17 = vadd.f32 %v1747_v15, %v963_v11  ;;  %v975_v10 = vrot.slane %v5138_v9, %v974_v3  ;;  %v983_v11 = vrot.slane %v5138_v9, %v982_v4  ;;  %v4196_v3 = vld [vmem:[%s5456_s5 + $0x140] sm:$0xff]  }
 0x211   :  { %v1708_v18 = vpop.f32.mrf.mxu0  ;;  %v1749_v19 = vpop.f32.mrf.mxu1 }
 0x212   :  { %v1709_v20 = vadd.f32 %v1708_v18, %v959_v12  ;;  %v1750_v24 = vadd.f32 %v1749_v19, %v967_v13  ;;  %v2000_v28 = vmax.f32 %v1707_v16, 0.0  ;;  %v2002_v30 = vmax.f32 %v1748_v17, 0.0  ;;  %v4194_v12 = vld [vmem:[%s5456_s5 + $0x108] sm:$0xff]   ;;  %v4198_v18 = vld [vmem:[%s5456_s5 + $0x100] sm:$0xff]  }
 0x213   :  { %v1710_v31 = vpop.f32.mrf.mxu0  ;;  %v1751_v32 = vpop.f32.mrf.mxu1  ;;  %v4199_v19 = vld [vmem:[%s5456_s5 + $0x180] sm:$0xff]  }
 0x214   :  { %v2001_v33 = vmax.f32 %v1709_v20, 0.0  ;;  %v2003_v34 = vmax.f32 %v1750_v24, 0.0  ;;  %v2016_v41 = vpack.c.bf16 %v2000_v28, %v2000_v28  ;;  %v2018_v42 = vpack.c.bf16 %v2002_v30, %v2002_v30  ;;  %v4200_v31 = vld [vmem:[%s5456_s5 + $0x278] sm:$0xff]  }
 0x215   :  { %v1711_v35 = vpop.f32.mrf.mxu0  ;;  %v1752_v38 = vpop.f32.mrf.mxu1  ;;  %v4201_v32 = vld [vmem:[%s5456_s5 + $0x2f8] sm:$0xff]  }
 0x216   :  { %v2017_v36 = vpack.c.bf16 %v2001_v33, %v2001_v33  ;;  %v2019_v37 = vpack.c.bf16 %v2003_v34, %v2003_v34 }
 0x218   :  { %3095 = vmatprep.mubr.bf16.mxu0 %v2017_v36  ;;  %3135 = vmatprep.mubr.bf16.mxu1 %v2019_v37 }
 0x219   :  { %3096 = vmatmul.mubr.bf16.vlgmr.msra.gmra.mxu0 %v2016_v41  ;;  %3136 = vmatmul.mubr.bf16.vlgmr.msra.gmra.mxu1 %v2018_v42 }
 0x21a   :  { %3806 = vmatpush3.bf16.msra.mxu0 %v4170_v39  ;;  %3828 = vmatpush3.bf16.msra.mxu1 %v4171_v40  ;;  %v4202_v39 = vld [vmem:[%s5456_s5 + $0x238] sm:$0xff]  }
 0x21b   :  { %3807 = vmatprep.subr.bf16.mxu0 %v4172_v43  ;;  %3829 = vmatprep.subr.bf16.mxu1 %v4173_v44  ;;  %v4203_v40 = vld [vmem:[%s5456_s5 + $0x2b8] sm:$0xff]   ;;  %v4204_v43 = vld [vmem:[%s5456_s5 + $0x270] sm:$0xff]  }
 0x21c   :  { %v4205_v44 = vld [vmem:[%s5456_s5 + $0x2f0] sm:$0xff]  }
 0x21e   :  { %3808 = vmatpush3.bf16.msra.mxu0 %v4174_v45  ;;  %3830 = vmatpush3.bf16.msra.mxu1 %v4175_v21  ;;  %v4206_v45 = vld [vmem:[%s5456_s5 + $0x230] sm:$0xff]  }
 0x21f   :  { %3809 = vmatprep.subr.bf16.mxu0 %v4176_v22  ;;  %3831 = vmatprep.subr.bf16.mxu1 %v4177_v23  ;;  %v4207_v21 = vld [vmem:[%s5456_s5 + $0x2b0] sm:$0xff]   ;;  %v4208_v22 = vld [vmem:[%s5456_s5 + $0x268] sm:$0xff]  }
 0x220   :  { %v4209_v23 = vld [vmem:[%s5456_s5 + $0x2e8] sm:$0xff]  }
 0x222   :  { %3810 = vmatpush3.bf16.msra.mxu0 %v4178_v25  ;;  %3832 = vmatpush3.bf16.msra.mxu1 %v4179_v26  ;;  %v4210_v25 = vld [vmem:[%s5456_s5 + $0x228] sm:$0xff]  }
 0x223   :  { %3811 = vmatprep.subr.bf16.mxu0 %v4180_v27  ;;  %3833 = vmatprep.subr.bf16.mxu1 %v4181_v46  ;;  %v4211_v26 = vld [vmem:[%s5456_s5 + $0x2a8] sm:$0xff]   ;;  %v4212_v27 = vld [vmem:[%s5456_s5 + $0x260] sm:$0xff]  }
 0x224   :  { %v4213_v46 = vld [vmem:[%s5456_s5 + $0x2e0] sm:$0xff]  }
 0x226   :  { %3812 = vmatpush3.bf16.msra.mxu0 %v4182_v47  ;;  %3834 = vmatpush3.bf16.msra.mxu1 %v4183_v48  ;;  %v4214_v47 = vld [vmem:[%s5456_s5 + $0x220] sm:$0xff]  }
 0x227   :  { %3813 = vmatprep.subr.bf16.mxu0 %v4184_v49  ;;  %3835 = vmatprep.subr.bf16.mxu1 %v4185_v50  ;;  %v4215_v48 = vld [vmem:[%s5456_s5 + $0x2a0] sm:$0xff]   ;;  %v4216_v49 = vld [vmem:[%s5456_s5 + $0x258] sm:$0xff]  }
 0x228   :  { %v4217_v50 = vld [vmem:[%s5456_s5 + $0x2d8] sm:$0xff]  }
 0x22a   :  { %3814 = vmatpush3.bf16.msra.mxu0 %v4186_v51  ;;  %3836 = vmatpush3.bf16.msra.mxu1 %v4187_v29  ;;  %v4218_v51 = vld [vmem:[%s5456_s5 + $0x218] sm:$0xff]  }
 0x22b   :  { %3815 = vmatprep.subr.bf16.mxu0 %v4188_v53  ;;  %3837 = vmatprep.subr.bf16.mxu1 %v4189_v54  ;;  %v4219_v29 = vld [vmem:[%s5456_s5 + $0x298] sm:$0xff]   ;;  %v4220_v53 = vld [vmem:[%s5456_s5 + $0x250] sm:$0xff]  }
 0x22c   :  { %v4221_v54 = vld [vmem:[%s5456_s5 + $0x2d0] sm:$0xff]  }
 0x22e   :  { %3816 = vmatpush3.bf16.msra.mxu0 %v4190_v55  ;;  %3838 = vmatpush3.bf16.msra.mxu1 %v4191_v56  ;;  %v4222_v55 = vld [vmem:[%s5456_s5 + $0x210] sm:$0xff]  }
 0x22f   :  { %v1788_v13 = vpop.f32.mrf.mxu0  ;;  %v1829_v2 = vpop.f32.mrf.mxu1  ;;  %3817 = vmatprep.subr.bf16.mxu0 %v4192_v57  ;;  %3839 = vmatprep.subr.bf16.mxu1 %v4193_v58  ;;  %v4223_v56 = vld [vmem:[%s5456_s5 + $0x290] sm:$0xff]   ;;  %v4224_v57 = vld [vmem:[%s5456_s5 + $0x248] sm:$0xff]  }
 0x230   :  { %v1789_v4 = vadd.f32 %v1788_v13, %v971_v59  ;;  %v1830_v9 = vadd.f32 %v1829_v2, %v979_v60  ;;  %v4225_v58 = vld [vmem:[%s5456_s5 + $0x2c8] sm:$0xff]  }
 0x231   :  { %v1790_v14 = vpop.f32.mrf.mxu0  ;;  %v1831_v15 = vpop.f32.mrf.mxu1  ;;  %v4226_v59 = vld [vmem:[%s5456_s5 + $0x208] sm:$0xff]  }
 0x232   :  { %v1791_v16 = vadd.f32 %v1790_v14, %v975_v10  ;;  %v1832_v17 = vadd.f32 %v1831_v15, %v983_v11  ;;  %3818 = vmatpush3.bf16.msra.mxu0 %v4194_v12  ;;  %3840 = vmatpush3.bf16.msra.mxu1 %v4195_v1  ;;  %v2004_v20 = vmax.f32 %v1789_v4, 0.0  ;;  %v2006_v24 = vmax.f32 %v1830_v9, 0.0  ;;  %v4227_v60 = vld [vmem:[%s5456_s5 + $0x288] sm:$0xff]   ;;  %v4228_v12 = vld [vmem:[%s5456_s5 + $0x240] sm:$0xff]  }
 0x233   :  { %v1792_v28 = vpop.f32.mrf.mxu0  ;;  %v1833_v30 = vpop.f32.mrf.mxu1  ;;  %3819 = vmatprep.subr.bf16.mxu0 %v4196_v3  ;;  %3841 = vmatprep.subr.bf16.mxu1 %v4197_v52  ;;  %v4229_v1 = vld [vmem:[%s5456_s5 + $0x2c0] sm:$0xff]  }
 0x234   :  { %v2005_v33 = vmax.f32 %v1791_v16, 0.0  ;;  %v2007_v34 = vmax.f32 %v1832_v17, 0.0  ;;  %v2020_v41 = vpack.c.bf16 %v2004_v20, %v2004_v20  ;;  %v2022_v42 = vpack.c.bf16 %v2006_v24, %v2006_v24  ;;  %v4230_v14 = vld [vmem:[%s5456_s5 + $0x200] sm:$0xff]  }
 0x235   :  { %v1793_v35 = vpop.f32.mrf.mxu0  ;;  %v1834_v38 = vpop.f32.mrf.mxu1  ;;  %v4231_v15 = vld [vmem:[%s5456_s5 + $0x280] sm:$0xff]  }
 0x236   :  { %v2021_v36 = vpack.c.bf16 %v2005_v33, %v2005_v33  ;;  %v2023_v37 = vpack.c.bf16 %v2007_v34, %v2007_v34  ;;  %3820 = vmatpush3.bf16.msra.mxu0 %v4198_v18  ;;  %3842 = vmatpush3.bf16.msra.mxu1 %v4199_v19  ;;  %v4236_v35 = vld [vmem:[%s5456_s5 + $0x370] sm:$0xff]  }
 0x237   :  { %3849 = vmatprep.subr.bf16.mxu0 %v4200_v31  ;;  %3871 = vmatprep.subr.bf16.mxu1 %v4201_v32  ;;  %v4234_v31 = vld [vmem:[%s5456_s5 + $0x338] sm:$0xff]   ;;  %v4237_v38 = vld [vmem:[%s5456_s5 + $0x3f0] sm:$0xff]  }
 0x238   :  { %3175 = vmatprep.mubr.bf16.mxu0 %v2021_v36  ;;  %3215 = vmatprep.mubr.bf16.mxu1 %v2023_v37  ;;  %v4235_v32 = vld [vmem:[%s5456_s5 + $0x3b8] sm:$0xff]   ;;  %v4238_v36 = vld [vmem:[%s5456_s5 + $0x330] sm:$0xff]  }
 0x239   :  { %3176 = vmatmul.mubr.bf16.vlgmr.msra.gmra.mxu0 %v2020_v41  ;;  %3216 = vmatmul.mubr.bf16.vlgmr.msra.gmra.mxu1 %v2022_v42  ;;  %v4239_v37 = vld [vmem:[%s5456_s5 + $0x3b0] sm:$0xff]   ;;  %v4242_v41 = vld [vmem:[%s5456_s5 + $0x328] sm:$0xff]  }
 0x23a   :  { %3850 = vmatpush3.bf16.msra.mxu0 %v4202_v39  ;;  %3872 = vmatpush3.bf16.msra.mxu1 %v4203_v40  ;;  %v4240_v39 = vld [vmem:[%s5456_s5 + $0x368] sm:$0xff]  }
 0x23b   :  { %3851 = vmatprep.subr.bf16.mxu0 %v4204_v43  ;;  %3873 = vmatprep.subr.bf16.mxu1 %v4205_v44  ;;  %v4241_v40 = vld [vmem:[%s5456_s5 + $0x3e8] sm:$0xff]   ;;  %v4244_v43 = vld [vmem:[%s5456_s5 + $0x360] sm:$0xff]  }
 0x23c   :  { %v4243_v42 = vld [vmem:[%s5456_s5 + $0x3a8] sm:$0xff]   ;;  %v4245_v44 = vld [vmem:[%s5456_s5 + $0x3e0] sm:$0xff]  }
 0x23e   :  { %3852 = vmatpush3.bf16.msra.mxu0 %v4206_v45  ;;  %3874 = vmatpush3.bf16.msra.mxu1 %v4207_v21  ;;  %v4246_v45 = vld [vmem:[%s5456_s5 + $0x320] sm:$0xff]  }
 0x23f   :  { %3853 = vmatprep.subr.bf16.mxu0 %v4208_v22  ;;  %3875 = vmatprep.subr.bf16.mxu1 %v4209_v23  ;;  %v4247_v21 = vld [vmem:[%s5456_s5 + $0x3a0] sm:$0xff]   ;;  %v4248_v22 = vld [vmem:[%s5456_s5 + $0x358] sm:$0xff]  }
 0x240   :  { %v4249_v23 = vld [vmem:[%s5456_s5 + $0x3d8] sm:$0xff]  }
 0x242   :  { %3854 = vmatpush3.bf16.msra.mxu0 %v4210_v25  ;;  %3876 = vmatpush3.bf16.msra.mxu1 %v4211_v26  ;;  %v4250_v25 = vld [vmem:[%s5456_s5 + $0x318] sm:$0xff]  }
 0x243   :  { %3855 = vmatprep.subr.bf16.mxu0 %v4212_v27  ;;  %3877 = vmatprep.subr.bf16.mxu1 %v4213_v46  ;;  %v4251_v26 = vld [vmem:[%s5456_s5 + $0x398] sm:$0xff]   ;;  %v4252_v27 = vld [vmem:[%s5456_s5 + $0x350] sm:$0xff]  }
 0x244   :  { %v4253_v46 = vld [vmem:[%s5456_s5 + $0x3d0] sm:$0xff]  }
 0x246   :  { %3856 = vmatpush3.bf16.msra.mxu0 %v4214_v47  ;;  %3878 = vmatpush3.bf16.msra.mxu1 %v4215_v48  ;;  %v4254_v47 = vld [vmem:[%s5456_s5 + $0x310] sm:$0xff]  }
 0x247   :  { %3857 = vmatprep.subr.bf16.mxu0 %v4216_v49  ;;  %3879 = vmatprep.subr.bf16.mxu1 %v4217_v50  ;;  %v4255_v48 = vld [vmem:[%s5456_s5 + $0x390] sm:$0xff]   ;;  %v4256_v49 = vld [vmem:[%s5456_s5 + $0x348] sm:$0xff]  }
 0x248   :  { %v4257_v50 = vld [vmem:[%s5456_s5 + $0x3c8] sm:$0xff]  }
 0x24a   :  { %3858 = vmatpush3.bf16.msra.mxu0 %v4218_v51  ;;  %3880 = vmatpush3.bf16.msra.mxu1 %v4219_v29  ;;  %v4258_v51 = vld [vmem:[%s5456_s5 + $0x308] sm:$0xff]  }
 0x24b   :  { %3859 = vmatprep.subr.bf16.mxu0 %v4220_v53  ;;  %3881 = vmatprep.subr.bf16.mxu1 %v4221_v54  ;;  %v4259_v29 = vld [vmem:[%s5456_s5 + $0x388] sm:$0xff]  }
 0x24e   :  { %3860 = vmatpush3.bf16.msra.mxu0 %v4222_v55  ;;  %3882 = vmatpush3.bf16.msra.mxu1 %v4223_v56  ;;  %v4260_v55 = vld [vmem:[%s5456_s5 + $0x340] sm:$0xff]  }
 0x24f   :  { %v1870_v10 = vpop.f32.mrf.mxu0  ;;  %v1911_v11 = vpop.f32.mrf.mxu1  ;;  %3861 = vmatprep.subr.bf16.mxu0 %v4224_v57  ;;  %3883 = vmatprep.subr.bf16.mxu1 %v4225_v58  ;;  %v4261_v56 = vld [vmem:[%s5456_s5 + $0x3c0] sm:$0xff]  }
 0x250   :  { %v1871_v13 = vadd.f32 %v1870_v10, %v5107_v61  ;;  %v1912_v2 = vadd.f32 %v1911_v11, %v5109_v62 }
 0x251   :  { %v1872_v3 = vpop.f32.mrf.mxu0  ;;  %v1913_v52 = vpop.f32.mrf.mxu1 }
 0x252   :  { %v1873_v4 = vadd.f32 %v1872_v3, %v5111_v63  ;;  %v1914_v9 = vadd.f32 %v1913_v52, %v5113_v0  ;;  %3862 = vmatpush3.bf16.msra.mxu0 %v4226_v59  ;;  %3884 = vmatpush3.bf16.msra.mxu1 %v4227_v60  ;;  %v2008_v16 = vmax.f32 %v1871_v13, 0.0  ;;  %v2010_v61 = vmax.f32 %v1912_v2, 0.0  ;;  %v4232_v63 = vld [vmem:[%s5456_s5 + $0x378] sm:$0xff]  }
 0x253   :  { %v1874_v17 = vpop.f32.mrf.mxu0  ;;  %v1915_v62 = vpop.f32.mrf.mxu1  ;;  %3863 = vmatprep.subr.bf16.mxu0 %v4228_v12  ;;  %3885 = vmatprep.subr.bf16.mxu1 %v4229_v1  ;;  %v4233_v0 = vld [vmem:[%s5456_s5 + $0x3f8] sm:$0xff]   ;;  %v4262_v12 = vld [vmem:[%s5456_s5 + $0x300] sm:$0xff]  }
 0x254   :  { %v2009_v18 = vmax.f32 %v1873_v4, 0.0  ;;  %v2011_v19 = vmax.f32 %v1914_v9, 0.0  ;;  %v2024_v33 = vpack.c.bf16 %v2008_v16, %v2008_v16  ;;  %v2026_v34 = vpack.c.bf16 %v2010_v61, %v2010_v61  ;;  %v4263_v1 = vld [vmem:[%s5456_s5 + $0x380] sm:$0xff]  }
 0x255   :  { %v1875_v20 = vpop.f32.mrf.mxu0  ;;  %v1916_v24 = vpop.f32.mrf.mxu1  ;;  %v3552_v17 = vld [vmem:[%s5458_s6] ss:$0 sm:$0xff] }
 0x256   :  { %v2025_v28 = vpack.c.bf16 %v2009_v18, %v2009_v18  ;;  %v2027_v30 = vpack.c.bf16 %v2011_v19, %v2011_v19  ;;  %3864 = vmatpush3.bf16.msra.mxu0 %v4230_v14  ;;  %3886 = vmatpush3.bf16.msra.mxu1 %v4231_v15 }
 0x257   :  { %3893 = vmatprep.subr.bf16.mxu0 %v4232_v63  ;;  %3915 = vmatprep.subr.bf16.mxu1 %v4233_v0 }
 0x258   :  { %3255 = vmatprep.mubr.bf16.mxu0 %v2025_v28  ;;  %3295 = vmatprep.mubr.bf16.mxu1 %v2027_v30 }
 0x259   :  { %3256 = vmatmul.mubr.bf16.vlgmr.msra.gmra.mxu0 %v2024_v33  ;;  %3296 = vmatmul.mubr.bf16.vlgmr.msra.gmra.mxu1 %v2026_v34 }
 0x25a   :  { %3894 = vmatpush3.bf16.msra.mxu0 %v4234_v31  ;;  %3916 = vmatpush3.bf16.msra.mxu1 %v4235_v32 }
 0x25b   :  { %3895 = vmatprep.subr.bf16.mxu0 %v4236_v35  ;;  %3917 = vmatprep.subr.bf16.mxu1 %v4237_v38 }
 0x25e   :  { %3896 = vmatpush3.bf16.msra.mxu0 %v4238_v36  ;;  %3918 = vmatpush3.bf16.msra.mxu1 %v4239_v37 }
 0x25f   :  { %3897 = vmatprep.subr.bf16.mxu0 %v4240_v39  ;;  %3919 = vmatprep.subr.bf16.mxu1 %v4241_v40 }
 0x262   :  { %3898 = vmatpush3.bf16.msra.mxu0 %v4242_v41  ;;  %3920 = vmatpush3.bf16.msra.mxu1 %v4243_v42 }
 0x263   :  { %3899 = vmatprep.subr.bf16.mxu0 %v4244_v43  ;;  %3921 = vmatprep.subr.bf16.mxu1 %v4245_v44 }
 0x266   :  { %3900 = vmatpush3.bf16.msra.mxu0 %v4246_v45  ;;  %3922 = vmatpush3.bf16.msra.mxu1 %v4247_v21 }
 0x267   :  { %3901 = vmatprep.subr.bf16.mxu0 %v4248_v22  ;;  %3923 = vmatprep.subr.bf16.mxu1 %v4249_v23 }
 0x26a   :  { %3902 = vmatpush3.bf16.msra.mxu0 %v4250_v25  ;;  %3924 = vmatpush3.bf16.msra.mxu1 %v4251_v26 }
 0x26b   :  { %3903 = vmatprep.subr.bf16.mxu0 %v4252_v27  ;;  %3925 = vmatprep.subr.bf16.mxu1 %v4253_v46 }
 0x26e   :  { %3904 = vmatpush3.bf16.msra.mxu0 %v4254_v47  ;;  %3926 = vmatpush3.bf16.msra.mxu1 %v4255_v48 }
 0x26f   :  { %v1952_v53 = vpop.f32.mrf.mxu0  ;;  %v1993_v54 = vpop.f32.mrf.mxu1  ;;  %3905 = vmatprep.subr.bf16.mxu0 %v4256_v49  ;;  %3927 = vmatprep.subr.bf16.mxu1 %v4257_v50 }
 0x270   :  { %v1953_v57 = vadd.f32 %v1952_v53, %v5121_v5  ;;  %v1994_v58 = vadd.f32 %v1993_v54, %v5125_v6 }
 0x271   :  { %v1954_v59 = vpop.f32.mrf.mxu0  ;;  %v1995_v60 = vpop.f32.mrf.mxu1 }
 0x272   :  { %v1955_v10 = vadd.f32 %v1954_v59, %v5129_v7  ;;  %v1996_v11 = vadd.f32 %v1995_v60, %v5133_v8  ;;  %3906 = vmatpush3.bf16.msra.mxu0 %v4258_v51  ;;  %3928 = vmatpush3.bf16.msra.mxu1 %v4259_v29  ;;  %v2012_v13 = vmax.f32 %v1953_v57, 0.0  ;;  %v2014_v5 = vmax.f32 %v1994_v58, 0.0 }
 0x273   :  { %v1956_v2 = vpop.f32.mrf.mxu0  ;;  %v1997_v6 = vpop.f32.mrf.mxu1  ;;  %3907 = vmatprep.subr.bf16.mxu0 %v4260_v55  ;;  %3929 = vmatprep.subr.bf16.mxu1 %v4261_v56 }
 0x274   :  { %v2013_v3 = vmax.f32 %v1955_v10, 0.0  ;;  %v2015_v7 = vmax.f32 %v1996_v11, 0.0  ;;  %v2028_v14 = vpack.c.bf16 %v2012_v13, %v2012_v13  ;;  %v2030_v15 = vpack.c.bf16 %v2014_v5, %v2014_v5 }
 0x275   :  { %v1957_v52 = vpop.f32.mrf.mxu0  ;;  %v1998_v8 = vpop.f32.mrf.mxu1 }
 0x276   :  { %v2029_v4 = vpack.c.bf16 %v2013_v3, %v2013_v3  ;;  %v2031_v9 = vpack.c.bf16 %v2015_v7, %v2015_v7  ;;  %3908 = vmatpush3.bf16.msra.mxu0 %v4262_v12  ;;  %3930 = vmatpush3.bf16.msra.mxu1 %v4263_v1 }
 0x278   :  { %3335 = vmatprep.mubr.bf16.mxu0 %v2029_v4  ;;  %3375 = vmatprep.mubr.bf16.mxu1 %v2031_v9 }
 0x279   :  { %3336 = vmatmul.mubr.bf16.vlgmr.msra.gmra.mxu0 %v2028_v14  ;;  %3376 = vmatmul.mubr.bf16.vlgmr.msra.gmra.mxu1 %v2030_v15 }
 0x2d9   :  { %v3777_v16 = vpop.f32.mrf.mxu0  ;;  %v3799_v61 = vpop.f32.mrf.mxu1 }
 0x2db   :  { %v3778_v62 = vpop.f32.mrf.mxu0  ;;  %v3800_v63 = vpop.f32.mrf.mxu1 }
 0x2dc   :  { %v3779_v0 = vadd.f32 %v3778_v62, %v3777_v16  ;;  %v3801_v18 = vadd.f32 %v3800_v63, %v3799_v61 }
 0x2dd   :  { %v3780_v19 = vpop.f32.mrf.mxu0  ;;  %v3802_v20 = vpop.f32.mrf.mxu1 }
 0x2de   :  { %v3098_v24 = vadd.f32 %v3779_v0, %v3552_v17 }
 0x2df   :  { %v3781_v28 = vpop.f32.mrf.mxu0  ;;  %v3803_v30 = vpop.f32.mrf.mxu1 }
 0x2e0   :  { %v3138_v31 = vadd.f32 %v3801_v18, %v3098_v24 }
 0x2f9   :  { %v3821_v32 = vpop.f32.mrf.mxu0  ;;  %v3843_v33 = vpop.f32.mrf.mxu1 }
 0x2fb   :  { %v3822_v34 = vpop.f32.mrf.mxu0  ;;  %v3844_v35 = vpop.f32.mrf.mxu1 }
 0x2fc   :  { %v3823_v23 = vadd.f32 %v3822_v34, %v3821_v32  ;;  %v3845_v26 = vadd.f32 %v3844_v35, %v3843_v33 }
 0x2fd   :  { %v3824_v38 = vpop.f32.mrf.mxu0  ;;  %v3846_v36 = vpop.f32.mrf.mxu1 }
 0x2fe   :  { %v3178_v25 = vadd.f32 %v3823_v23, %v3138_v31 }
 0x2ff   :  { %v3825_v37 = vpop.f32.mrf.mxu0  ;;  %v3847_v39 = vpop.f32.mrf.mxu1 }
 0x300   :  { %v3218_v46 = vadd.f32 %v3845_v26, %v3178_v25 }
 0x319   :  { %v3865_v40 = vpop.f32.mrf.mxu0  ;;  %v3887_v41 = vpop.f32.mrf.mxu1 }
 0x31b   :  { %v3866_v42 = vpop.f32.mrf.mxu0  ;;  %v3888_v43 = vpop.f32.mrf.mxu1 }
 0x31c   :  { %v3867_v27 = vadd.f32 %v3866_v42, %v3865_v40  ;;  %v3889_v50 = vadd.f32 %v3888_v43, %v3887_v41 }
 0x31d   :  { %v3868_v44 = vpop.f32.mrf.mxu0  ;;  %v3890_v45 = vpop.f32.mrf.mxu1 }
 0x31e   :  { %v3258_v47 = vadd.f32 %v3867_v27, %v3218_v46 }
 0x31f   :  { %v3869_v21 = vpop.f32.mrf.mxu0  ;;  %v3891_v22 = vpop.f32.mrf.mxu1 }
 0x320   :  { %v3298_v53 = vadd.f32 %v3889_v50, %v3258_v47 }
 0x339   :  { %v3909_v48 = vpop.f32.mrf.mxu0  ;;  %v3931_v49 = vpop.f32.mrf.mxu1 }
 0x33b   :  { %v3910_v51 = vpop.f32.mrf.mxu0  ;;  %v3932_v29 = vpop.f32.mrf.mxu1 }
 0x33c   :  { %v3911_v54 = vadd.f32 %v3910_v51, %v3909_v48  ;;  %v3933_v58 = vadd.f32 %v3932_v29, %v3931_v49 }
 0x33d   :  { %v3912_v55 = vpop.f32.mrf.mxu0  ;;  %v3934_v56 = vpop.f32.mrf.mxu1 }
 0x33e   :  { %v3338_v57 = vadd.f32 %v3911_v54, %v3298_v53 }
 0x33f   :  { %v3913_v59 = vpop.f32.mrf.mxu0  ;;  %v3935_v60 = vpop.f32.mrf.mxu1 }
 0x340   :  { %v3378_v10 = vadd.f32 %v3933_v58, %v3338_v57 }
 0x342   :  { %3383 = vst [vmem:[%s5459_s7] sm:$0xff] %v3378_v10 }

// kernel: _forward_impl.1
= control target key start
LH: loop header
LB: loop body
LE: loop exit
PB: predicated region body
PF: predicated region fallthrough
CT: control target
= control target key end

     0   :  { %v4264_v0 = vmov 0.0   ;;  %vm4265_vm0 = vmmov 0   ;;  %vm67_vm1 = vcmask 523264   ;;  %s5452_s1 = inlined_call_operand.vmem [shape: bf16[64,128], index: 1, kind: input, shape index: {}]   ;;  %s5453_s0 = inlined_call_operand.vmem [shape: bf16[16,8,64], index: 0, kind: input, shape index: {}]   ;;  %s5454_s3 = inlined_call_operand.vmem [shape: bf16[128,2048], index: 3, kind: input, shape index: {}]   ;;  %s5455_s2 = inlined_call_operand.vmem [shape: f32[1,128], index: 2, kind: input, shape index: {}]   ;;  %s5456_s5 = inlined_call_operand.vmem [shape: bf16[2048,128], index: 5, kind: input, shape index: {}]   ;;  %s5457_s4 = inlined_call_operand.vmem [shape: f32[1,2048], index: 4, kind: input, shape index: {}]   ;;  %s5458_s6 = inlined_call_operand.vmem [shape: f32[1,128], index: 6, kind: input, shape index: {}]   ;;  %s5459_s7 = inlined_call_operand.vmem [shape: f32[8,128], index: 7, kind: output, shape index: {}]  }
   0x1   :  { %3937 = vmatprep.subr.bf16.mxu0 %v4264_v0  ;;  %3949 = vmatprep.subr.bf16.mxu1 %v4264_v0  ;;  %v4312_v1 = vld [vmem:[%s5452_s1 + $0x18] sm:$0xff]   ;;  %v4323_v2 = vld [vmem:[%s5452_s1 + $0x10] sm:$0xff]   ;;  %v4332_v3 = vld [vmem:[%s5452_s1 + $0x8] sm:$0xff]  }
   0x2   :  { %3945 = vmatprep.mubr.msk.bf16.mxu0 %vm4265_vm0, %v4264_v0  ;;  %3957 = vmatprep.mubr.msk.bf16.mxu1 %vm4265_vm0, %v4264_v0  ;;  %v4341_v4 = vld [vmem:[%s5452_s1] sm:$0xff]   ;;  %v3396_v7 = vld [vmem:[%s5453_s0 + $0x8] sm:$0xf]  ;;  %v3398_v8 = vld [vmem:[%s5453_s0 + $0xc] sm:$0xf] }
   0x3   :  { %3938 = vmatpush3.bf16.msra.mxu0 %v4312_v1  ;;  %3950 = vmatpush3.bf16.msra.mxu1 %v4312_v1  ;;  %v36_v5 = vld [vmem:[%s5453_s0] sm:$0xf]  ;;  %v3394_v6 = vld [vmem:[%s5453_s0 + $0x4] sm:$0xf]  ;;  %v3400_v9 = vld [vmem:[%s5453_s0 + $0x10] sm:$0xf] }
   0x4   :  { %3939 = vmatprep.subr.bf16.mxu0 %v4264_v0  ;;  %3951 = vmatprep.subr.bf16.mxu1 %v4264_v0  ;;  %v3402_v10 = vld [vmem:[%s5453_s0 + $0x14] sm:$0xf]  ;;  %v3404_v11 = vld [vmem:[%s5453_s0 + $0x18] sm:$0xf]  ;;  %v3406_v12 = vld [vmem:[%s5453_s0 + $0x1c] sm:$0xf] }
   0x5   :  { %v3408_v13 = vld [vmem:[%s5453_s0 + $0x20] sm:$0xf]  ;;  %v3410_v14 = vld [vmem:[%s5453_s0 + $0x24] sm:$0xf]  ;;  %v3412_v15 = vld [vmem:[%s5453_s0 + $0x28] sm:$0xf] }
   0x6   :  { %v3414_v16 = vld [vmem:[%s5453_s0 + $0x2c] sm:$0xf]  ;;  %v3416_v17 = vld [vmem:[%s5453_s0 + $0x30] sm:$0xf]  ;;  %v3418_v18 = vld [vmem:[%s5453_s0 + $0x34] sm:$0xf] }
   0x7   :  { %3940 = vmatpush3.bf16.msra.mxu0 %v4323_v2  ;;  %3952 = vmatpush3.bf16.msra.mxu1 %v4323_v2  ;;  %v3420_v19 = vld [vmem:[%s5453_s0 + $0x38] sm:$0xf]  ;;  %v3422_v20 = vld [vmem:[%s5453_s0 + $0x3c] sm:$0xf]  ;;  %v932_v21 = vld [vmem:[%s5454_s3 + $0x380] sm:$0xff] }
   0x8   :  { %3941 = vmatprep.subr.bf16.mxu0 %v4264_v0  ;;  %3953 = vmatprep.subr.bf16.mxu1 %v4264_v0  ;;  %v940_v22 = vld [vmem:[%s5454_s3 + $0x3c0] sm:$0xff]  ;;  %v933_v23 = vld [vmem:[%s5454_s3 + $0x388] sm:$0xff] }
   0x9   :  { %v3536_v24 = vcombine.low %v932_v21, %v940_v22  ;;  %v3537_v25 = vcombine.high %v932_v21, %v940_v22  ;;  %v941_v26 = vld [vmem:[%s5454_s3 + $0x3c8] sm:$0xff]  ;;  %v916_v29 = vld [vmem:[%s5454_s3 + $0x300] sm:$0xff]  ;;  %v4650_v21 = vld [vmem:[%s5454_s3 + $0x390] sm:$0xff] }
   0xa   :  { %v3538_v27 = vcombine.low %v933_v23, %v941_v26  ;;  %v3539_v28 = vcombine.high %v933_v23, %v941_v26  ;;  %v924_v30 = vld [vmem:[%s5454_s3 + $0x340] sm:$0xff]  ;;  %v917_v31 = vld [vmem:[%s5454_s3 + $0x308] sm:$0xff]  ;;  %v4655_v22 = vld [vmem:[%s5454_s3 + $0x3d0] sm:$0xff] }
   0xb   :  { %3942 = vmatpush3.bf16.msra.mxu0 %v4332_v3  ;;  %3954 = vmatpush3.bf16.msra.mxu1 %v4332_v3  ;;  %v3521_v32 = vcombine.high %v916_v29, %v924_v30  ;;  %v925_v33 = vld [vmem:[%s5454_s3 + $0x348] sm:$0xff]  ;;  %v3520_v34 = vcombine.low %v916_v29, %v924_v30  ;;  %v900_v37 = vld [vmem:[%s5454_s3 + $0x280] sm:$0xff]  ;;  %v4660_v23 = vld [vmem:[%s5454_s3 + $0x398] sm:$0xff]  ;;  %v3540_v26 = vcombine.low %v4650_v21, %v4655_v22  ;;  %v4266_v29 = vmov 0  }
   0xc   :  { %3943 = vmatprep.subr.bf16.mxu0 %v4264_v0  ;;  %3955 = vmatprep.subr.bf16.mxu1 %v4264_v0  ;;  %v3522_v35 = vcombine.low %v917_v31, %v925_v33  ;;  %v3523_v36 = vcombine.high %v917_v31, %v925_v33  ;;  %v908_v38 = vld [vmem:[%s5454_s3 + $0x2c0] sm:$0xff]  ;;  %v901_v39 = vld [vmem:[%s5454_s3 + $0x288] sm:$0xff] }
   0xd   :  { %v3505_v40 = vcombine.high %v900_v37, %v908_v38  ;;  %v909_v41 = vld [vmem:[%s5454_s3 + $0x2c8] sm:$0xff]  ;;  %v3504_v42 = vcombine.low %v900_v37, %v908_v38  ;;  %v884_v45 = vld [vmem:[%s5454_s3 + $0x200] sm:$0xff] }
   0xe   :  { %v3506_v43 = vcombine.low %v901_v39, %v909_v41  ;;  %v3507_v44 = vcombine.high %v901_v39, %v909_v41  ;;  %v892_v46 = vld [vmem:[%s5454_s3 + $0x240] sm:$0xff]  ;;  %v885_v47 = vld [vmem:[%s5454_s3 + $0x208] sm:$0xff] }
   0xf   :  { %3944 = vmatpush3.bf16.msra.mxu0 %v4341_v4  ;;  %3956 = vmatpush3.bf16.msra.mxu1 %v4341_v4  ;;  %v3489_v48 = vcombine.high %v884_v45, %v892_v46  ;;  %v893_v49 = vld [vmem:[%s5454_s3 + $0x248] sm:$0xff]  ;;  %v3488_v50 = vcombine.low %v884_v45, %v892_v46  ;;  %v868_v53 = vld [vmem:[%s5454_s3 + $0x180] sm:$0xff] }
  0x10   :  { %3961 = vmatprep.subr.bf16.mxu0 %v4264_v0  ;;  %3973 = vmatprep.subr.bf16.mxu1 %v4264_v0  ;;  %v3490_v51 = vcombine.low %v885_v47, %v893_v49  ;;  %v3491_v52 = vcombine.high %v885_v47, %v893_v49  ;;  %v876_v54 = vld [vmem:[%s5454_s3 + $0x1c0] sm:$0xff]  ;;  %v869_v55 = vld [vmem:[%s5454_s3 + $0x188] sm:$0xff] }
  0x11   :  { %v3473_v56 = vcombine.high %v868_v53, %v876_v54  ;;  %v877_v57 = vld [vmem:[%s5454_s3 + $0x1c8] sm:$0xff]  ;;  %v3472_v58 = vcombine.low %v868_v53, %v876_v54  ;;  %v852_v61 = vld [vmem:[%s5454_s3 + $0x100] sm:$0xff] }
  0x12   :  { %3946 = vmatmul.mubr.msk.bf16.vlgmr.msra.gmra.mxu0 %vm67_vm1, %v36_v5  ;;  %3958 = vmatmul.mubr.msk.bf16.vlgmr.msra.gmra.mxu1 %vm67_vm1, %v3394_v6  ;;  %v3475_v59 = vcombine.high %v869_v55, %v877_v57  ;;  %v3474_v60 = vcombine.low %v869_v55, %v877_v57  ;;  %v860_v62 = vld [vmem:[%s5454_s3 + $0x140] sm:$0xff]  ;;  %v853_v63 = vld [vmem:[%s5454_s3 + $0x108] sm:$0xff] }
  0x13   :  { %3962 = vmatpush3.bf16.msra.mxu0 %v4312_v1  ;;  %3974 = vmatpush3.bf16.msra.mxu1 %v4312_v1  ;;  %v836_v5 = vld [vmem:[%s5454_s3 + $0x80] sm:$0xff] }
  0x14   :  { %3963 = vmatprep.subr.bf16.mxu0 %v4264_v0  ;;  %3975 = vmatprep.subr.bf16.mxu1 %v4264_v0  ;;  %v844_v6 = vld [vmem:[%s5454_s3 + $0xc0] sm:$0xff] }
  0x15   :  { %3969 = vmatprep.mubr.msk.bf16.mxu0 %vm4265_vm0, %v4264_v0  ;;  %3981 = vmatprep.mubr.msk.bf16.mxu1 %vm4265_vm0, %v4264_v0  ;;  %v4680_v30 = vld [vmem:[%s5455_s2] ss:$0 sm:$0xff] }
  0x17   :  { %3964 = vmatpush3.bf16.msra.mxu0 %v4323_v2  ;;  %3976 = vmatpush3.bf16.msra.mxu1 %v4323_v2 }
  0x18   :  { %3965 = vmatprep.subr.bf16.mxu0 %v4264_v0  ;;  %3977 = vmatprep.subr.bf16.mxu1 %v4264_v0 }
  0x1b   :  { %3966 = vmatpush3.bf16.msra.mxu0 %v4332_v3  ;;  %3978 = vmatpush3.bf16.msra.mxu1 %v4332_v3 }
  0x1c   :  { %3967 = vmatprep.subr.bf16.mxu0 %v4264_v0  ;;  %3979 = vmatprep.subr.bf16.mxu1 %v4264_v0 }
  0x1f   :  { %3968 = vmatpush3.bf16.msra.mxu0 %v4341_v4  ;;  %3980 = vmatpush3.bf16.msra.mxu1 %v4341_v4 }
  0x20   :  { %3985 = vmatprep.subr.bf16.mxu0 %v4264_v0  ;;  %3997 = vmatprep.subr.bf16.mxu1 %v4264_v0 }
  0x22   :  { %3970 = vmatmul.mubr.msk.bf16.vlgmr.msra.gmra.mxu0 %vm67_vm1, %v3396_v7  ;;  %3982 = vmatmul.mubr.msk.bf16.vlgmr.msra.gmra.mxu1 %vm67_vm1, %v3398_v8  ;;  %v837_v7 = vld [vmem:[%s5454_s3 + $0x88] sm:$0xff]  ;;  %v3441_v8 = vcombine.high %v836_v5, %v844_v6 }
  0x23   :  { %3986 = vmatpush3.bf16.msra.mxu0 %v4312_v1  ;;  %3998 = vmatpush3.bf16.msra.mxu1 %v4312_v1 }
  0x24   :  { %3987 = vmatprep.subr.bf16.mxu0 %v4264_v0  ;;  %3999 = vmatprep.subr.bf16.mxu1 %v4264_v0 }
  0x25   :  { %3993 = vmatprep.mubr.msk.bf16.mxu0 %vm4265_vm0, %v4264_v0  ;;  %4005 = vmatprep.mubr.msk.bf16.mxu1 %vm4265_vm0, %v4264_v0 }
  0x27   :  { %3988 = vmatpush3.bf16.msra.mxu0 %v4323_v2  ;;  %4000 = vmatpush3.bf16.msra.mxu1 %v4323_v2 }
  0x28   :  { %3989 = vmatprep.subr.bf16.mxu0 %v4264_v0  ;;  %4001 = vmatprep.subr.bf16.mxu1 %v4264_v0 }
  0x2b   :  { %3990 = vmatpush3.bf16.msra.mxu0 %v4332_v3  ;;  %4002 = vmatpush3.bf16.msra.mxu1 %v4332_v3 }
  0x2c   :  { %3991 = vmatprep.subr.bf16.mxu0 %v4264_v0  ;;  %4003 = vmatprep.subr.bf16.mxu1 %v4264_v0 }
  0x2f   :  { %3992 = vmatpush3.bf16.msra.mxu0 %v4341_v4  ;;  %4004 = vmatpush3.bf16.msra.mxu1 %v4341_v4 }
  0x30   :  { %4009 = vmatprep.subr.bf16.mxu0 %v4264_v0  ;;  %4021 = vmatprep.subr.bf16.mxu1 %v4264_v0 }
  0x32   :  { %3994 = vmatmul.mubr.msk.bf16.vlgmr.msra.gmra.mxu0 %vm67_vm1, %v3400_v9  ;;  %4006 = vmatmul.mubr.msk.bf16.vlgmr.msra.gmra.mxu1 %vm67_vm1, %v3402_v10  ;;  %v845_v9 = vld [vmem:[%s5454_s3 + $0xc8] sm:$0xff]  ;;  %v3440_v10 = vcombine.low %v836_v5, %v844_v6 }
  0x33   :  { %4010 = vmatpush3.bf16.msra.mxu0 %v4312_v1  ;;  %4022 = vmatpush3.bf16.msra.mxu1 %v4312_v1 }
  0x34   :  { %4011 = vmatprep.subr.bf16.mxu0 %v4264_v0  ;;  %4023 = vmatprep.subr.bf16.mxu1 %v4264_v0 }
  0x35   :  { %4017 = vmatprep.mubr.msk.bf16.mxu0 %vm4265_vm0, %v4264_v0  ;;  %4029 = vmatprep.mubr.msk.bf16.mxu1 %vm4265_vm0, %v4264_v0 }
  0x37   :  { %4012 = vmatpush3.bf16.msra.mxu0 %v4323_v2  ;;  %4024 = vmatpush3.bf16.msra.mxu1 %v4323_v2 }
  0x38   :  { %4013 = vmatprep.subr.bf16.mxu0 %v4264_v0  ;;  %4025 = vmatprep.subr.bf16.mxu1 %v4264_v0 }
  0x3b   :  { %4014 = vmatpush3.bf16.msra.mxu0 %v4332_v3  ;;  %4026 = vmatpush3.bf16.msra.mxu1 %v4332_v3 }
  0x3c   :  { %4015 = vmatprep.subr.bf16.mxu0 %v4264_v0  ;;  %4027 = vmatprep.subr.bf16.mxu1 %v4264_v0 }
  0x3f   :  { %4016 = vmatpush3.bf16.msra.mxu0 %v4341_v4  ;;  %4028 = vmatpush3.bf16.msra.mxu1 %v4341_v4 }
  0x40   :  { %4033 = vmatprep.subr.bf16.mxu0 %v4264_v0  ;;  %4045 = vmatprep.subr.bf16.mxu1 %v4264_v0 }
  0x42   :  { %4018 = vmatmul.mubr.msk.bf16.vlgmr.msra.gmra.mxu0 %vm67_vm1, %v3404_v11  ;;  %4030 = vmatmul.mubr.msk.bf16.vlgmr.msra.gmra.mxu1 %vm67_vm1, %v3406_v12  ;;  %v3442_v11 = vcombine.low %v837_v7, %v845_v9  ;;  %v3443_v12 = vcombine.high %v837_v7, %v845_v9 }
  0x43   :  { %4034 = vmatpush3.bf16.msra.mxu0 %v4312_v1  ;;  %4046 = vmatpush3.bf16.msra.mxu1 %v4312_v1 }
  0x44   :  { %4035 = vmatprep.subr.bf16.mxu0 %v4264_v0  ;;  %4047 = vmatprep.subr.bf16.mxu1 %v4264_v0 }
  0x45   :  { %4041 = vmatprep.mubr.msk.bf16.mxu0 %vm4265_vm0, %v4264_v0  ;;  %4053 = vmatprep.mubr.msk.bf16.mxu1 %vm4265_vm0, %v4264_v0 }
  0x47   :  { %4036 = vmatpush3.bf16.msra.mxu0 %v4323_v2  ;;  %4048 = vmatpush3.bf16.msra.mxu1 %v4323_v2 }
  0x48   :  { %4037 = vmatprep.subr.bf16.mxu0 %v4264_v0  ;;  %4049 = vmatprep.subr.bf16.mxu1 %v4264_v0 }
  0x4b   :  { %4038 = vmatpush3.bf16.msra.mxu0 %v4332_v3  ;;  %4050 = vmatpush3.bf16.msra.mxu1 %v4332_v3 }
  0x4c   :  { %4039 = vmatprep.subr.bf16.mxu0 %v4264_v0  ;;  %4051 = vmatprep.subr.bf16.mxu1 %v4264_v0 }
  0x4f   :  { %4040 = vmatpush3.bf16.msra.mxu0 %v4341_v4  ;;  %4052 = vmatpush3.bf16.msra.mxu1 %v4341_v4 }
  0x50   :  { %4057 = vmatprep.subr.bf16.mxu0 %v4264_v0  ;;  %4069 = vmatprep.subr.bf16.mxu1 %v4264_v0 }
  0x52   :  { %4042 = vmatmul.mubr.msk.bf16.vlgmr.msra.gmra.mxu0 %vm67_vm1, %v3408_v13  ;;  %4054 = vmatmul.mubr.msk.bf16.vlgmr.msra.gmra.mxu1 %vm67_vm1, %v3410_v14  ;;  %v820_v13 = vld [vmem:[%s5454_s3] sm:$0xff] }
  0x53   :  { %4058 = vmatpush3.bf16.msra.mxu0 %v4312_v1  ;;  %4070 = vmatpush3.bf16.msra.mxu1 %v4312_v1  ;;  %v828_v14 = vld [vmem:[%s5454_s3 + $0x40] sm:$0xff] }
  0x54   :  { %4059 = vmatprep.subr.bf16.mxu0 %v4264_v0  ;;  %4071 = vmatprep.subr.bf16.mxu1 %v4264_v0 }
  0x55   :  { %4065 = vmatprep.mubr.msk.bf16.mxu0 %vm4265_vm0, %v4264_v0  ;;  %4077 = vmatprep.mubr.msk.bf16.mxu1 %vm4265_vm0, %v4264_v0 }
  0x57   :  { %4060 = vmatpush3.bf16.msra.mxu0 %v4323_v2  ;;  %4072 = vmatpush3.bf16.msra.mxu1 %v4323_v2 }
  0x58   :  { %4061 = vmatprep.subr.bf16.mxu0 %v4264_v0  ;;  %4073 = vmatprep.subr.bf16.mxu1 %v4264_v0 }
  0x5b   :  { %4062 = vmatpush3.bf16.msra.mxu0 %v4332_v3  ;;  %4074 = vmatpush3.bf16.msra.mxu1 %v4332_v3 }
  0x5c   :  { %4063 = vmatprep.subr.bf16.mxu0 %v4264_v0  ;;  %4075 = vmatprep.subr.bf16.mxu1 %v4264_v0 }
  0x5f   :  { %4064 = vmatpush3.bf16.msra.mxu0 %v4341_v4  ;;  %4076 = vmatpush3.bf16.msra.mxu1 %v4341_v4 }
  0x60   :  { %4081 = vmatprep.subr.bf16.mxu0 %v4264_v0  ;;  %4093 = vmatprep.subr.bf16.mxu1 %v4264_v0 }
  0x62   :  { %4066 = vmatmul.mubr.msk.bf16.vlgmr.msra.gmra.mxu0 %vm67_vm1, %v3412_v15  ;;  %4078 = vmatmul.mubr.msk.bf16.vlgmr.msra.gmra.mxu1 %vm67_vm1, %v3414_v16  ;;  %v821_v15 = vld [vmem:[%s5454_s3 + $0x8] sm:$0xff]  ;;  %v3425_v16 = vcombine.high %v820_v13, %v828_v14 }
  0x63   :  { %4082 = vmatpush3.bf16.msra.mxu0 %v4312_v1  ;;  %4094 = vmatpush3.bf16.msra.mxu1 %v4312_v1 }
  0x64   :  { %4083 = vmatprep.subr.bf16.mxu0 %v4264_v0  ;;  %4095 = vmatprep.subr.bf16.mxu1 %v4264_v0 }
  0x65   :  { %4089 = vmatprep.mubr.msk.bf16.mxu0 %vm4265_vm0, %v4264_v0  ;;  %4101 = vmatprep.mubr.msk.bf16.mxu1 %vm4265_vm0, %v4264_v0 }
  0x67   :  { %4084 = vmatpush3.bf16.msra.mxu0 %v4323_v2  ;;  %4096 = vmatpush3.bf16.msra.mxu1 %v4323_v2 }
  0x68   :  { %4085 = vmatprep.subr.bf16.mxu0 %v4264_v0  ;;  %4097 = vmatprep.subr.bf16.mxu1 %v4264_v0 }
  0x6b   :  { %4086 = vmatpush3.bf16.msra.mxu0 %v4332_v3  ;;  %4098 = vmatpush3.bf16.msra.mxu1 %v4332_v3 }
  0x6c   :  { %4087 = vmatprep.subr.bf16.mxu0 %v4264_v0  ;;  %4099 = vmatprep.subr.bf16.mxu1 %v4264_v0 }
  0x6f   :  { %4088 = vmatpush3.bf16.msra.mxu0 %v4341_v4  ;;  %4100 = vmatpush3.bf16.msra.mxu1 %v4341_v4 }
  0x70   :  { %4105 = vmatprep.subr.bf16.mxu0 %v4264_v0  ;;  %4117 = vmatprep.subr.bf16.mxu1 %v4264_v0 }
  0x72   :  { %4090 = vmatmul.mubr.msk.bf16.vlgmr.msra.gmra.mxu0 %vm67_vm1, %v3416_v17  ;;  %4102 = vmatmul.mubr.msk.bf16.vlgmr.msra.gmra.mxu1 %vm67_vm1, %v3418_v18  ;;  %v829_v17 = vld [vmem:[%s5454_s3 + $0x48] sm:$0xff]  ;;  %v3424_v18 = vcombine.low %v820_v13, %v828_v14 }
  0x73   :  { %4106 = vmatpush3.bf16.msra.mxu0 %v4312_v1  ;;  %4118 = vmatpush3.bf16.msra.mxu1 %v4312_v1  ;;  %v861_v1 = vld [vmem:[%s5454_s3 + $0x148] sm:$0xff] }
  0x74   :  { %4107 = vmatprep.subr.bf16.mxu0 %v4264_v0  ;;  %4119 = vmatprep.subr.bf16.mxu1 %v4264_v0 }
  0x75   :  { %4113 = vmatprep.mubr.msk.bf16.mxu0 %vm4265_vm0, %v4264_v0  ;;  %4125 = vmatprep.mubr.msk.bf16.mxu1 %vm4265_vm0, %v4264_v0 }
  0x77   :  { %4108 = vmatpush3.bf16.msra.mxu0 %v4323_v2  ;;  %4120 = vmatpush3.bf16.msra.mxu1 %v4323_v2  ;;  %v3456_v2 = vcombine.low %v852_v61, %v860_v62 }
  0x78   :  { %4109 = vmatprep.subr.bf16.mxu0 %v4264_v0  ;;  %4121 = vmatprep.subr.bf16.mxu1 %v4264_v0 }
  0x7b   :  { %4110 = vmatpush3.bf16.msra.mxu0 %v4332_v3  ;;  %4122 = vmatpush3.bf16.msra.mxu1 %v4332_v3  ;;  %v3458_v3 = vcombine.low %v853_v63, %v861_v1 }
  0x7c   :  { %4111 = vmatprep.subr.bf16.mxu0 %v4264_v0  ;;  %4123 = vmatprep.subr.bf16.mxu1 %v4264_v0  ;;  %v3457_v0 = vcombine.high %v852_v61, %v860_v62 }
  0x7f   :  { %4112 = vmatpush3.bf16.msra.mxu0 %v4341_v4  ;;  %4124 = vmatpush3.bf16.msra.mxu1 %v4341_v4  ;;  %v3459_v4 = vcombine.high %v853_v63, %v861_v1 }
  0x80   :  { %1672 = vmatprep.subr.bf16.mxu0 %v3537_v25  ;;  %1713 = vmatprep.subr.bf16.mxu1 %v3539_v28  ;;  %v4667_v25 = vld [vmem:[%s5454_s3 + $0x3d8] sm:$0xff] }
  0x81   :  { %v3543_v28 = vcombine.high %v4660_v23, %v4667_v25 }
  0x82   :  { %4114 = vmatmul.mubr.msk.bf16.vlgmr.msra.gmra.mxu0 %vm67_vm1, %v3420_v19  ;;  %4126 = vmatmul.mubr.msk.bf16.vlgmr.msra.gmra.mxu1 %vm67_vm1, %v3422_v20  ;;  %v3426_v19 = vcombine.low %v821_v15, %v829_v17  ;;  %v3427_v20 = vcombine.high %v821_v15, %v829_v17 }
  0x83   :  { %1673 = vmatpush1.bf16.msra.mxu0 %v3536_v24  ;;  %1714 = vmatpush1.bf16.msra.mxu1 %v3538_v27  ;;  %v3541_v24 = vcombine.high %v4650_v21, %v4655_v22  ;;  %v3542_v27 = vcombine.low %v4660_v23, %v4667_v25  ;;  %v895_v21 = vld [vmem:[%s5454_s3 + $0x258] sm:$0xff] }
  0x84   :  { %1674 = vmatprep.subr.bf16.mxu0 %v3521_v32  ;;  %1715 = vmatprep.subr.bf16.mxu1 %v3523_v36 }
  0x85   :  { %1704 = vmatprep.mubr.bf16.mxu0 %v4266_v29  ;;  %1745 = vmatprep.mubr.bf16.mxu1 %v4266_v29 }
  0x87   :  { %1675 = vmatpush1.bf16.msra.mxu0 %v3520_v34  ;;  %1716 = vmatpush1.bf16.msra.mxu1 %v3522_v35 }
  0x88   :  { %1676 = vmatprep.subr.bf16.mxu0 %v3505_v40  ;;  %1717 = vmatprep.subr.bf16.mxu1 %v3507_v44 }
  0x8b   :  { %1677 = vmatpush1.bf16.msra.mxu0 %v3504_v42  ;;  %1718 = vmatpush1.bf16.msra.mxu1 %v3506_v43 }
  0x8c   :  { %1678 = vmatprep.subr.bf16.mxu0 %v3489_v48  ;;  %1719 = vmatprep.subr.bf16.mxu1 %v3491_v52 }
  0x8f   :  { %1679 = vmatpush1.bf16.msra.mxu0 %v3488_v50  ;;  %1720 = vmatpush1.bf16.msra.mxu1 %v3490_v51 }
  0x90   :  { %1680 = vmatprep.subr.bf16.mxu0 %v3473_v56  ;;  %1721 = vmatprep.subr.bf16.mxu1 %v3475_v59 }
  0x93   :  { %1681 = vmatpush1.bf16.msra.mxu0 %v3472_v58  ;;  %1722 = vmatpush1.bf16.msra.mxu1 %v3474_v60 }
  0x94   :  { %1682 = vmatprep.subr.bf16.mxu0 %v3457_v0  ;;  %1723 = vmatprep.subr.bf16.mxu1 %v3459_v4 }
  0x97   :  { %1683 = vmatpush1.bf16.msra.mxu0 %v3456_v2  ;;  %1724 = vmatpush1.bf16.msra.mxu1 %v3458_v3 }
  0x98   :  { %1684 = vmatprep.subr.bf16.mxu0 %v3441_v8  ;;  %1725 = vmatprep.subr.bf16.mxu1 %v3443_v12 }
  0x9b   :  { %1685 = vmatpush1.bf16.msra.mxu0 %v3440_v10  ;;  %1726 = vmatpush1.bf16.msra.mxu1 %v3442_v11 }
  0x9c   :  { %1686 = vmatprep.subr.bf16.mxu0 %v3425_v16  ;;  %1727 = vmatprep.subr.bf16.mxu1 %v3427_v20 }
  0x9f   :  { %1687 = vmatpush1.bf16.msra.mxu0 %v3424_v18  ;;  %1728 = vmatpush1.bf16.msra.mxu1 %v3426_v19 }
  0xa0   :  { %1754 = vmatprep.subr.bf16.mxu0 %v3541_v24  ;;  %1795 = vmatprep.subr.bf16.mxu1 %v3543_v28 }
  0xd2   :  { %v105_v31 = vpop.f32.mrf.mxu0  ;;  %v152_v32 = vpop.f32.mrf.mxu1 }
  0xd3   :  { %v106_v33 = vadd.f32 %v4680_v30, %v105_v31  ;;  %v153_v34 = vadd.f32 %v4680_v30, %v152_v32 }
  0xd4   :  { %v3947_v35 = vpop.f32.mrf.mxu0  ;;  %v3959_v36 = vpop.f32.mrf.mxu1 }
  0xd5   :  { %v111_v37 = vmax.f32 %v106_v33, 0.0  ;;  %v158_v38 = vmax.f32 %v153_v34, 0.0 }
  0xd6   :  { %v108_v39 = vpop.f32.mrf.mxu0  ;;  %v155_v40 = vpop.f32.mrf.mxu1 }
  0xd7   :  { %v159_v41 = vadd.f32 %v158_v38, %v111_v37 }
  0xd8   :  { %v3948_v42 = vpop.f32.mrf.mxu0  ;;  %v3960_v43 = vpop.f32.mrf.mxu1 }
  0xe2   :  { %v199_v44 = vpop.f32.mrf.mxu0  ;;  %v246_v45 = vpop.f32.mrf.mxu1 }
  0xe3   :  { %v200_v46 = vadd.f32 %v4680_v30, %v199_v44  ;;  %v247_v47 = vadd.f32 %v4680_v30, %v246_v45 }
  0xe4   :  { %v3971_v48 = vpop.f32.mrf.mxu0  ;;  %v3983_v49 = vpop.f32.mrf.mxu1 }
  0xe5   :  { %v205_v50 = vmax.f32 %v200_v46, 0.0  ;;  %v252_v51 = vmax.f32 %v247_v47, 0.0 }
  0xe6   :  { %v202_v52 = vpop.f32.mrf.mxu0  ;;  %v249_v53 = vpop.f32.mrf.mxu1 }
  0xe7   :  { %v206_v54 = vadd.f32 %v205_v50, %v159_v41 }
  0xe8   :  { %v3972_v55 = vpop.f32.mrf.mxu0  ;;  %v3984_v56 = vpop.f32.mrf.mxu1 }
  0xe9   :  { %v253_v57 = vadd.f32 %v252_v51, %v206_v54 }
  0xf2   :  { %v293_v58 = vpop.f32.mrf.mxu0  ;;  %v340_v59 = vpop.f32.mrf.mxu1 }
  0xf3   :  { %v294_v18 = vadd.f32 %v4680_v30, %v293_v58  ;;  %v341_v32 = vadd.f32 %v4680_v30, %v340_v59 }
  0xf4   :  { %v3995_v60 = vpop.f32.mrf.mxu0  ;;  %v4007_v61 = vpop.f32.mrf.mxu1 }
  0xf5   :  { %v299_v31 = vmax.f32 %v294_v18, 0.0  ;;  %v346_v39 = vmax.f32 %v341_v32, 0.0  ;;  %v927_v32 = vld [vmem:[%s5454_s3 + $0x358] sm:$0xff] }
  0xf6   :  { %v296_v62 = vpop.f32.mrf.mxu0  ;;  %v343_v63 = vpop.f32.mrf.mxu1 }
  0xf7   :  { %v300_v38 = vadd.f32 %v299_v31, %v253_v57 }
  0xf8   :  { %v3996_v0 = vpop.f32.mrf.mxu0  ;;  %v4008_v1 = vpop.f32.mrf.mxu1 }
  0xf9   :  { %v347_v42 = vadd.f32 %v346_v39, %v300_v38 }
 0x102   :  { %v387_v2 = vpop.f32.mrf.mxu0  ;;  %v434_v3 = vpop.f32.mrf.mxu1 }
 0x103   :  { %v388_v35 = vadd.f32 %v4680_v30, %v387_v2  ;;  %v435_v41 = vadd.f32 %v4680_v30, %v434_v3 }
 0x104   :  { %v4019_v4 = vpop.f32.mrf.mxu0  ;;  %v4031_v5 = vpop.f32.mrf.mxu1 }
 0x105   :  { %v393_v40 = vmax.f32 %v388_v35, 0.0  ;;  %v440_v45 = vmax.f32 %v435_v41, 0.0  ;;  %v910_v35 = vld [vmem:[%s5454_s3 + $0x2d0] sm:$0xff] }
 0x106   :  { %v390_v6 = vpop.f32.mrf.mxu0  ;;  %v437_v7 = vpop.f32.mrf.mxu1 }
 0x107   :  { %v394_v44 = vadd.f32 %v393_v40, %v347_v42 }
 0x108   :  { %v4020_v8 = vpop.f32.mrf.mxu0  ;;  %v4032_v9 = vpop.f32.mrf.mxu1 }
 0x109   :  { %v441_v50 = vadd.f32 %v440_v45, %v394_v44  ;;  %v894_v44 = vld [vmem:[%s5454_s3 + $0x250] sm:$0xff]  ;;  %v887_v45 = vld [vmem:[%s5454_s3 + $0x218] sm:$0xff] }
 0x112   :  { %v481_v10 = vpop.f32.mrf.mxu0  ;;  %v528_v11 = vpop.f32.mrf.mxu1 }
 0x113   :  { %v482_v43 = vadd.f32 %v4680_v30, %v481_v10  ;;  %v529_v47 = vadd.f32 %v4680_v30, %v528_v11 }
 0x114   :  { %v4043_v12 = vpop.f32.mrf.mxu0  ;;  %v4055_v13 = vpop.f32.mrf.mxu1 }
 0x115   :  { %v487_v46 = vmax.f32 %v482_v43, 0.0  ;;  %v534_v55 = vmax.f32 %v529_v47, 0.0  ;;  %v886_v43 = vld [vmem:[%s5454_s3 + $0x210] sm:$0xff]  ;;  %v871_v47 = vld [vmem:[%s5454_s3 + $0x198] sm:$0xff] }
 0x116   :  { %v484_v14 = vpop.f32.mrf.mxu0  ;;  %v531_v15 = vpop.f32.mrf.mxu1 }
 0x117   :  { %v488_v54 = vadd.f32 %v487_v46, %v441_v50  ;;  %v878_v46 = vld [vmem:[%s5454_s3 + $0x1d0] sm:$0xff]  ;;  %v3495_v50 = vcombine.high %v887_v45, %v895_v21 }
 0x118   :  { %v4044_v16 = vpop.f32.mrf.mxu0  ;;  %v4056_v17 = vpop.f32.mrf.mxu1 }
 0x119   :  { %v535_v62 = vadd.f32 %v534_v55, %v488_v54  ;;  %v862_v54 = vld [vmem:[%s5454_s3 + $0x150] sm:$0xff]  ;;  %v855_v55 = vld [vmem:[%s5454_s3 + $0x118] sm:$0xff] }
 0x122   :  { %v575_v19 = vpop.f32.mrf.mxu0  ;;  %v622_v20 = vpop.f32.mrf.mxu1 }
 0x123   :  { %v576_v51 = vadd.f32 %v4680_v30, %v575_v19  ;;  %v623_v59 = vadd.f32 %v4680_v30, %v622_v20 }
 0x124   :  { %v4067_v24 = vpop.f32.mrf.mxu0  ;;  %v4079_v28 = vpop.f32.mrf.mxu1 }
 0x125   :  { %v581_v58 = vmax.f32 %v576_v51, 0.0  ;;  %v628_v1 = vmax.f32 %v623_v59, 0.0  ;;  %v918_v24 = vld [vmem:[%s5454_s3 + $0x310] sm:$0xff]  ;;  %v3492_v51 = vcombine.low %v886_v43, %v894_v44 }
 0x126   :  { %v578_v33 = vpop.f32.mrf.mxu0  ;;  %v625_v34 = vpop.f32.mrf.mxu1  ;;  %v926_v28 = vld [vmem:[%s5454_s3 + $0x350] sm:$0xff] }
 0x127   :  { %v582_v0 = vadd.f32 %v581_v58, %v535_v62  ;;  %v902_v34 = vld [vmem:[%s5454_s3 + $0x290] sm:$0xff]  ;;  %v3525_v39 = vcombine.high %v918_v24, %v926_v28  ;;  %v3524_v41 = vcombine.low %v918_v24, %v926_v28  ;;  %v920_v24 = vld [vmem:[%s5454_s3 + $0x320] sm:$0xff] }
 0x128   :  { %v4068_v36 = vpop.f32.mrf.mxu0  ;;  %v4080_v37 = vpop.f32.mrf.mxu1  ;;  %v3509_v22 = vcombine.high %v902_v34, %v910_v35  ;;  %v3508_v25 = vcombine.low %v902_v34, %v910_v35  ;;  %v846_v62 = vld [vmem:[%s5454_s3 + $0xd0] sm:$0xff]  ;;  %v928_v28 = vld [vmem:[%s5454_s3 + $0x360] sm:$0xff] }
 0x129   :  { %v629_v4 = vadd.f32 %v628_v1, %v582_v0  ;;  %v903_v36 = vld [vmem:[%s5454_s3 + $0x298] sm:$0xff] }
 0x12a   :  { %v911_v37 = vld [vmem:[%s5454_s3 + $0x2d8] sm:$0xff] }
 0x12b   :  { %v3511_v23 = vcombine.high %v903_v36, %v911_v37  ;;  %v847_v0 = vld [vmem:[%s5454_s3 + $0xd8] sm:$0xff] }
 0x132   :  { %v669_v48 = vpop.f32.mrf.mxu0  ;;  %v716_v49 = vpop.f32.mrf.mxu1 }
 0x133   :  { %v670_v63 = vadd.f32 %v4680_v30, %v669_v48  ;;  %v717_v3 = vadd.f32 %v4680_v30, %v716_v49  ;;  %v879_v48 = vld [vmem:[%s5454_s3 + $0x1d8] sm:$0xff]  ;;  %v3493_v49 = vcombine.high %v886_v43, %v894_v44  ;;  %v3528_v43 = vcombine.low %v920_v24, %v928_v28 }
 0x134   :  { %v4091_v52 = vpop.f32.mrf.mxu0  ;;  %v4103_v53 = vpop.f32.mrf.mxu1  ;;  %v3479_v58 = vcombine.high %v871_v47, %v879_v48 }
 0x135   :  { %v675_v2 = vmax.f32 %v670_v63, 0.0  ;;  %v722_v6 = vmax.f32 %v717_v3, 0.0  ;;  %v3494_v52 = vcombine.low %v887_v45, %v895_v21  ;;  %v854_v53 = vld [vmem:[%s5454_s3 + $0x110] sm:$0xff]  ;;  %v839_v63 = vld [vmem:[%s5454_s3 + $0x98] sm:$0xff]  ;;  %v888_v45 = vld [vmem:[%s5454_s3 + $0x220] sm:$0xff] }
 0x136   :  { %v672_v56 = vpop.f32.mrf.mxu0  ;;  %v719_v57 = vpop.f32.mrf.mxu1  ;;  %v3461_v1 = vcombine.high %v854_v53, %v862_v54  ;;  %v3460_v3 = vcombine.low %v854_v53, %v862_v54  ;;  %v896_v21 = vld [vmem:[%s5454_s3 + $0x260] sm:$0xff] }
 0x137   :  { %v676_v5 = vadd.f32 %v675_v2, %v629_v4  ;;  %v863_v56 = vld [vmem:[%s5454_s3 + $0x158] sm:$0xff]  ;;  %v3496_v53 = vcombine.low %v888_v45, %v896_v21 }
 0x138   :  { %v4092_v60 = vpop.f32.mrf.mxu0  ;;  %v4104_v61 = vpop.f32.mrf.mxu1  ;;  %v3463_v2 = vcombine.high %v855_v55, %v863_v56  ;;  %v3462_v4 = vcombine.low %v855_v55, %v863_v56  ;;  %v856_v55 = vld [vmem:[%s5454_s3 + $0x120] sm:$0xff] }
 0x139   :  { %v723_v13 = vadd.f32 %v722_v6, %v676_v5  ;;  %v3478_v60 = vcombine.low %v871_v47, %v879_v48  ;;  %v838_v61 = vld [vmem:[%s5454_s3 + $0x90] sm:$0xff]  ;;  %v872_v47 = vld [vmem:[%s5454_s3 + $0x1a0] sm:$0xff] }
 0x13a   :  { %v822_v5 = vld [vmem:[%s5454_s3 + $0x10] sm:$0xff]  ;;  %v880_v48 = vld [vmem:[%s5454_s3 + $0x1e0] sm:$0xff] }
 0x13b   :  { %v830_v6 = vld [vmem:[%s5454_s3 + $0x50] sm:$0xff]  ;;  %v864_v56 = vld [vmem:[%s5454_s3 + $0x160] sm:$0xff] }
 0x142   :  { %v763_v7 = vpop.f32.mrf.mxu0  ;;  %v810_v8 = vpop.f32.mrf.mxu1 }
 0x143   :  { %v764_v9 = vadd.f32 %v4680_v30, %v763_v7  ;;  %v811_v10 = vadd.f32 %v4680_v30, %v810_v8  ;;  %v919_v30 = vld [vmem:[%s5454_s3 + $0x318] sm:$0xff] }
 0x144   :  { %v4115_v11 = vpop.f32.mrf.mxu0  ;;  %v4127_v12 = vpop.f32.mrf.mxu1  ;;  %v3527_v40 = vcombine.high %v919_v30, %v927_v32  ;;  %v3526_v42 = vcombine.low %v919_v30, %v927_v32  ;;  %v823_v7 = vld [vmem:[%s5454_s3 + $0x18] sm:$0xff]  ;;  %v921_v30 = vld [vmem:[%s5454_s3 + $0x328] sm:$0xff] }
 0x145   :  { %v769_v14 = vmax.f32 %v764_v9, 0.0  ;;  %v816_v15 = vmax.f32 %v811_v10, 0.0  ;;  %v831_v8 = vld [vmem:[%s5454_s3 + $0x58] sm:$0xff]  ;;  %v3445_v9 = vcombine.high %v838_v61, %v846_v62  ;;  %v3447_v10 = vcombine.high %v839_v63, %v847_v0 }
 0x146   :  { %v766_v16 = vpop.f32.mrf.mxu0  ;;  %v813_v17 = vpop.f32.mrf.mxu1  ;;  %v3444_v11 = vcombine.low %v838_v61, %v846_v62  ;;  %v3446_v12 = vcombine.low %v839_v63, %v847_v0  ;;  %v3480_v61 = vcombine.low %v872_v47, %v880_v48  ;;  %v840_v63 = vld [vmem:[%s5454_s3 + $0xa0] sm:$0xff] }
 0x147   :  { %v770_v18 = vadd.f32 %v769_v14, %v723_v13  ;;  %v936_v13 = vld [vmem:[%s5454_s3 + $0x3a0] sm:$0xff]  ;;  %v945_v16 = vld [vmem:[%s5454_s3 + $0x3e8] sm:$0xff]  ;;  %v3429_v17 = vcombine.high %v822_v5, %v830_v6 }
 0x148   :  { %v4116_v19 = vpop.f32.mrf.mxu0  ;;  %v4128_v20 = vpop.f32.mrf.mxu1  ;;  %v944_v14 = vld [vmem:[%s5454_s3 + $0x3e0] sm:$0xff] }
 0x149   :  { %v817_v31 = vadd.f32 %v816_v15, %v770_v18  ;;  %v937_v15 = vld [vmem:[%s5454_s3 + $0x3a8] sm:$0xff]  ;;  %v3431_v18 = vcombine.high %v823_v7, %v831_v8  ;;  %v3428_v19 = vcombine.low %v822_v5, %v830_v6  ;;  %v3430_v20 = vcombine.low %v823_v7, %v831_v8  ;;  %v848_v0 = vld [vmem:[%s5454_s3 + $0xe0] sm:$0xff] }
 0x14a   :  { %v3545_v32 = vcombine.high %v936_v13, %v944_v14  ;;  %v3544_v34 = vcombine.low %v936_v13, %v944_v14  ;;  %v3546_v35 = vcombine.low %v937_v15, %v945_v16  ;;  %v3464_v5 = vcombine.low %v856_v55, %v864_v56  ;;  %v824_v7 = vld [vmem:[%s5454_s3 + $0x20] sm:$0xff] }
 0x14b   :  { %v818_v33 = vmul.f32 0.0625, %v817_v31  ;;  %v929_v31 = vld [vmem:[%s5454_s3 + $0x368] sm:$0xff]  ;;  %v832_v8 = vld [vmem:[%s5454_s3 + $0x60] sm:$0xff]  ;;  %v3448_v13 = vcombine.low %v840_v63, %v848_v0 }
 0x14c   :  { %v3530_v44 = vcombine.low %v921_v30, %v929_v31 }
 0x14d   :  { %v4722_v38 = vpack.c.bf16 %v818_v33, %v818_v33  ;;  %v3547_v33 = vcombine.high %v937_v15, %v945_v16  ;;  %v938_v15 = vld [vmem:[%s5454_s3 + $0x3b0] sm:$0xff] }
 0x14e   :  { %v946_v16 = vld [vmem:[%s5454_s3 + $0x3f0] sm:$0xff] }
 0x14f   :  { %1705 = vmatmul.mubr.bf16.vlgmr.msra.gmra.mxu0 %v4722_v38  ;;  %1746 = vmatmul.mubr.bf16.vlgmr.msra.gmra.mxu1 %v4722_v38 }
 0x150   :  { %1755 = vmatpush1.bf16.msra.mxu0 %v3540_v26  ;;  %1796 = vmatpush1.bf16.msra.mxu1 %v3542_v27  ;;  %v3510_v26 = vcombine.low %v903_v36, %v911_v37  ;;  %v870_v27 = vld [vmem:[%s5454_s3 + $0x190] sm:$0xff]  ;;  %v904_v36 = vld [vmem:[%s5454_s3 + $0x2a0] sm:$0xff] }
 0x151   :  { %1756 = vmatprep.subr.bf16.mxu0 %v3525_v39  ;;  %1797 = vmatprep.subr.bf16.mxu1 %v3527_v40  ;;  %v3477_v57 = vcombine.high %v870_v27, %v878_v46  ;;  %v3476_v59 = vcombine.low %v870_v27, %v878_v46  ;;  %v912_v37 = vld [vmem:[%s5454_s3 + $0x2e0] sm:$0xff]  ;;  %v905_v39 = vld [vmem:[%s5454_s3 + $0x2a8] sm:$0xff] }
 0x152   :  { %1786 = vmatprep.mubr.bf16.mxu0 %v4266_v29  ;;  %1827 = vmatprep.mubr.bf16.mxu1 %v4266_v29  ;;  %v913_v40 = vld [vmem:[%s5454_s3 + $0x2e8] sm:$0xff]  ;;  %v3512_v27 = vcombine.low %v904_v36, %v912_v37 }
 0x153   :  { %v3514_v46 = vcombine.low %v905_v39, %v913_v40 }
 0x154   :  { %1757 = vmatpush1.bf16.msra.mxu0 %v3524_v41  ;;  %1798 = vmatpush1.bf16.msra.mxu1 %v3526_v42  ;;  %v3529_v41 = vcombine.high %v920_v24, %v928_v28  ;;  %v3531_v42 = vcombine.high %v921_v30, %v929_v31  ;;  %v3432_v24 = vcombine.low %v824_v7, %v832_v8  ;;  %v922_v30 = vld [vmem:[%s5454_s3 + $0x330] sm:$0xff] }
 0x155   :  { %1758 = vmatprep.subr.bf16.mxu0 %v3509_v22  ;;  %1799 = vmatprep.subr.bf16.mxu1 %v3511_v23  ;;  %v889_v22 = vld [vmem:[%s5454_s3 + $0x228] sm:$0xff]  ;;  %v930_v31 = vld [vmem:[%s5454_s3 + $0x370] sm:$0xff] }
 0x156   :  { %v897_v23 = vld [vmem:[%s5454_s3 + $0x268] sm:$0xff] }
 0x157   :  { %v3498_v54 = vcombine.low %v889_v22, %v897_v23 }
 0x158   :  { %1759 = vmatpush1.bf16.msra.mxu0 %v3508_v25  ;;  %1800 = vmatpush1.bf16.msra.mxu1 %v3510_v26  ;;  %v3513_v25 = vcombine.high %v904_v36, %v912_v37  ;;  %v3515_v26 = vcombine.high %v905_v39, %v913_v40  ;;  %v3548_v36 = vcombine.low %v938_v15, %v946_v16  ;;  %v906_v39 = vld [vmem:[%s5454_s3 + $0x2b0] sm:$0xff] }
 0x159   :  { %1760 = vmatprep.subr.bf16.mxu0 %v3493_v49  ;;  %1801 = vmatprep.subr.bf16.mxu1 %v3495_v50  ;;  %v873_v49 = vld [vmem:[%s5454_s3 + $0x1a8] sm:$0xff]  ;;  %v914_v40 = vld [vmem:[%s5454_s3 + $0x2f0] sm:$0xff] }
 0x15a   :  { %v881_v50 = vld [vmem:[%s5454_s3 + $0x1e8] sm:$0xff] }
 0x15b   :  { %v3482_v62 = vcombine.low %v873_v49, %v881_v50 }
 0x15c   :  { %1761 = vmatpush1.bf16.msra.mxu0 %v3492_v51  ;;  %1802 = vmatpush1.bf16.msra.mxu1 %v3494_v52  ;;  %v3497_v51 = vcombine.high %v888_v45, %v896_v21  ;;  %v3499_v52 = vcombine.high %v889_v22, %v897_v23  ;;  %v3532_v45 = vcombine.low %v922_v30, %v930_v31 }
 0x15d   :  { %1762 = vmatprep.subr.bf16.mxu0 %v3477_v57  ;;  %1803 = vmatprep.subr.bf16.mxu1 %v3479_v58  ;;  %v857_v57 = vld [vmem:[%s5454_s3 + $0x128] sm:$0xff]  ;;  %v3517_v22 = vcombine.high %v906_v39, %v914_v40 }
 0x15e   :  { %v865_v58 = vld [vmem:[%s5454_s3 + $0x168] sm:$0xff] }
 0x15f   :  { %v3466_v6 = vcombine.low %v857_v57, %v865_v58 }
 0x160   :  { %1763 = vmatpush1.bf16.msra.mxu0 %v3476_v59  ;;  %1804 = vmatpush1.bf16.msra.mxu1 %v3478_v60  ;;  %v3481_v59 = vcombine.high %v872_v47, %v880_v48  ;;  %v3483_v60 = vcombine.high %v873_v49, %v881_v50  ;;  %v3516_v47 = vcombine.low %v906_v39, %v914_v40  ;;  %v4148_v39 = vld [vmem:[%s5456_s5 + $0x60] sm:$0xff]  }
 0x161   :  { %1764 = vmatprep.subr.bf16.mxu0 %v3461_v1  ;;  %1805 = vmatprep.subr.bf16.mxu1 %v3463_v2  ;;  %v841_v1 = vld [vmem:[%s5454_s3 + $0xa8] sm:$0xff]  ;;  %v4149_v40 = vld [vmem:[%s5456_s5 + $0xe0] sm:$0xff]  }
 0x162   :  { %v849_v2 = vld [vmem:[%s5454_s3 + $0xe8] sm:$0xff] }
 0x163   :  { %v3450_v14 = vcombine.low %v841_v1, %v849_v2 }
 0x164   :  { %1765 = vmatpush1.bf16.msra.mxu0 %v3460_v3  ;;  %1806 = vmatpush1.bf16.msra.mxu1 %v3462_v4  ;;  %v3465_v3 = vcombine.high %v856_v55, %v864_v56  ;;  %v3467_v4 = vcombine.high %v857_v57, %v865_v58  ;;  %v858_v58 = vld [vmem:[%s5454_s3 + $0x130] sm:$0xff] }
 0x165   :  { %1766 = vmatprep.subr.bf16.mxu0 %v3445_v9  ;;  %1807 = vmatprep.subr.bf16.mxu1 %v3447_v10  ;;  %v825_v9 = vld [vmem:[%s5454_s3 + $0x28] sm:$0xff] }
 0x166   :  { %v833_v10 = vld [vmem:[%s5454_s3 + $0x68] sm:$0xff] }
 0x167   :  { %v3434_v28 = vcombine.low %v825_v9, %v833_v10 }
 0x168   :  { %1767 = vmatpush1.bf16.msra.mxu0 %v3444_v11  ;;  %1808 = vmatpush1.bf16.msra.mxu1 %v3446_v12  ;;  %v3449_v11 = vcombine.high %v840_v63, %v848_v0  ;;  %v3451_v12 = vcombine.high %v841_v1, %v849_v2  ;;  %v842_v2 = vld [vmem:[%s5454_s3 + $0xb0] sm:$0xff] }
 0x169   :  { %1768 = vmatprep.subr.bf16.mxu0 %v3429_v17  ;;  %1809 = vmatprep.subr.bf16.mxu1 %v3431_v18  ;;  %v939_v17 = vld [vmem:[%s5454_s3 + $0x3b8] sm:$0xff] }
 0x16a   :  { %v947_v18 = vld [vmem:[%s5454_s3 + $0x3f8] sm:$0xff] }
 0x16b   :  { %v3550_v37 = vcombine.low %v939_v17, %v947_v18 }
 0x16c   :  { %1769 = vmatpush1.bf16.msra.mxu0 %v3428_v19  ;;  %1810 = vmatpush1.bf16.msra.mxu1 %v3430_v20  ;;  %v3433_v19 = vcombine.high %v824_v7, %v832_v8  ;;  %v3435_v20 = vcombine.high %v825_v9, %v833_v10  ;;  %v826_v10 = vld [vmem:[%s5454_s3 + $0x30] sm:$0xff] }
 0x16d   :  { %1836 = vmatprep.subr.bf16.mxu0 %v3545_v32  ;;  %1877 = vmatprep.subr.bf16.mxu1 %v3547_v33  ;;  %v923_v32 = vld [vmem:[%s5454_s3 + $0x338] sm:$0xff] }
 0x16e   :  { %v931_v33 = vld [vmem:[%s5454_s3 + $0x378] sm:$0xff] }
 0x16f   :  { %1787 = vmatmul.mubr.bf16.vlgmr.msra.gmra.mxu0 %v4722_v38  ;;  %1828 = vmatmul.mubr.bf16.vlgmr.msra.gmra.mxu1 %v4722_v38  ;;  %v3534_v21 = vcombine.low %v923_v32, %v931_v33 }
 0x170   :  { %1837 = vmatpush1.bf16.msra.mxu0 %v3544_v34  ;;  %1878 = vmatpush1.bf16.msra.mxu1 %v3546_v35  ;;  %v3549_v34 = vcombine.high %v938_v15, %v946_v16  ;;  %v3551_v35 = vcombine.high %v939_v17, %v947_v18 }
 0x171   :  { %1838 = vmatprep.subr.bf16.mxu0 %v3529_v41  ;;  %1879 = vmatprep.subr.bf16.mxu1 %v3531_v42  ;;  %v907_v41 = vld [vmem:[%s5454_s3 + $0x2b8] sm:$0xff]  ;;  %v3533_v42 = vcombine.high %v922_v30, %v930_v31  ;;  %v4140_v31 = vld [vmem:[%s5456_s5 + $0x70] sm:$0xff]  }
 0x172   :  { %1868 = vmatprep.mubr.bf16.mxu0 %v4266_v29  ;;  %1909 = vmatprep.mubr.bf16.mxu1 %v4266_v29  ;;  %v4139_v30 = vld [vmem:[%s5456_s5 + $0xb8] sm:$0xff]  }
 0x174   :  { %1839 = vmatpush1.bf16.msra.mxu0 %v3528_v43  ;;  %1880 = vmatpush1.bf16.msra.mxu1 %v3530_v44  ;;  %v3535_v43 = vcombine.high %v923_v32, %v931_v33  ;;  %v915_v44 = vld [vmem:[%s5454_s3 + $0x2f8] sm:$0xff]  ;;  %v4141_v32 = vld [vmem:[%s5456_s5 + $0xf0] sm:$0xff]  }
 0x175   :  { %1840 = vmatprep.subr.bf16.mxu0 %v3513_v25  ;;  %1881 = vmatprep.subr.bf16.mxu1 %v3515_v26  ;;  %v3519_v23 = vcombine.high %v907_v41, %v915_v44  ;;  %v890_v25 = vld [vmem:[%s5454_s3 + $0x230] sm:$0xff]  ;;  %v3518_v48 = vcombine.low %v907_v41, %v915_v44  ;;  %v4150_v41 = vld [vmem:[%s5456_s5 + $0x20] sm:$0xff]   ;;  %v4153_v44 = vld [vmem:[%s5456_s5 + $0xd8] sm:$0xff]  }
 0x176   :  { %v898_v26 = vld [vmem:[%s5454_s3 + $0x270] sm:$0xff] }
 0x177   :  { %v3501_v49 = vcombine.high %v890_v25, %v898_v26  ;;  %v4142_v33 = vld [vmem:[%s5456_s5 + $0x30] sm:$0xff]  }
 0x178   :  { %1841 = vmatpush1.bf16.msra.mxu0 %v3512_v27  ;;  %1882 = vmatpush1.bf16.msra.mxu1 %v3514_v46  ;;  %v891_v27 = vld [vmem:[%s5454_s3 + $0x238] sm:$0xff] }
 0x179   :  { %1842 = vmatprep.subr.bf16.mxu0 %v3497_v51  ;;  %1883 = vmatprep.subr.bf16.mxu1 %v3499_v52  ;;  %v899_v46 = vld [vmem:[%s5454_s3 + $0x278] sm:$0xff]  ;;  %v874_v51 = vld [vmem:[%s5454_s3 + $0x1b0] sm:$0xff] }
 0x17a   :  { %v3503_v50 = vcombine.high %v891_v27, %v899_v46  ;;  %v882_v52 = vld [vmem:[%s5454_s3 + $0x1f0] sm:$0xff]  ;;  %v3502_v55 = vcombine.low %v891_v27, %v899_v46  ;;  %v4160_v27 = vld [vmem:[%s5456_s5 + $0x48] sm:$0xff]  }
 0x17b   :  { %v3485_v56 = vcombine.high %v874_v51, %v882_v52  ;;  %v4161_v46 = vld [vmem:[%s5456_s5 + $0xc8] sm:$0xff]  }
 0x17c   :  { %1843 = vmatpush1.bf16.msra.mxu0 %v3496_v53  ;;  %1884 = vmatpush1.bf16.msra.mxu1 %v3498_v54  ;;  %v883_v53 = vld [vmem:[%s5454_s3 + $0x1f8] sm:$0xff]  ;;  %v3500_v54 = vcombine.low %v890_v25, %v898_v26  ;;  %v4158_v25 = vld [vmem:[%s5456_s5 + $0x10] sm:$0xff]  }
 0x17d   :  { %1844 = vmatprep.subr.bf16.mxu0 %v3481_v59  ;;  %1885 = vmatprep.subr.bf16.mxu1 %v3483_v60  ;;  %v866_v59 = vld [vmem:[%s5454_s3 + $0x170] sm:$0xff]  ;;  %v859_v60 = vld [vmem:[%s5454_s3 + $0x138] sm:$0xff] }
 0x17e   :  { %v3469_v0 = vcombine.high %v858_v58, %v866_v59  ;;  %v4159_v26 = vld [vmem:[%s5456_s5 + $0x90] sm:$0xff]  }
 0x180   :  { %1845 = vmatpush1.bf16.msra.mxu0 %v3480_v61  ;;  %1886 = vmatpush1.bf16.msra.mxu1 %v3482_v62  ;;  %v867_v61 = vld [vmem:[%s5454_s3 + $0x178] sm:$0xff]  ;;  %v3484_v62 = vcombine.low %v874_v51, %v882_v52  ;;  %v4165_v51 = vld [vmem:[%s5456_s5 + $0xc0] sm:$0xff]  }
 0x181   :  { %1846 = vmatprep.subr.bf16.mxu0 %v3465_v3  ;;  %1887 = vmatprep.subr.bf16.mxu1 %v3467_v4  ;;  %v3471_v1 = vcombine.high %v859_v60, %v867_v61  ;;  %v850_v3 = vld [vmem:[%s5454_s3 + $0xf0] sm:$0xff]  ;;  %v843_v4 = vld [vmem:[%s5454_s3 + $0xb8] sm:$0xff]  ;;  %v3470_v7 = vcombine.low %v859_v60, %v867_v61 }
 0x182   :  { %v3453_v8 = vcombine.high %v842_v2, %v850_v3 }
 0x184   :  { %1847 = vmatpush1.bf16.msra.mxu0 %v3464_v5  ;;  %1888 = vmatpush1.bf16.msra.mxu1 %v3466_v6  ;;  %v851_v5 = vld [vmem:[%s5454_s3 + $0xf8] sm:$0xff]  ;;  %v3468_v6 = vcombine.low %v858_v58, %v866_v59  ;;  %v949_v58 = vld [vmem:[%s5457_s4 + $0x8] sm:$0xff] }
 0x185   :  { %1848 = vmatprep.subr.bf16.mxu0 %v3449_v11  ;;  %1889 = vmatprep.subr.bf16.mxu1 %v3451_v12  ;;  %v3455_v9 = vcombine.high %v843_v4, %v851_v5  ;;  %v834_v11 = vld [vmem:[%s5454_s3 + $0x70] sm:$0xff]  ;;  %v827_v12 = vld [vmem:[%s5454_s3 + $0x38] sm:$0xff]  ;;  %v3454_v15 = vcombine.low %v843_v4, %v851_v5 }
 0x186   :  { %v3437_v16 = vcombine.high %v826_v10, %v834_v11  ;;  %v3436_v18 = vcombine.low %v826_v10, %v834_v11 }
 0x188   :  { %1849 = vmatpush1.bf16.msra.mxu0 %v3448_v13  ;;  %1890 = vmatpush1.bf16.msra.mxu1 %v3450_v14  ;;  %v835_v13 = vld [vmem:[%s5454_s3 + $0x78] sm:$0xff]  ;;  %v3452_v14 = vcombine.low %v842_v2, %v850_v3 }
 0x189   :  { %1850 = vmatprep.subr.bf16.mxu0 %v3433_v19  ;;  %1891 = vmatprep.subr.bf16.mxu1 %v3435_v20  ;;  %v3439_v17 = vcombine.high %v827_v12, %v835_v13  ;;  %v3438_v19 = vcombine.low %v827_v12, %v835_v13  ;;  %v4136_v20 = vld [vmem:[%s5456_s5 + $0x78] sm:$0xff]  }
 0x18c   :  { %1851 = vmatpush1.bf16.msra.mxu0 %v3432_v24  ;;  %1892 = vmatpush1.bf16.msra.mxu1 %v3434_v28  ;;  %v4137_v24 = vld [vmem:[%s5456_s5 + $0xf8] sm:$0xff]  }
 0x18d   :  { %1918 = vmatprep.subr.bf16.mxu0 %v3549_v34  ;;  %1959 = vmatprep.subr.bf16.mxu1 %v3551_v35  ;;  %v4138_v28 = vld [vmem:[%s5456_s5 + $0x38] sm:$0xff]   ;;  %v4143_v34 = vld [vmem:[%s5456_s5 + $0xb0] sm:$0xff]   ;;  %v4144_v35 = vld [vmem:[%s5456_s5 + $0x68] sm:$0xff]  }
 0x18f   :  { %1869 = vmatmul.mubr.bf16.vlgmr.msra.gmra.mxu0 %v4722_v38  ;;  %1910 = vmatmul.mubr.bf16.vlgmr.msra.gmra.mxu1 %v4722_v38 }
 0x190   :  { %1919 = vmatpush1.bf16.msra.mxu0 %v3548_v36  ;;  %1960 = vmatpush1.bf16.msra.mxu1 %v3550_v37  ;;  %v4146_v36 = vld [vmem:[%s5456_s5 + $0x28] sm:$0xff]  }
 0x191   :  { %1920 = vmatprep.subr.bf16.mxu0 %v3533_v42  ;;  %1961 = vmatprep.subr.bf16.mxu1 %v3535_v43  ;;  %v4147_v37 = vld [vmem:[%s5456_s5 + $0xa8] sm:$0xff]   ;;  %v4151_v42 = vld [vmem:[%s5456_s5 + $0xa0] sm:$0xff]   ;;  %v4152_v43 = vld [vmem:[%s5456_s5 + $0x58] sm:$0xff]  }
 0x192   :  { %1950 = vmatprep.mubr.bf16.mxu0 %v4266_v29  ;;  %1991 = vmatprep.mubr.bf16.mxu1 %v4266_v29  ;;  %v875_v29 = vld [vmem:[%s5454_s3 + $0x1b8] sm:$0xff] }
 0x193   :  { %v3487_v57 = vcombine.high %v875_v29, %v883_v53  ;;  %v3486_v63 = vcombine.low %v875_v29, %v883_v53  ;;  %v4166_v29 = vld [vmem:[%s5456_s5] sm:$0xff]  }
 0x194   :  { %1921 = vmatpush1.bf16.msra.mxu0 %v3532_v45  ;;  %1962 = vmatpush1.bf16.msra.mxu1 %v3534_v21  ;;  %v4154_v45 = vld [vmem:[%s5456_s5 + $0x18] sm:$0xff]   ;;  %v4167_v53 = vld [vmem:[%s5456_s5 + $0x80] sm:$0xff]  }
 0x195   :  { %1922 = vmatprep.subr.bf16.mxu0 %v3517_v22  ;;  %1963 = vmatprep.subr.bf16.mxu1 %v3519_v23  ;;  %v4155_v21 = vld [vmem:[%s5456_s5 + $0x98] sm:$0xff]   ;;  %v4156_v22 = vld [vmem:[%s5456_s5 + $0x50] sm:$0xff]  }
 0x196   :  { %v4157_v23 = vld [vmem:[%s5456_s5 + $0xd0] sm:$0xff]  }
 0x198   :  { %1923 = vmatpush1.bf16.msra.mxu0 %v3516_v47  ;;  %1964 = vmatpush1.bf16.msra.mxu1 %v3518_v48  ;;  %v952_v47 = vlaneseq  ;;  %v4162_v48 = vld [vmem:[%s5456_s5 + $0x8] sm:$0xff]  }
 0x199   :  { %1924 = vmatprep.subr.bf16.mxu0 %v3501_v49  ;;  %1965 = vmatprep.subr.bf16.mxu1 %v3503_v50  ;;  %v4163_v49 = vld [vmem:[%s5456_s5 + $0x88] sm:$0xff]   ;;  %v4164_v50 = vld [vmem:[%s5456_s5 + $0x40] sm:$0xff]  }
 0x19a   :  { %v5086_v52 = vshrl.u32 %v952_v47, 7  ;;  %v4182_v47 = vld [vmem:[%s5456_s5 + $0x120] sm:$0xff]  }
 0x19c   :  { %1925 = vmatpush1.bf16.msra.mxu0 %v3500_v54  ;;  %1966 = vmatpush1.bf16.msra.mxu1 %v3502_v55  ;;  %v4168_v54 = vld [vmem:[%s5456_s5 + $0x178] sm:$0xff]   ;;  %v958_v59 = vsub.s32 1, %v5086_v52  ;;  %v966_v60 = vsub.s32 3, %v5086_v52  ;;  %v978_v2 = vsub.s32 6, %v5086_v52  ;;  %v974_v3 = vsub.s32 5, %v5086_v52 }
 0x19d   :  { %1926 = vmatprep.subr.bf16.mxu0 %v3485_v56  ;;  %1967 = vmatprep.subr.bf16.mxu1 %v3487_v57  ;;  %v4169_v55 = vld [vmem:[%s5456_s5 + $0x1f8] sm:$0xff]   ;;  %v954_v56 = vsub.s32 0, %v5086_v52  ;;  %v962_v57 = vsub.s32 2, %v5086_v52  ;;  %v982_v4 = vsub.s32 7, %v5086_v52 }
 0x19f   :  { %v5107_v61 = vrot.slane %v949_v58, %v954_v56 }
 0x1a0   :  { %1927 = vmatpush1.bf16.msra.mxu0 %v3484_v62  ;;  %1968 = vmatpush1.bf16.msra.mxu1 %v3486_v63  ;;  %v5109_v62 = vrot.slane %v949_v58, %v962_v57  ;;  %v5111_v63 = vrot.slane %v949_v58, %v958_v59 }
 0x1a1   :  { %1928 = vmatprep.subr.bf16.mxu0 %v3469_v0  ;;  %1969 = vmatprep.subr.bf16.mxu1 %v3471_v1  ;;  %v5113_v0 = vrot.slane %v949_v58, %v966_v60  ;;  %v970_v1 = vsub.s32 4, %v5086_v52  ;;  %v4197_v52 = vld [vmem:[%s5456_s5 + $0x1c0] sm:$0xff]  }
 0x1a3   :  { %v5121_v5 = vrot.slane %v949_v58, %v970_v1 }
 0x1a4   :  { %1929 = vmatpush1.bf16.msra.mxu0 %v3468_v6  ;;  %1970 = vmatpush1.bf16.msra.mxu1 %v3470_v7  ;;  %v5125_v6 = vrot.slane %v949_v58, %v978_v2  ;;  %v5129_v7 = vrot.slane %v949_v58, %v974_v3 }
 0x1a5   :  { %1930 = vmatprep.subr.bf16.mxu0 %v3453_v8  ;;  %1971 = vmatprep.subr.bf16.mxu1 %v3455_v9  ;;  %v5133_v8 = vrot.slane %v949_v58, %v982_v4  ;;  %v5138_v9 = vld [vmem:[%s5457_s4] sm:$0xff]  ;;  %v4193_v58 = vld [vmem:[%s5456_s5 + $0x1c8] sm:$0xff]  }
 0x1a6   :  { %v955_v10 = vrot.slane %v5138_v9, %v954_v56  ;;  %v963_v11 = vrot.slane %v5138_v9, %v962_v57  ;;  %v959_v12 = vrot.slane %v5138_v9, %v958_v59  ;;  %v967_v13 = vrot.slane %v5138_v9, %v966_v60  ;;  %v4191_v56 = vld [vmem:[%s5456_s5 + $0x190] sm:$0xff]   ;;  %v4192_v57 = vld [vmem:[%s5456_s5 + $0x148] sm:$0xff]  }
 0x1a7   :  { %v971_v59 = vrot.slane %v5138_v9, %v970_v1  ;;  %v979_v60 = vrot.slane %v5138_v9, %v978_v2  ;;  %v4195_v1 = vld [vmem:[%s5456_s5 + $0x188] sm:$0xff]  }
 0x1a8   :  { %1931 = vmatpush1.bf16.msra.mxu0 %v3452_v14  ;;  %1972 = vmatpush1.bf16.msra.mxu1 %v3454_v15 }
 0x1a9   :  { %1932 = vmatprep.subr.bf16.mxu0 %v3437_v16  ;;  %1973 = vmatprep.subr.bf16.mxu1 %v3439_v17 }
 0x1ac   :  { %1933 = vmatpush1.bf16.msra.mxu0 %v3436_v18  ;;  %1974 = vmatpush1.bf16.msra.mxu1 %v3438_v19 }
 0x1ad   :  { %3761 = vmatprep.subr.bf16.mxu0 %v4136_v20  ;;  %3783 = vmatprep.subr.bf16.mxu1 %v4137_v24 }
 0x1af   :  { %1951 = vmatmul.mubr.bf16.vlgmr.msra.gmra.mxu0 %v4722_v38  ;;  %1992 = vmatmul.mubr.bf16.vlgmr.msra.gmra.mxu1 %v4722_v38  ;;  %v4145_v38 = vld [vmem:[%s5456_s5 + $0xe8] sm:$0xff]  }
 0x1b0   :  { %3762 = vmatpush3.bf16.msra.mxu0 %v4138_v28  ;;  %3784 = vmatpush3.bf16.msra.mxu1 %v4139_v30 }
 0x1b1   :  { %3763 = vmatprep.subr.bf16.mxu0 %v4140_v31  ;;  %3785 = vmatprep.subr.bf16.mxu1 %v4141_v32 }
 0x1b4   :  { %3764 = vmatpush3.bf16.msra.mxu0 %v4142_v33  ;;  %3786 = vmatpush3.bf16.msra.mxu1 %v4143_v34 }
 0x1b5   :  { %3765 = vmatprep.subr.bf16.mxu0 %v4144_v35  ;;  %3787 = vmatprep.subr.bf16.mxu1 %v4145_v38 }
 0x1b8   :  { %3766 = vmatpush3.bf16.msra.mxu0 %v4146_v36  ;;  %3788 = vmatpush3.bf16.msra.mxu1 %v4147_v37 }
 0x1b9   :  { %3767 = vmatprep.subr.bf16.mxu0 %v4148_v39  ;;  %3789 = vmatprep.subr.bf16.mxu1 %v4149_v40  ;;  %v4170_v39 = vld [vmem:[%s5456_s5 + $0x138] sm:$0xff]  }
 0x1ba   :  { %v4171_v40 = vld [vmem:[%s5456_s5 + $0x1b8] sm:$0xff]  }
 0x1bc   :  { %3768 = vmatpush3.bf16.msra.mxu0 %v4150_v41  ;;  %3790 = vmatpush3.bf16.msra.mxu1 %v4151_v42 }
 0x1bd   :  { %3769 = vmatprep.subr.bf16.mxu0 %v4152_v43  ;;  %3791 = vmatprep.subr.bf16.mxu1 %v4153_v44  ;;  %v4172_v43 = vld [vmem:[%s5456_s5 + $0x170] sm:$0xff]  }
 0x1be   :  { %v4173_v44 = vld [vmem:[%s5456_s5 + $0x1f0] sm:$0xff]  }
 0x1c0   :  { %3770 = vmatpush3.bf16.msra.mxu0 %v4154_v45  ;;  %3792 = vmatpush3.bf16.msra.mxu1 %v4155_v21  ;;  %v4174_v45 = vld [vmem:[%s5456_s5 + $0x130] sm:$0xff]  }
 0x1c1   :  { %3771 = vmatprep.subr.bf16.mxu0 %v4156_v22  ;;  %3793 = vmatprep.subr.bf16.mxu1 %v4157_v23  ;;  %v4175_v21 = vld [vmem:[%s5456_s5 + $0x1b0] sm:$0xff]   ;;  %v4176_v22 = vld [vmem:[%s5456_s5 + $0x168] sm:$0xff]  }
 0x1c2   :  { %v4177_v23 = vld [vmem:[%s5456_s5 + $0x1e8] sm:$0xff]  }
 0x1c4   :  { %3772 = vmatpush3.bf16.msra.mxu0 %v4158_v25  ;;  %3794 = vmatpush3.bf16.msra.mxu1 %v4159_v26  ;;  %v4178_v25 = vld [vmem:[%s5456_s5 + $0x128] sm:$0xff]  }
 0x1c5   :  { %3773 = vmatprep.subr.bf16.mxu0 %v4160_v27  ;;  %3795 = vmatprep.subr.bf16.mxu1 %v4161_v46  ;;  %v4179_v26 = vld [vmem:[%s5456_s5 + $0x1a8] sm:$0xff]   ;;  %v4180_v27 = vld [vmem:[%s5456_s5 + $0x160] sm:$0xff]  }
 0x1c6   :  { %v4181_v46 = vld [vmem:[%s5456_s5 + $0x1e0] sm:$0xff]  }
 0x1c8   :  { %3774 = vmatpush3.bf16.msra.mxu0 %v4162_v48  ;;  %3796 = vmatpush3.bf16.msra.mxu1 %v4163_v49  ;;  %v4183_v48 = vld [vmem:[%s5456_s5 + $0x1a0] sm:$0xff]   ;;  %v4184_v49 = vld [vmem:[%s5456_s5 + $0x158] sm:$0xff]  }
 0x1c9   :  { %3775 = vmatprep.subr.bf16.mxu0 %v4164_v50  ;;  %3797 = vmatprep.subr.bf16.mxu1 %v4165_v51  ;;  %v4185_v50 = vld [vmem:[%s5456_s5 + $0x1d8] sm:$0xff]  }
 0x1ca   :  { %v4186_v51 = vld [vmem:[%s5456_s5 + $0x118] sm:$0xff]  }
 0x1cc   :  { %3776 = vmatpush3.bf16.msra.mxu0 %v4166_v29  ;;  %3798 = vmatpush3.bf16.msra.mxu1 %v4167_v53  ;;  %v4187_v29 = vld [vmem:[%s5456_s5 + $0x198] sm:$0xff]   ;;  %v4188_v53 = vld [vmem:[%s5456_s5 + $0x150] sm:$0xff]  }
 0x1cd   :  { %3805 = vmatprep.subr.bf16.mxu0 %v4168_v54  ;;  %3827 = vmatprep.subr.bf16.mxu1 %v4169_v55  ;;  %v4189_v54 = vld [vmem:[%s5456_s5 + $0x1d0] sm:$0xff]  }
 0x1ce   :  { %v4190_v55 = vld [vmem:[%s5456_s5 + $0x110] sm:$0xff]  }
 0x20f   :  { %v1706_v14 = vpop.f32.mrf.mxu0  ;;  %v1747_v15 = vpop.f32.mrf.mxu1 }
 0x210   :  { %v1707_v16 = vadd.f32 %v1706_v14, %v955_v10  ;;  %v1748_v17 = vadd.f32 %v1747_v15, %v963_v11  ;;  %v975_v10 = vrot.slane %v5138_v9, %v974_v3  ;;  %v983_v11 = vrot.slane %v5138_v9, %v982_v4  ;;  %v4196_v3 = vld [vmem:[%s5456_s5 + $0x140] sm:$0xff]  }
 0x211   :  { %v1708_v18 = vpop.f32.mrf.mxu0  ;;  %v1749_v19 = vpop.f32.mrf.mxu1 }
 0x212   :  { %v1709_v20 = vadd.f32 %v1708_v18, %v959_v12  ;;  %v1750_v24 = vadd.f32 %v1749_v19, %v967_v13  ;;  %v2000_v28 = vmax.f32 %v1707_v16, 0.0  ;;  %v2002_v30 = vmax.f32 %v1748_v17, 0.0  ;;  %v4194_v12 = vld [vmem:[%s5456_s5 + $0x108] sm:$0xff]   ;;  %v4198_v18 = vld [vmem:[%s5456_s5 + $0x100] sm:$0xff]  }
 0x213   :  { %v1710_v31 = vpop.f32.mrf.mxu0  ;;  %v1751_v32 = vpop.f32.mrf.mxu1  ;;  %v4199_v19 = vld [vmem:[%s5456_s5 + $0x180] sm:$0xff]  }
 0x214   :  { %v2001_v33 = vmax.f32 %v1709_v20, 0.0  ;;  %v2003_v34 = vmax.f32 %v1750_v24, 0.0  ;;  %v2016_v41 = vpack.c.bf16 %v2000_v28, %v2000_v28  ;;  %v2018_v42 = vpack.c.bf16 %v2002_v30, %v2002_v30  ;;  %v4200_v31 = vld [vmem:[%s5456_s5 + $0x278] sm:$0xff]  }
 0x215   :  { %v1711_v35 = vpop.f32.mrf.mxu0  ;;  %v1752_v38 = vpop.f32.mrf.mxu1  ;;  %v4201_v32 = vld [vmem:[%s5456_s5 + $0x2f8] sm:$0xff]  }
 0x216   :  { %v2017_v36 = vpack.c.bf16 %v2001_v33, %v2001_v33  ;;  %v2019_v37 = vpack.c.bf16 %v2003_v34, %v2003_v34 }
 0x218   :  { %3095 = vmatprep.mubr.bf16.mxu0 %v2017_v36  ;;  %3135 = vmatprep.mubr.bf16.mxu1 %v2019_v37 }
 0x219   :  { %3096 = vmatmul.mubr.bf16.vlgmr.msra.gmra.mxu0 %v2016_v41  ;;  %3136 = vmatmul.mubr.bf16.vlgmr.msra.gmra.mxu1 %v2018_v42 }
 0x21a   :  { %3806 = vmatpush3.bf16.msra.mxu0 %v4170_v39  ;;  %3828 = vmatpush3.bf16.msra.mxu1 %v4171_v40  ;;  %v4202_v39 = vld [vmem:[%s5456_s5 + $0x238] sm:$0xff]  }
 0x21b   :  { %3807 = vmatprep.subr.bf16.mxu0 %v4172_v43  ;;  %3829 = vmatprep.subr.bf16.mxu1 %v4173_v44  ;;  %v4203_v40 = vld [vmem:[%s5456_s5 + $0x2b8] sm:$0xff]   ;;  %v4204_v43 = vld [vmem:[%s5456_s5 + $0x270] sm:$0xff]  }
 0x21c   :  { %v4205_v44 = vld [vmem:[%s5456_s5 + $0x2f0] sm:$0xff]  }
 0x21e   :  { %3808 = vmatpush3.bf16.msra.mxu0 %v4174_v45  ;;  %3830 = vmatpush3.bf16.msra.mxu1 %v4175_v21  ;;  %v4206_v45 = vld [vmem:[%s5456_s5 + $0x230] sm:$0xff]  }
 0x21f   :  { %3809 = vmatprep.subr.bf16.mxu0 %v4176_v22  ;;  %3831 = vmatprep.subr.bf16.mxu1 %v4177_v23  ;;  %v4207_v21 = vld [vmem:[%s5456_s5 + $0x2b0] sm:$0xff]   ;;  %v4208_v22 = vld [vmem:[%s5456_s5 + $0x268] sm:$0xff]  }
 0x220   :  { %v4209_v23 = vld [vmem:[%s5456_s5 + $0x2e8] sm:$0xff]  }
 0x222   :  { %3810 = vmatpush3.bf16.msra.mxu0 %v4178_v25  ;;  %3832 = vmatpush3.bf16.msra.mxu1 %v4179_v26  ;;  %v4210_v25 = vld [vmem:[%s5456_s5 + $0x228] sm:$0xff]  }
 0x223   :  { %3811 = vmatprep.subr.bf16.mxu0 %v4180_v27  ;;  %3833 = vmatprep.subr.bf16.mxu1 %v4181_v46  ;;  %v4211_v26 = vld [vmem:[%s5456_s5 + $0x2a8] sm:$0xff]   ;;  %v4212_v27 = vld [vmem:[%s5456_s5 + $0x260] sm:$0xff]  }
 0x224   :  { %v4213_v46 = vld [vmem:[%s5456_s5 + $0x2e0] sm:$0xff]  }
 0x226   :  { %3812 = vmatpush3.bf16.msra.mxu0 %v4182_v47  ;;  %3834 = vmatpush3.bf16.msra.mxu1 %v4183_v48  ;;  %v4214_v47 = vld [vmem:[%s5456_s5 + $0x220] sm:$0xff]  }
 0x227   :  { %3813 = vmatprep.subr.bf16.mxu0 %v4184_v49  ;;  %3835 = vmatprep.subr.bf16.mxu1 %v4185_v50  ;;  %v4215_v48 = vld [vmem:[%s5456_s5 + $0x2a0] sm:$0xff]   ;;  %v4216_v49 = vld [vmem:[%s5456_s5 + $0x258] sm:$0xff]  }
 0x228   :  { %v4217_v50 = vld [vmem:[%s5456_s5 + $0x2d8] sm:$0xff]  }
 0x22a   :  { %3814 = vmatpush3.bf16.msra.mxu0 %v4186_v51  ;;  %3836 = vmatpush3.bf16.msra.mxu1 %v4187_v29  ;;  %v4218_v51 = vld [vmem:[%s5456_s5 + $0x218] sm:$0xff]  }
 0x22b   :  { %3815 = vmatprep.subr.bf16.mxu0 %v4188_v53  ;;  %3837 = vmatprep.subr.bf16.mxu1 %v4189_v54  ;;  %v4219_v29 = vld [vmem:[%s5456_s5 + $0x298] sm:$0xff]   ;;  %v4220_v53 = vld [vmem:[%s5456_s5 + $0x250] sm:$0xff]  }
 0x22c   :  { %v4221_v54 = vld [vmem:[%s5456_s5 + $0x2d0] sm:$0xff]  }
 0x22e   :  { %3816 = vmatpush3.bf16.msra.mxu0 %v4190_v55  ;;  %3838 = vmatpush3.bf16.msra.mxu1 %v4191_v56  ;;  %v4222_v55 = vld [vmem:[%s5456_s5 + $0x210] sm:$0xff]  }
 0x22f   :  { %v1788_v13 = vpop.f32.mrf.mxu0  ;;  %v1829_v2 = vpop.f32.mrf.mxu1  ;;  %3817 = vmatprep.subr.bf16.mxu0 %v4192_v57  ;;  %3839 = vmatprep.subr.bf16.mxu1 %v4193_v58  ;;  %v4223_v56 = vld [vmem:[%s5456_s5 + $0x290] sm:$0xff]   ;;  %v4224_v57 = vld [vmem:[%s5456_s5 + $0x248] sm:$0xff]  }
 0x230   :  { %v1789_v4 = vadd.f32 %v1788_v13, %v971_v59  ;;  %v1830_v9 = vadd.f32 %v1829_v2, %v979_v60  ;;  %v4225_v58 = vld [vmem:[%s5456_s5 + $0x2c8] sm:$0xff]  }
 0x231   :  { %v1790_v14 = vpop.f32.mrf.mxu0  ;;  %v1831_v15 = vpop.f32.mrf.mxu1  ;;  %v4226_v59 = vld [vmem:[%s5456_s5 + $0x208] sm:$0xff]  }
 0x232   :  { %v1791_v16 = vadd.f32 %v1790_v14, %v975_v10  ;;  %v1832_v17 = vadd.f32 %v1831_v15, %v983_v11  ;;  %3818 = vmatpush3.bf16.msra.mxu0 %v4194_v12  ;;  %3840 = vmatpush3.bf16.msra.mxu1 %v4195_v1  ;;  %v2004_v20 = vmax.f32 %v1789_v4, 0.0  ;;  %v2006_v24 = vmax.f32 %v1830_v9, 0.0  ;;  %v4227_v60 = vld [vmem:[%s5456_s5 + $0x288] sm:$0xff]   ;;  %v4228_v12 = vld [vmem:[%s5456_s5 + $0x240] sm:$0xff]  }
 0x233   :  { %v1792_v28 = vpop.f32.mrf.mxu0  ;;  %v1833_v30 = vpop.f32.mrf.mxu1  ;;  %3819 = vmatprep.subr.bf16.mxu0 %v4196_v3  ;;  %3841 = vmatprep.subr.bf16.mxu1 %v4197_v52  ;;  %v4229_v1 = vld [vmem:[%s5456_s5 + $0x2c0] sm:$0xff]  }
 0x234   :  { %v2005_v33 = vmax.f32 %v1791_v16, 0.0  ;;  %v2007_v34 = vmax.f32 %v1832_v17, 0.0  ;;  %v2020_v41 = vpack.c.bf16 %v2004_v20, %v2004_v20  ;;  %v2022_v42 = vpack.c.bf16 %v2006_v24, %v2006_v24  ;;  %v4230_v14 = vld [vmem:[%s5456_s5 + $0x200] sm:$0xff]  }
 0x235   :  { %v1793_v35 = vpop.f32.mrf.mxu0  ;;  %v1834_v38 = vpop.f32.mrf.mxu1  ;;  %v4231_v15 = vld [vmem:[%s5456_s5 + $0x280] sm:$0xff]  }
 0x236   :  { %v2021_v36 = vpack.c.bf16 %v2005_v33, %v2005_v33  ;;  %v2023_v37 = vpack.c.bf16 %v2007_v34, %v2007_v34  ;;  %3820 = vmatpush3.bf16.msra.mxu0 %v4198_v18  ;;  %3842 = vmatpush3.bf16.msra.mxu1 %v4199_v19  ;;  %v4236_v35 = vld [vmem:[%s5456_s5 + $0x370] sm:$0xff]  }
 0x237   :  { %3849 = vmatprep.subr.bf16.mxu0 %v4200_v31  ;;  %3871 = vmatprep.subr.bf16.mxu1 %v4201_v32  ;;  %v4234_v31 = vld [vmem:[%s5456_s5 + $0x338] sm:$0xff]   ;;  %v4237_v38 = vld [vmem:[%s5456_s5 + $0x3f0] sm:$0xff]  }
 0x238   :  { %3175 = vmatprep.mubr.bf16.mxu0 %v2021_v36  ;;  %3215 = vmatprep.mubr.bf16.mxu1 %v2023_v37  ;;  %v4235_v32 = vld [vmem:[%s5456_s5 + $0x3b8] sm:$0xff]   ;;  %v4238_v36 = vld [vmem:[%s5456_s5 + $0x330] sm:$0xff]  }
 0x239   :  { %3176 = vmatmul.mubr.bf16.vlgmr.msra.gmra.mxu0 %v2020_v41  ;;  %3216 = vmatmul.mubr.bf16.vlgmr.msra.gmra.mxu1 %v2022_v42  ;;  %v4239_v37 = vld [vmem:[%s5456_s5 + $0x3b0] sm:$0xff]   ;;  %v4242_v41 = vld [vmem:[%s5456_s5 + $0x328] sm:$0xff]  }
 0x23a   :  { %3850 = vmatpush3.bf16.msra.mxu0 %v4202_v39  ;;  %3872 = vmatpush3.bf16.msra.mxu1 %v4203_v40  ;;  %v4240_v39 = vld [vmem:[%s5456_s5 + $0x368] sm:$0xff]  }
 0x23b   :  { %3851 = vmatprep.subr.bf16.mxu0 %v4204_v43  ;;  %3873 = vmatprep.subr.bf16.mxu1 %v4205_v44  ;;  %v4241_v40 = vld [vmem:[%s5456_s5 + $0x3e8] sm:$0xff]   ;;  %v4244_v43 = vld [vmem:[%s5456_s5 + $0x360] sm:$0xff]  }
 0x23c   :  { %v4243_v42 = vld [vmem:[%s5456_s5 + $0x3a8] sm:$0xff]   ;;  %v4245_v44 = vld [vmem:[%s5456_s5 + $0x3e0] sm:$0xff]  }
 0x23e   :  { %3852 = vmatpush3.bf16.msra.mxu0 %v4206_v45  ;;  %3874 = vmatpush3.bf16.msra.mxu1 %v4207_v21  ;;  %v4246_v45 = vld [vmem:[%s5456_s5 + $0x320] sm:$0xff]  }
 0x23f   :  { %3853 = vmatprep.subr.bf16.mxu0 %v4208_v22  ;;  %3875 = vmatprep.subr.bf16.mxu1 %v4209_v23  ;;  %v4247_v21 = vld [vmem:[%s5456_s5 + $0x3a0] sm:$0xff]   ;;  %v4248_v22 = vld [vmem:[%s5456_s5 + $0x358] sm:$0xff]  }
 0x240   :  { %v4249_v23 = vld [vmem:[%s5456_s5 + $0x3d8] sm:$0xff]  }
 0x242   :  { %3854 = vmatpush3.bf16.msra.mxu0 %v4210_v25  ;;  %3876 = vmatpush3.bf16.msra.mxu1 %v4211_v26  ;;  %v4250_v25 = vld [vmem:[%s5456_s5 + $0x318] sm:$0xff]  }
 0x243   :  { %3855 = vmatprep.subr.bf16.mxu0 %v4212_v27  ;;  %3877 = vmatprep.subr.bf16.mxu1 %v4213_v46  ;;  %v4251_v26 = vld [vmem:[%s5456_s5 + $0x398] sm:$0xff]   ;;  %v4252_v27 = vld [vmem:[%s5456_s5 + $0x350] sm:$0xff]  }
 0x244   :  { %v4253_v46 = vld [vmem:[%s5456_s5 + $0x3d0] sm:$0xff]  }
 0x246   :  { %3856 = vmatpush3.bf16.msra.mxu0 %v4214_v47  ;;  %3878 = vmatpush3.bf16.msra.mxu1 %v4215_v48  ;;  %v4254_v47 = vld [vmem:[%s5456_s5 + $0x310] sm:$0xff]  }
 0x247   :  { %3857 = vmatprep.subr.bf16.mxu0 %v4216_v49  ;;  %3879 = vmatprep.subr.bf16.mxu1 %v4217_v50  ;;  %v4255_v48 = vld [vmem:[%s5456_s5 + $0x390] sm:$0xff]   ;;  %v4256_v49 = vld [vmem:[%s5456_s5 + $0x348] sm:$0xff]  }
 0x248   :  { %v4257_v50 = vld [vmem:[%s5456_s5 + $0x3c8] sm:$0xff]  }
 0x24a   :  { %3858 = vmatpush3.bf16.msra.mxu0 %v4218_v51  ;;  %3880 = vmatpush3.bf16.msra.mxu1 %v4219_v29  ;;  %v4258_v51 = vld [vmem:[%s5456_s5 + $0x308] sm:$0xff]  }
 0x24b   :  { %3859 = vmatprep.subr.bf16.mxu0 %v4220_v53  ;;  %3881 = vmatprep.subr.bf16.mxu1 %v4221_v54  ;;  %v4259_v29 = vld [vmem:[%s5456_s5 + $0x388] sm:$0xff]  }
 0x24e   :  { %3860 = vmatpush3.bf16.msra.mxu0 %v4222_v55  ;;  %3882 = vmatpush3.bf16.msra.mxu1 %v4223_v56  ;;  %v4260_v55 = vld [vmem:[%s5456_s5 + $0x340] sm:$0xff]  }
 0x24f   :  { %v1870_v10 = vpop.f32.mrf.mxu0  ;;  %v1911_v11 = vpop.f32.mrf.mxu1  ;;  %3861 = vmatprep.subr.bf16.mxu0 %v4224_v57  ;;  %3883 = vmatprep.subr.bf16.mxu1 %v4225_v58  ;;  %v4261_v56 = vld [vmem:[%s5456_s5 + $0x3c0] sm:$0xff]  }
 0x250   :  { %v1871_v13 = vadd.f32 %v1870_v10, %v5107_v61  ;;  %v1912_v2 = vadd.f32 %v1911_v11, %v5109_v62 }
 0x251   :  { %v1872_v3 = vpop.f32.mrf.mxu0  ;;  %v1913_v52 = vpop.f32.mrf.mxu1 }
 0x252   :  { %v1873_v4 = vadd.f32 %v1872_v3, %v5111_v63  ;;  %v1914_v9 = vadd.f32 %v1913_v52, %v5113_v0  ;;  %3862 = vmatpush3.bf16.msra.mxu0 %v4226_v59  ;;  %3884 = vmatpush3.bf16.msra.mxu1 %v4227_v60  ;;  %v2008_v16 = vmax.f32 %v1871_v13, 0.0  ;;  %v2010_v61 = vmax.f32 %v1912_v2, 0.0  ;;  %v4232_v63 = vld [vmem:[%s5456_s5 + $0x378] sm:$0xff]  }
 0x253   :  { %v1874_v17 = vpop.f32.mrf.mxu0  ;;  %v1915_v62 = vpop.f32.mrf.mxu1  ;;  %3863 = vmatprep.subr.bf16.mxu0 %v4228_v12  ;;  %3885 = vmatprep.subr.bf16.mxu1 %v4229_v1  ;;  %v4233_v0 = vld [vmem:[%s5456_s5 + $0x3f8] sm:$0xff]   ;;  %v4262_v12 = vld [vmem:[%s5456_s5 + $0x300] sm:$0xff]  }
 0x254   :  { %v2009_v18 = vmax.f32 %v1873_v4, 0.0  ;;  %v2011_v19 = vmax.f32 %v1914_v9, 0.0  ;;  %v2024_v33 = vpack.c.bf16 %v2008_v16, %v2008_v16  ;;  %v2026_v34 = vpack.c.bf16 %v2010_v61, %v2010_v61  ;;  %v4263_v1 = vld [vmem:[%s5456_s5 + $0x380] sm:$0xff]  }
 0x255   :  { %v1875_v20 = vpop.f32.mrf.mxu0  ;;  %v1916_v24 = vpop.f32.mrf.mxu1  ;;  %v3552_v17 = vld [vmem:[%s5458_s6] ss:$0 sm:$0xff] }
 0x256   :  { %v2025_v28 = vpack.c.bf16 %v2009_v18, %v2009_v18  ;;  %v2027_v30 = vpack.c.bf16 %v2011_v19, %v2011_v19  ;;  %3864 = vmatpush3.bf16.msra.mxu0 %v4230_v14  ;;  %3886 = vmatpush3.bf16.msra.mxu1 %v4231_v15 }
 0x257   :  { %3893 = vmatprep.subr.bf16.mxu0 %v4232_v63  ;;  %3915 = vmatprep.subr.bf16.mxu1 %v4233_v0 }
 0x258   :  { %3255 = vmatprep.mubr.bf16.mxu0 %v2025_v28  ;;  %3295 = vmatprep.mubr.bf16.mxu1 %v2027_v30 }
 0x259   :  { %3256 = vmatmul.mubr.bf16.vlgmr.msra.gmra.mxu0 %v2024_v33  ;;  %3296 = vmatmul.mubr.bf16.vlgmr.msra.gmra.mxu1 %v2026_v34 }
 0x25a   :  { %3894 = vmatpush3.bf16.msra.mxu0 %v4234_v31  ;;  %3916 = vmatpush3.bf16.msra.mxu1 %v4235_v32 }
 0x25b   :  { %3895 = vmatprep.subr.bf16.mxu0 %v4236_v35  ;;  %3917 = vmatprep.subr.bf16.mxu1 %v4237_v38 }
 0x25e   :  { %3896 = vmatpush3.bf16.msra.mxu0 %v4238_v36  ;;  %3918 = vmatpush3.bf16.msra.mxu1 %v4239_v37 }
 0x25f   :  { %3897 = vmatprep.subr.bf16.mxu0 %v4240_v39  ;;  %3919 = vmatprep.subr.bf16.mxu1 %v4241_v40 }
 0x262   :  { %3898 = vmatpush3.bf16.msra.mxu0 %v4242_v41  ;;  %3920 = vmatpush3.bf16.msra.mxu1 %v4243_v42 }
 0x263   :  { %3899 = vmatprep.subr.bf16.mxu0 %v4244_v43  ;;  %3921 = vmatprep.subr.bf16.mxu1 %v4245_v44 }
 0x266   :  { %3900 = vmatpush3.bf16.msra.mxu0 %v4246_v45  ;;  %3922 = vmatpush3.bf16.msra.mxu1 %v4247_v21 }
 0x267   :  { %3901 = vmatprep.subr.bf16.mxu0 %v4248_v22  ;;  %3923 = vmatprep.subr.bf16.mxu1 %v4249_v23 }
 0x26a   :  { %3902 = vmatpush3.bf16.msra.mxu0 %v4250_v25  ;;  %3924 = vmatpush3.bf16.msra.mxu1 %v4251_v26 }
 0x26b   :  { %3903 = vmatprep.subr.bf16.mxu0 %v4252_v27  ;;  %3925 = vmatprep.subr.bf16.mxu1 %v4253_v46 }
 0x26e   :  { %3904 = vmatpush3.bf16.msra.mxu0 %v4254_v47  ;;  %3926 = vmatpush3.bf16.msra.mxu1 %v4255_v48 }
 0x26f   :  { %v1952_v53 = vpop.f32.mrf.mxu0  ;;  %v1993_v54 = vpop.f32.mrf.mxu1  ;;  %3905 = vmatprep.subr.bf16.mxu0 %v4256_v49  ;;  %3927 = vmatprep.subr.bf16.mxu1 %v4257_v50 }
 0x270   :  { %v1953_v57 = vadd.f32 %v1952_v53, %v5121_v5  ;;  %v1994_v58 = vadd.f32 %v1993_v54, %v5125_v6 }
 0x271   :  { %v1954_v59 = vpop.f32.mrf.mxu0  ;;  %v1995_v60 = vpop.f32.mrf.mxu1 }
 0x272   :  { %v1955_v10 = vadd.f32 %v1954_v59, %v5129_v7  ;;  %v1996_v11 = vadd.f32 %v1995_v60, %v5133_v8  ;;  %3906 = vmatpush3.bf16.msra.mxu0 %v4258_v51  ;;  %3928 = vmatpush3.bf16.msra.mxu1 %v4259_v29  ;;  %v2012_v13 = vmax.f32 %v1953_v57, 0.0  ;;  %v2014_v5 = vmax.f32 %v1994_v58, 0.0 }
 0x273   :  { %v1956_v2 = vpop.f32.mrf.mxu0  ;;  %v1997_v6 = vpop.f32.mrf.mxu1  ;;  %3907 = vmatprep.subr.bf16.mxu0 %v4260_v55  ;;  %3929 = vmatprep.subr.bf16.mxu1 %v4261_v56 }
 0x274   :  { %v2013_v3 = vmax.f32 %v1955_v10, 0.0  ;;  %v2015_v7 = vmax.f32 %v1996_v11, 0.0  ;;  %v2028_v14 = vpack.c.bf16 %v2012_v13, %v2012_v13  ;;  %v2030_v15 = vpack.c.bf16 %v2014_v5, %v2014_v5 }
 0x275   :  { %v1957_v52 = vpop.f32.mrf.mxu0  ;;  %v1998_v8 = vpop.f32.mrf.mxu1 }
 0x276   :  { %v2029_v4 = vpack.c.bf16 %v2013_v3, %v2013_v3  ;;  %v2031_v9 = vpack.c.bf16 %v2015_v7, %v2015_v7  ;;  %3908 = vmatpush3.bf16.msra.mxu0 %v4262_v12  ;;  %3930 = vmatpush3.bf16.msra.mxu1 %v4263_v1 }
 0x278   :  { %3335 = vmatprep.mubr.bf16.mxu0 %v2029_v4  ;;  %3375 = vmatprep.mubr.bf16.mxu1 %v2031_v9 }
 0x279   :  { %3336 = vmatmul.mubr.bf16.vlgmr.msra.gmra.mxu0 %v2028_v14  ;;  %3376 = vmatmul.mubr.bf16.vlgmr.msra.gmra.mxu1 %v2030_v15 }
 0x2d9   :  { %v3777_v16 = vpop.f32.mrf.mxu0  ;;  %v3799_v61 = vpop.f32.mrf.mxu1 }
 0x2db   :  { %v3778_v62 = vpop.f32.mrf.mxu0  ;;  %v3800_v63 = vpop.f32.mrf.mxu1 }
 0x2dc   :  { %v3779_v0 = vadd.f32 %v3778_v62, %v3777_v16  ;;  %v3801_v18 = vadd.f32 %v3800_v63, %v3799_v61 }
 0x2dd   :  { %v3780_v19 = vpop.f32.mrf.mxu0  ;;  %v3802_v20 = vpop.f32.mrf.mxu1 }
 0x2de   :  { %v3098_v24 = vadd.f32 %v3779_v0, %v3552_v17 }
 0x2df   :  { %v3781_v28 = vpop.f32.mrf.mxu0  ;;  %v3803_v30 = vpop.f32.mrf.mxu1 }
 0x2e0   :  { %v3138_v31 = vadd.f32 %v3801_v18, %v3098_v24 }
 0x2f9   :  { %v3821_v32 = vpop.f32.mrf.mxu0  ;;  %v3843_v33 = vpop.f32.mrf.mxu1 }
 0x2fb   :  { %v3822_v34 = vpop.f32.mrf.mxu0  ;;  %v3844_v35 = vpop.f32.mrf.mxu1 }
 0x2fc   :  { %v3823_v23 = vadd.f32 %v3822_v34, %v3821_v32  ;;  %v3845_v26 = vadd.f32 %v3844_v35, %v3843_v33 }
 0x2fd   :  { %v3824_v38 = vpop.f32.mrf.mxu0  ;;  %v3846_v36 = vpop.f32.mrf.mxu1 }
 0x2fe   :  { %v3178_v25 = vadd.f32 %v3823_v23, %v3138_v31 }
 0x2ff   :  { %v3825_v37 = vpop.f32.mrf.mxu0  ;;  %v3847_v39 = vpop.f32.mrf.mxu1 }
 0x300   :  { %v3218_v46 = vadd.f32 %v3845_v26, %v3178_v25 }
 0x319   :  { %v3865_v40 = vpop.f32.mrf.mxu0  ;;  %v3887_v41 = vpop.f32.mrf.mxu1 }
 0x31b   :  { %v3866_v42 = vpop.f32.mrf.mxu0  ;;  %v3888_v43 = vpop.f32.mrf.mxu1 }
 0x31c   :  { %v3867_v27 = vadd.f32 %v3866_v42, %v3865_v40  ;;  %v3889_v50 = vadd.f32 %v3888_v43, %v3887_v41 }
 0x31d   :  { %v3868_v44 = vpop.f32.mrf.mxu0  ;;  %v3890_v45 = vpop.f32.mrf.mxu1 }
 0x31e   :  { %v3258_v47 = vadd.f32 %v3867_v27, %v3218_v46 }
 0x31f   :  { %v3869_v21 = vpop.f32.mrf.mxu0  ;;  %v3891_v22 = vpop.f32.mrf.mxu1 }
 0x320   :  { %v3298_v53 = vadd.f32 %v3889_v50, %v3258_v47 }
 0x339   :  { %v3909_v48 = vpop.f32.mrf.mxu0  ;;  %v3931_v49 = vpop.f32.mrf.mxu1 }
 0x33b   :  { %v3910_v51 = vpop.f32.mrf.mxu0  ;;  %v3932_v29 = vpop.f32.mrf.mxu1 }
 0x33c   :  { %v3911_v54 = vadd.f32 %v3910_v51, %v3909_v48  ;;  %v3933_v58 = vadd.f32 %v3932_v29, %v3931_v49 }
 0x33d   :  { %v3912_v55 = vpop.f32.mrf.mxu0  ;;  %v3934_v56 = vpop.f32.mrf.mxu1 }
 0x33e   :  { %v3338_v57 = vadd.f32 %v3911_v54, %v3298_v53 }
 0x33f   :  { %v3913_v59 = vpop.f32.mrf.mxu0  ;;  %v3935_v60 = vpop.f32.mrf.mxu1 }
 0x340   :  { %v3378_v10 = vadd.f32 %v3933_v58, %v3338_v57 }
 0x342   :  { %3383 = vst [vmem:[%s5459_s7] sm:$0xff] %v3378_v10 }

</bundles_post_ra>
